<compile_context>
chip_gen: v7x
topology: tpu7x:2x2x1
jax: 0.10.0
libtpu: 0.0.40
codegen_flags: <defaults>
</compile_context>

<pallas_src>
import functools
import math

import numpy as np

import jax
import jax.numpy as jnp
from jax.experimental import pallas as pl
from jax.experimental.pallas import tpu as pltpu

LRELU_SLOPE = 0.2
GN_EPS = 1e-5


# ----------------------------------------------------------------------------
# In-kernel helpers (2D matmuls, elementwise, lane reductions only)
# ----------------------------------------------------------------------------
def _lrelu(y):
    return jnp.where(y >= 0.0, y, LRELU_SLOPE * y)


def _gn_rows(y, r_ind, r_ind_t, inv_cnt, eps=GN_EPS):
    """GroupNorm where each group is a set of rows (x all lanes), given by r_ind.

    Lane reduction (XLU) for per-row sums, then one (G,R)x(R,2) matmul for the
    grouped [sum, sumsq] and one (R,G)x(G,2) matmul to broadcast mean/rstd back.
    """
    m1 = jnp.sum(y, axis=-1, keepdims=True)
    m2 = jnp.sum(y * y, axis=-1, keepdims=True)
    gm = jnp.dot(r_ind, jnp.concatenate([m1, m2], axis=1),
                 preferred_element_type=jnp.float32)              # (G, 2)
    mean = gm[:, 0:1] * inv_cnt
    var = jnp.maximum(gm[:, 1:2] * inv_cnt - mean * mean, 0.0)    # clamp >= 0
    rstd = jax.lax.rsqrt(var + eps)
    back = jnp.dot(r_ind_t, jnp.concatenate([mean, rstd], axis=1),
                   preferred_element_type=jnp.float32)            # (R, 2)
    return (y - back[:, 0:1]) * back[:, 1:2]


def _gn_lanes(y, c_ind, c_ind_t, inv_cnt, eps=GN_EPS):
    """GroupNorm where each group is a contiguous block of lanes within a row.

    One stats matmul on the stacked [y ; y*y] and one broadcast-back matmul.
    """
    r = y.shape[0]
    s = jnp.dot(jnp.concatenate([y, y * y], axis=0), c_ind,
                preferred_element_type=jnp.float32)               # (2R, G)
    mean = s[:r] * inv_cnt
    var = jnp.maximum(s[r:] * inv_cnt - mean * mean, 0.0)
    rstd = jax.lax.rsqrt(var + eps)
    back = jnp.dot(jnp.concatenate([mean, rstd], axis=0), c_ind_t,
                   preferred_element_type=jnp.float32)            # (2R, C)
    return (y - back[:r]) * back[r:]


# ----------------------------------------------------------------------------
# The single fused kernel
# ----------------------------------------------------------------------------
def _fused_kernel(cols1_ref, w1bd_ref, b1_ref, s2_ref, w2bd_ref,
                  gn2_rind_ref, gn2_rindt_ref, m3_ref, gn3_cind_ref,
                  gn3_cindt_ref, w4_ref, cmp_cind_ref, cmp_cindt_ref,
                  l1a_ref, l1b_ref, l2_ref, o_ref,
                  *, batch, n_taps, c3_in, gn2_inv, gn3_inv, cmp_inv):
    n2 = 2 * batch

    # ---- stage 1: conv1 (block-diagonal matmul on the patch matrix) + bias + LReLU
    h1 = jnp.dot(w1bd_ref[...], cols1_ref[...],
                 preferred_element_type=jnp.float32)              # (nf*2B, 16*16)
    h1 = _lrelu(h1 + b1_ref[...]).astype(jnp.bfloat16)

    # ---- stage 2: conv2 as 16 in-VMEM 0/1 gather matmuls + per-tap block-diag
    # weights, then GroupNorm(2*ng) + LeakyReLU fused.  Nothing leaves VMEM.
    acc2 = None
    for t in range(n_taps):
        gathered = jnp.dot(h1, s2_ref[t],
                           preferred_element_type=jnp.float32)    # (nf*2B, 8*8)
        term = jnp.dot(w2bd_ref[t], gathered.astype(jnp.bfloat16),
                       preferred_element_type=jnp.float32)        # (2nf*2B, 8*8)
        acc2 = term if acc2 is None else acc2 + term
    h2 = _lrelu(_gn_rows(acc2, gn2_rind_ref[...], gn2_rindt_ref[...], gn2_inv))

    # ---- stage 3: conv3 with the patch gather folded into per-input-channel
    # weight slabs so the result lands directly in the lane-dense (2B, 4nf*16)
    # layout conv4 needs (no lane-sparse store, no XLA reshape/transpose).
    acc3 = None
    for c in range(c3_in):
        lhs = h2[c * n2:(c + 1) * n2, :].astype(jnp.bfloat16)     # (2B, 64)
        term = jnp.dot(lhs, m3_ref[c],
                       preferred_element_type=jnp.float32)        # (2B, 4nf*16)
        acc3 = term if acc3 is None else acc3 + term
    h3 = _lrelu(_gn_lanes(acc3, gn3_cind_ref[...], gn3_cindt_ref[...], gn3_inv))
    h3 = h3.astype(jnp.bfloat16)

    # ---- stage 4: conv4 (4x4 valid) == dense matmul on flattened 4x4 features
    feats = jnp.dot(h3, w4_ref[...],
                    preferred_element_type=jnp.float32)           # (2B, 8nf)

    # ---- cmp_net.  The [fl|fr]/[fr|fl] concat never materializes: the first
    # cmp GroupNorm's groups never straddle the two halves, so GN+LReLU is
    # applied once per sample and Linear1 is split into its [own|other] halves
    # with a batch-half roll (replaces the old permutation matmul + iotas).
    g = _lrelu(_gn_lanes(feats, cmp_cind_ref[...], cmp_cindt_ref[...], cmp_inv))
    g = g.astype(jnp.bfloat16)
    u = jnp.dot(g, l1a_ref[...], preferred_element_type=jnp.float32)
    v = jnp.dot(g, l1b_ref[...], preferred_element_type=jnp.float32)
    z = u + pltpu.roll(v, shift=batch, axis=0)                    # (2B, 8nf)
    z = _lrelu(_gn_lanes(z, cmp_cind_ref[...], cmp_cindt_ref[...], cmp_inv))
    # Final Linear(8nf -> 1): VPU multiply + lane reduction.
    score = jnp.sum(z * l2_ref[...], axis=-1, keepdims=True)      # (2B, 1)
    o_ref[...] = 0.5 * (score[0:batch, :] - score[batch:n2, :])


# ----------------------------------------------------------------------------
# pallas_call wrapper (single full-VMEM block, one launch for the whole net)
# ----------------------------------------------------------------------------
def _full_spec(shape):
    return pl.BlockSpec(shape, lambda i: (0,) * len(shape))


def _fused_call(cols1, prep, batch, *, c3_in, gn2_inv, gn3_inv, cmp_inv):
    args = [cols1, prep["w1bd"], prep["b1"], prep["s2"], prep["w2bd"],
            prep["gn2_rind"], prep["gn2_rindt"], prep["m3"],
            prep["gn3_cind"], prep["gn3_cindt"], prep["w4"],
            prep["cmp_cind"], prep["cmp_cindt"],
            prep["l1a"], prep["l1b"], prep["l2"]]
    kern = functools.partial(_fused_kernel, batch=batch, n_taps=16,
                             c3_in=c3_in, gn2_inv=gn2_inv, gn3_inv=gn3_inv,
                             cmp_inv=cmp_inv)
    bytes_accessed = sum(int(a.size) * a.dtype.itemsize for a in args) + 4 * batch
    return pl.pallas_call(
        kern,
        out_shape=jax.ShapeDtypeStruct((batch, 1), jnp.float32),
        grid=(1,),
        in_specs=[_full_spec(a.shape) for a in args],
        out_specs=_full_spec((batch, 1)),
        compiler_params=pltpu.CompilerParams(
            dimension_semantics=("arbitrary",)),
        cost_estimate=pl.CostEstimate(flops=40_000_000, transcendentals=256,
                                      bytes_accessed=int(bytes_accessed)),
    )(*args)


# ----------------------------------------------------------------------------
# Host-side one-time constant construction (gather matrices, GN indicators,
# block-diagonal / folded conv weights).  Runs once at setup, outside jit.
# ----------------------------------------------------------------------------
def _gather_mats(h, w, k, stride, pad):
    """(k*k, h*w, ho*wo) 0/1 matrices: per-tap spatial gather with zero padding."""
    ho = (h + 2 * pad - k) // stride + 1
    wo = (w + 2 * pad - k) // stride + 1
    s = np.zeros((k * k, h * w, ho * wo), np.float32)
    for ki in range(k):
        for kj in range(k):
            t = ki * k + kj
            for oh in range(ho):
                ih = stride * oh + ki - pad
                if not 0 <= ih < h:
                    continue
                for ow in range(wo):
                    iw = stride * ow + kj - pad
                    if 0 <= iw < w:
                        s[t, ih * w + iw, oh * wo + ow] = 1.0
    return s, ho, wo


def _group_rows_indicator(n_ch, n_batch, group_size):
    """Rows ordered channel-major/batch-minor; group = (sample, channel block)."""
    n_groups = (n_ch // group_size) * n_batch
    ind = np.zeros((n_groups, n_ch * n_batch), np.float32)
    for c in range(n_ch):
        for b in range(n_batch):
            ind[(c // group_size) * n_batch + b, c * n_batch + b] = 1.0
    return ind


def _group_lanes_indicator(n_lanes, group_size):
    ind = np.zeros((n_lanes, n_lanes // group_size), np.float32)
    for l in range(n_lanes):
        ind[l, l // group_size] = 1.0
    return ind


# ----------------------------------------------------------------------------
# Parameter init (kaiming_uniform(gain=1) + spectral norm, as in spectral_init)
# ----------------------------------------------------------------------------
def kaiming_uniform(key, shape, fan_in, a=1.0):
    bound = math.sqrt(6.0 / ((1.0 + a * a) * fan_in))
    return jax.random.uniform(key, shape, jnp.float32, -bound, bound)


def spectral_normalize(w, key, eps=1e-12):
    # Mimics torch.nn.utils.spectral_norm's single power iteration at init.
    w_mat = w.reshape(w.shape[0], -1)
    u = jax.random.normal(key, (w_mat.shape[0],), jnp.float32)
    u = u / (jnp.linalg.norm(u) + eps)
    v = w_mat.T @ u
    v = v / (jnp.linalg.norm(v) + eps)
    u2 = w_mat @ v
    u2 = u2 / (jnp.linalg.norm(u2) + eps)
    sigma = u2 @ (w_mat @ v)
    return w / sigma


def init_params(key, nc, nf):
    cmp_nf = nf * 8
    keys = jax.random.split(key, 12)
    params = {}

    def conv_w(k_w, k_u, cout, cin):
        w = kaiming_uniform(k_w, (cout, cin, 4, 4), cin * 16)
        return spectral_normalize(w, k_u)

    params["c1_w"] = conv_w(keys[0], keys[1], nf, nc)
    params["c1_b"] = jnp.zeros((nf,), jnp.float32)
    params["c2_w"] = conv_w(keys[2], keys[3], nf * 2, nf)
    params["c3_w"] = conv_w(keys[4], keys[5], nf * 4, nf * 2)
    params["c4_w"] = conv_w(keys[6], keys[7], nf * 8, nf * 4)

    def lin_w(k_w, k_u, cout, cin):
        w = kaiming_uniform(k_w, (cout, cin), cin)
        return spectral_normalize(w, k_u)

    params["l1_w"] = lin_w(keys[8], keys[9], cmp_nf, cmp_nf * 2)
    params["l2_w"] = lin_w(keys[10], keys[11], 1, cmp_nf)
    return params


def prepare_params(params, nc, nf, batch, ng=2):
    """One-time repack: torch-layout weights -> matmul-ready kernel operands."""
    n = 2 * batch
    f32 = np.float32
    bf16 = jnp.bfloat16
    p = {}

    # conv1: block-diagonal over the batch so output rows are (channel, sample).
    w1 = np.asarray(params["c1_w"], f32).reshape(nf, nc * 16)
    p["w1bd"] = jnp.asarray(np.kron(w1, np.eye(n, dtype=f32)), dtype=bf16)
    p["b1"] = jnp.asarray(np.repeat(np.asarray(params["c1_b"], f32), n)
                          .reshape(nf * n, 1))

    # conv2: per-tap spatial gather matrices + block-diagonal per-tap weights.
    s2, _, _ = _gather_mats(16, 16, 4, 2, 1)                     # (16, 256, 64)
    p["s2"] = jnp.asarray(s2, dtype=bf16)
    w2 = np.asarray(params["c2_w"], f32).reshape(nf * 2, nf, 16)
    p["w2bd"] = jnp.asarray(
        np.stack([np.kron(w2[:, :, t], np.eye(n, dtype=f32)) for t in range(16)]),
        dtype=bf16)                                              # (16, 2nf*n, nf*n)
    gs2 = (nf * 2) // (ng * 2)
    rind2 = _group_rows_indicator(nf * 2, n, gs2)
    p["gn2_rind"] = jnp.asarray(rind2)
    p["gn2_rindt"] = jnp.asarray(rind2.T)

    # conv3: gather + weight folded into one slab per input channel, so the
    # output is produced directly in the (sample, channel*4*4) lane layout.
    s3, _, _ = _gather_mats(8, 8, 4, 2, 1)                       # (16, 64, 16)
    w3 = np.asarray(params["c3_w"], f32).reshape(nf * 4, nf * 2, 16)
    m3 = np.einsum("oct,tqs->cqos", w3, s3).reshape(nf * 2, 64, nf * 4 * 16)
    p["m3"] = jnp.asarray(m3, dtype=bf16)                        # (2nf, 64, 4nf*16)
    gs3 = (nf * 4) // (ng * 4)
    cind3 = _group_lanes_indicator(nf * 4 * 16, gs3 * 16)
    p["gn3_cind"] = jnp.asarray(cind3)
    p["gn3_cindt"] = jnp.asarray(cind3.T)

    # conv4 == linear on the flattened (channel-major) 4x4 features.
    p["w4"] = jnp.asarray(
        np.asarray(params["c4_w"], f32).reshape(nf * 8, nf * 4 * 16).T, dtype=bf16)

    # cmp_net GroupNorm indicators (groups of 4 channels) and split Linear1.
    cmp_nf, cmp_ng = nf * 8, ng * 8
    cindc = _group_lanes_indicator(cmp_nf, cmp_nf // cmp_ng)
    p["cmp_cind"] = jnp.asarray(cindc)
    p["cmp_cindt"] = jnp.asarray(cindc.T)
    l1 = np.asarray(params["l1_w"], f32)
    p["l1a"] = jnp.asarray(l1[:, :cmp_nf].T, dtype=bf16)
    p["l1b"] = jnp.asarray(l1[:, cmp_nf:].T, dtype=bf16)
    p["l2"] = jnp.asarray(np.asarray(params["l2_w"], f32).reshape(1, cmp_nf))
    return p


# ----------------------------------------------------------------------------
# Forward pass of GanCmpDOld
# ----------------------------------------------------------------------------
def gan_cmp_d_old(prep, left, right, nf, ng=2):
    batch, nc, spatial = left.shape[0], left.shape[1], left.shape[2]
    assert spatial == 32 and left.shape[3] == 32, "feature_net needs 32x32 inputs"
    assert nf % ng == 0
    # cmp_net decomposition requires the first cmp GroupNorm's groups to never
    # straddle the [fl|fr] concatenation boundary.
    assert (nf * 8) % (nf // ng) == 0
    n = 2 * batch
    comb = jnp.concatenate([left, right], axis=0)

    # Input-stage patch matrix; the only im2col left outside the fused kernel.
    # TODO(synk): pull this input-stage gather into the kernel too (manual DMA +
    # in-kernel gather) once batch/spatial make the selection constants worth it.
    ho = wo = spatial // 2
    xp = jnp.pad(comb, ((0, 0), (0, 0), (1, 1), (1, 1)))
    pats = [xp[:, :, i:i + 2 * ho:2, j:j + 2 * wo:2]
            for i in range(4) for j in range(4)]
    cols1 = (jnp.stack(pats, axis=2)            # (2B, nc, 16, Ho, Wo)
             .transpose(1, 2, 0, 3, 4)          # (nc, 16, 2B, Ho, Wo)
             .reshape(nc * 16 * n, ho * wo)
             .astype(jnp.bfloat16))

    gs = nf // ng
    out = _fused_call(
        cols1, prep, batch,
        c3_in=nf * 2,
        gn2_inv=1.0 / (gs * (spatial // 4) ** 2),
        gn3_inv=1.0 / (gs * (spatial // 8) ** 2),
        cmp_inv=1.0 / gs)
    return out.reshape(batch)


if __name__ == "__main__":
    nc, nf = 3, 8
    B, spatial = 2, 32  # spatial=32 so feature_net output is (2B, nf*8, 1, 1)

    key = jax.random.PRNGKey(0)
    k_params, k_left, k_right = jax.random.split(key, 3)
    params = init_params(k_params, nc, nf)
    prep = prepare_params(params, nc, nf, B)
    left = jax.random.normal(k_left, (B, nc, spatial, spatial), jnp.float32)
    right = jax.random.normal(k_right, (B, nc, spatial, spatial), jnp.float32)

    fwd = jax.jit(functools.partial(gan_cmp_d_old, nf=nf))
    out = jax.block_until_ready(fwd(prep, left, right))
    assert out.shape == (B,)
    print("KERNEL_OK")
</pallas_src>

<mosaic_0001>
module attributes {stable_mosaic.version = 11 : i64} {
  func.func @_fused_kernel(%arg0: i32, %arg1: memref<192x256xbf16, #tpu.memory_space<vmem>>, %arg2: memref<32x192xbf16, #tpu.memory_space<vmem>>, %arg3: memref<32x1xf32, #tpu.memory_space<vmem>>, %arg4: memref<16x256x64xbf16, #tpu.memory_space<vmem>>, %arg5: memref<16x64x32xbf16, #tpu.memory_space<vmem>>, %arg6: memref<16x64xf32, #tpu.memory_space<vmem>>, %arg7: memref<64x16xf32, #tpu.memory_space<vmem>>, %arg8: memref<16x64x512xbf16, #tpu.memory_space<vmem>>, %arg9: memref<512x8xf32, #tpu.memory_space<vmem>>, %arg10: memref<8x512xf32, #tpu.memory_space<vmem>>, %arg11: memref<512x64xbf16, #tpu.memory_space<vmem>>, %arg12: memref<64x16xf32, #tpu.memory_space<vmem>>, %arg13: memref<16x64xf32, #tpu.memory_space<vmem>>, %arg14: memref<64x64xbf16, #tpu.memory_space<vmem>>, %arg15: memref<64x64xbf16, #tpu.memory_space<vmem>>, %arg16: memref<1x64xf32, #tpu.memory_space<vmem>>, %arg17: memref<2x1xf32, #tpu.memory_space<vmem>>) attributes {dimension_semantics = [#tpu.dimension_semantics<arbitrary>], iteration_bounds = array<i64: 1>, scalar_prefetch = 0 : i64, scratch_operands = 0 : i64, tpu.core_type = #tpu.core_type<tc>, window_params = [{pipeline_mode = #tpu.pipeline_mode<synchronous>, transform_indices = @transform_0, window_bounds = array<i64: 192, 256>}, {pipeline_mode = #tpu.pipeline_mode<synchronous>, transform_indices = @transform_1, window_bounds = array<i64: 32, 192>}, {pipeline_mode = #tpu.pipeline_mode<synchronous>, transform_indices = @transform_2, window_bounds = array<i64: 32, 1>}, {pipeline_mode = #tpu.pipeline_mode<synchronous>, transform_indices = @transform_3, window_bounds = array<i64: 16, 256, 64>}, {pipeline_mode = #tpu.pipeline_mode<synchronous>, transform_indices = @transform_4, window_bounds = array<i64: 16, 64, 32>}, {pipeline_mode = #tpu.pipeline_mode<synchronous>, transform_indices = @transform_5, window_bounds = array<i64: 16, 64>}, {pipeline_mode = #tpu.pipeline_mode<synchronous>, transform_indices = @transform_6, window_bounds = array<i64: 64, 16>}, {pipeline_mode = #tpu.pipeline_mode<synchronous>, transform_indices = @transform_7, window_bounds = array<i64: 16, 64, 512>}, {pipeline_mode = #tpu.pipeline_mode<synchronous>, transform_indices = @transform_8, window_bounds = array<i64: 512, 8>}, {pipeline_mode = #tpu.pipeline_mode<synchronous>, transform_indices = @transform_9, window_bounds = array<i64: 8, 512>}, {pipeline_mode = #tpu.pipeline_mode<synchronous>, transform_indices = @transform_10, window_bounds = array<i64: 512, 64>}, {pipeline_mode = #tpu.pipeline_mode<synchronous>, transform_indices = @transform_11, window_bounds = array<i64: 64, 16>}, {pipeline_mode = #tpu.pipeline_mode<synchronous>, transform_indices = @transform_12, window_bounds = array<i64: 16, 64>}, {pipeline_mode = #tpu.pipeline_mode<synchronous>, transform_indices = @transform_13, window_bounds = array<i64: 64, 64>}, {pipeline_mode = #tpu.pipeline_mode<synchronous>, transform_indices = @transform_14, window_bounds = array<i64: 64, 64>}, {pipeline_mode = #tpu.pipeline_mode<synchronous>, transform_indices = @transform_15, window_bounds = array<i64: 1, 64>}, {pipeline_mode = #tpu.pipeline_mode<synchronous>, transform_indices = @transform_16, window_bounds = array<i64: 2, 1>}]} {
    %c0 = arith.constant 0 : index
    %c0_0 = arith.constant 0 : index
    %0 = vector.load %arg2[%c0, %c0_0] : memref<32x192xbf16, #tpu.memory_space<vmem>>, vector<32x192xbf16>
    %c0_1 = arith.constant 0 : index
    %c0_2 = arith.constant 0 : index
    %1 = vector.load %arg1[%c0_1, %c0_2] : memref<192x256xbf16, #tpu.memory_space<vmem>>, vector<192x256xbf16>
    %cst = arith.constant dense<0.000000e+00> : vector<32x256xf32>
    %2 = tpu.matmul %0, %1, %cst {dimension_numbers = #tpu.dot_dimension_numbers<[1], [0], [0], [1], [0, 0, 1, 1], [], []>} : vector<32x192xbf16>, vector<192x256xbf16>, vector<32x256xf32> -> vector<32x256xf32>
    %c0_3 = arith.constant 0 : index
    %c0_4 = arith.constant 0 : index
    %3 = vector.load %arg3[%c0_3, %c0_4] : memref<32x1xf32, #tpu.memory_space<vmem>>, vector<32x1xf32>
    %4 = vector.broadcast %3 : vector<32x1xf32> to vector<32x256xf32>
    %5 = arith.addf %2, %4 : vector<32x256xf32>
    %cst_5 = arith.constant 0.000000e+00 : f32
    %6 = vector.broadcast %cst_5 : f32 to vector<32x256xf32>
    %7 = arith.cmpf oge, %5, %6 : vector<32x256xf32>
    %cst_6 = arith.constant 2.000000e-01 : f32
    %8 = vector.broadcast %cst_6 : f32 to vector<32x256xf32>
    %9 = arith.mulf %8, %5 : vector<32x256xf32>
    %10 = arith.select %7, %5, %9 : vector<32x256xi1>, vector<32x256xf32>
    %11 = arith.truncf %10 : vector<32x256xf32> to vector<32x256xbf16>
    %c0_7 = arith.constant 0 : index
    %c0_8 = arith.constant 0 : index
    %c0_9 = arith.constant 0 : index
    %12 = vector.load %arg4[%c0_7, %c0_8, %c0_9] : memref<16x256x64xbf16, #tpu.memory_space<vmem>>, vector<1x256x64xbf16>
    %13 = vector.shape_cast %12 : vector<1x256x64xbf16> to vector<256x64xbf16>
    %cst_10 = arith.constant dense<0.000000e+00> : vector<32x64xf32>
    %14 = tpu.matmul %11, %13, %cst_10 {dimension_numbers = #tpu.dot_dimension_numbers<[1], [0], [0], [1], [0, 0, 1, 1], [], []>} : vector<32x256xbf16>, vector<256x64xbf16>, vector<32x64xf32> -> vector<32x64xf32>
    %c0_11 = arith.constant 0 : index
    %c0_12 = arith.constant 0 : index
    %c0_13 = arith.constant 0 : index
    %15 = vector.load %arg5[%c0_11, %c0_12, %c0_13] : memref<16x64x32xbf16, #tpu.memory_space<vmem>>, vector<1x64x32xbf16>
    %16 = vector.shape_cast %15 : vector<1x64x32xbf16> to vector<64x32xbf16>
    %17 = arith.truncf %14 : vector<32x64xf32> to vector<32x64xbf16>
    %cst_14 = arith.constant dense<0.000000e+00> : vector<64x64xf32>
    %18 = tpu.matmul %16, %17, %cst_14 {dimension_numbers = #tpu.dot_dimension_numbers<[1], [0], [0], [1], [0, 0, 1, 1], [], []>} : vector<64x32xbf16>, vector<32x64xbf16>, vector<64x64xf32> -> vector<64x64xf32>
    %c1 = arith.constant 1 : index
    %c0_15 = arith.constant 0 : index
    %c0_16 = arith.constant 0 : index
    %19 = vector.load %arg4[%c1, %c0_15, %c0_16] : memref<16x256x64xbf16, #tpu.memory_space<vmem>>, vector<1x256x64xbf16>
    %20 = vector.shape_cast %19 : vector<1x256x64xbf16> to vector<256x64xbf16>
    %cst_17 = arith.constant dense<0.000000e+00> : vector<32x64xf32>
    %21 = tpu.matmul %11, %20, %cst_17 {dimension_numbers = #tpu.dot_dimension_numbers<[1], [0], [0], [1], [0, 0, 1, 1], [], []>} : vector<32x256xbf16>, vector<256x64xbf16>, vector<32x64xf32> -> vector<32x64xf32>
    %c1_18 = arith.constant 1 : index
    %c0_19 = arith.constant 0 : index
    %c0_20 = arith.constant 0 : index
    %22 = vector.load %arg5[%c1_18, %c0_19, %c0_20] : memref<16x64x32xbf16, #tpu.memory_space<vmem>>, vector<1x64x32xbf16>
    %23 = vector.shape_cast %22 : vector<1x64x32xbf16> to vector<64x32xbf16>
    %24 = arith.truncf %21 : vector<32x64xf32> to vector<32x64xbf16>
    %cst_21 = arith.constant dense<0.000000e+00> : vector<64x64xf32>
    %25 = tpu.matmul %23, %24, %cst_21 {dimension_numbers = #tpu.dot_dimension_numbers<[1], [0], [0], [1], [0, 0, 1, 1], [], []>} : vector<64x32xbf16>, vector<32x64xbf16>, vector<64x64xf32> -> vector<64x64xf32>
    %26 = arith.addf %18, %25 : vector<64x64xf32>
    %c2 = arith.constant 2 : index
    %c0_22 = arith.constant 0 : index
    %c0_23 = arith.constant 0 : index
    %27 = vector.load %arg4[%c2, %c0_22, %c0_23] : memref<16x256x64xbf16, #tpu.memory_space<vmem>>, vector<1x256x64xbf16>
    %28 = vector.shape_cast %27 : vector<1x256x64xbf16> to vector<256x64xbf16>
    %cst_24 = arith.constant dense<0.000000e+00> : vector<32x64xf32>
    %29 = tpu.matmul %11, %28, %cst_24 {dimension_numbers = #tpu.dot_dimension_numbers<[1], [0], [0], [1], [0, 0, 1, 1], [], []>} : vector<32x256xbf16>, vector<256x64xbf16>, vector<32x64xf32> -> vector<32x64xf32>
    %c2_25 = arith.constant 2 : index
    %c0_26 = arith.constant 0 : index
    %c0_27 = arith.constant 0 : index
    %30 = vector.load %arg5[%c2_25, %c0_26, %c0_27] : memref<16x64x32xbf16, #tpu.memory_space<vmem>>, vector<1x64x32xbf16>
    %31 = vector.shape_cast %30 : vector<1x64x32xbf16> to vector<64x32xbf16>
    %32 = arith.truncf %29 : vector<32x64xf32> to vector<32x64xbf16>
    %cst_28 = arith.constant dense<0.000000e+00> : vector<64x64xf32>
    %33 = tpu.matmul %31, %32, %cst_28 {dimension_numbers = #tpu.dot_dimension_numbers<[1], [0], [0], [1], [0, 0, 1, 1], [], []>} : vector<64x32xbf16>, vector<32x64xbf16>, vector<64x64xf32> -> vector<64x64xf32>
    %34 = arith.addf %26, %33 : vector<64x64xf32>
    %c3 = arith.constant 3 : index
    %c0_29 = arith.constant 0 : index
    %c0_30 = arith.constant 0 : index
    %35 = vector.load %arg4[%c3, %c0_29, %c0_30] : memref<16x256x64xbf16, #tpu.memory_space<vmem>>, vector<1x256x64xbf16>
    %36 = vector.shape_cast %35 : vector<1x256x64xbf16> to vector<256x64xbf16>
    %cst_31 = arith.constant dense<0.000000e+00> : vector<32x64xf32>
    %37 = tpu.matmul %11, %36, %cst_31 {dimension_numbers = #tpu.dot_dimension_numbers<[1], [0], [0], [1], [0, 0, 1, 1], [], []>} : vector<32x256xbf16>, vector<256x64xbf16>, vector<32x64xf32> -> vector<32x64xf32>
    %c3_32 = arith.constant 3 : index
    %c0_33 = arith.constant 0 : index
    %c0_34 = arith.constant 0 : index
    %38 = vector.load %arg5[%c3_32, %c0_33, %c0_34] : memref<16x64x32xbf16, #tpu.memory_space<vmem>>, vector<1x64x32xbf16>
    %39 = vector.shape_cast %38 : vector<1x64x32xbf16> to vector<64x32xbf16>
    %40 = arith.truncf %37 : vector<32x64xf32> to vector<32x64xbf16>
    %cst_35 = arith.constant dense<0.000000e+00> : vector<64x64xf32>
    %41 = tpu.matmul %39, %40, %cst_35 {dimension_numbers = #tpu.dot_dimension_numbers<[1], [0], [0], [1], [0, 0, 1, 1], [], []>} : vector<64x32xbf16>, vector<32x64xbf16>, vector<64x64xf32> -> vector<64x64xf32>
    %42 = arith.addf %34, %41 : vector<64x64xf32>
    %c4 = arith.constant 4 : index
    %c0_36 = arith.constant 0 : index
    %c0_37 = arith.constant 0 : index
    %43 = vector.load %arg4[%c4, %c0_36, %c0_37] : memref<16x256x64xbf16, #tpu.memory_space<vmem>>, vector<1x256x64xbf16>
    %44 = vector.shape_cast %43 : vector<1x256x64xbf16> to vector<256x64xbf16>
    %cst_38 = arith.constant dense<0.000000e+00> : vector<32x64xf32>
    %45 = tpu.matmul %11, %44, %cst_38 {dimension_numbers = #tpu.dot_dimension_numbers<[1], [0], [0], [1], [0, 0, 1, 1], [], []>} : vector<32x256xbf16>, vector<256x64xbf16>, vector<32x64xf32> -> vector<32x64xf32>
    %c4_39 = arith.constant 4 : index
    %c0_40 = arith.constant 0 : index
    %c0_41 = arith.constant 0 : index
    %46 = vector.load %arg5[%c4_39, %c0_40, %c0_41] : memref<16x64x32xbf16, #tpu.memory_space<vmem>>, vector<1x64x32xbf16>
    %47 = vector.shape_cast %46 : vector<1x64x32xbf16> to vector<64x32xbf16>
    %48 = arith.truncf %45 : vector<32x64xf32> to vector<32x64xbf16>
    %cst_42 = arith.constant dense<0.000000e+00> : vector<64x64xf32>
    %49 = tpu.matmul %47, %48, %cst_42 {dimension_numbers = #tpu.dot_dimension_numbers<[1], [0], [0], [1], [0, 0, 1, 1], [], []>} : vector<64x32xbf16>, vector<32x64xbf16>, vector<64x64xf32> -> vector<64x64xf32>
    %50 = arith.addf %42, %49 : vector<64x64xf32>
    %c5 = arith.constant 5 : index
    %c0_43 = arith.constant 0 : index
    %c0_44 = arith.constant 0 : index
    %51 = vector.load %arg4[%c5, %c0_43, %c0_44] : memref<16x256x64xbf16, #tpu.memory_space<vmem>>, vector<1x256x64xbf16>
    %52 = vector.shape_cast %51 : vector<1x256x64xbf16> to vector<256x64xbf16>
    %cst_45 = arith.constant dense<0.000000e+00> : vector<32x64xf32>
    %53 = tpu.matmul %11, %52, %cst_45 {dimension_numbers = #tpu.dot_dimension_numbers<[1], [0], [0], [1], [0, 0, 1, 1], [], []>} : vector<32x256xbf16>, vector<256x64xbf16>, vector<32x64xf32> -> vector<32x64xf32>
    %c5_46 = arith.constant 5 : index
    %c0_47 = arith.constant 0 : index
    %c0_48 = arith.constant 0 : index
    %54 = vector.load %arg5[%c5_46, %c0_47, %c0_48] : memref<16x64x32xbf16, #tpu.memory_space<vmem>>, vector<1x64x32xbf16>
    %55 = vector.shape_cast %54 : vector<1x64x32xbf16> to vector<64x32xbf16>
    %56 = arith.truncf %53 : vector<32x64xf32> to vector<32x64xbf16>
    %cst_49 = arith.constant dense<0.000000e+00> : vector<64x64xf32>
    %57 = tpu.matmul %55, %56, %cst_49 {dimension_numbers = #tpu.dot_dimension_numbers<[1], [0], [0], [1], [0, 0, 1, 1], [], []>} : vector<64x32xbf16>, vector<32x64xbf16>, vector<64x64xf32> -> vector<64x64xf32>
    %58 = arith.addf %50, %57 : vector<64x64xf32>
    %c6 = arith.constant 6 : index
    %c0_50 = arith.constant 0 : index
    %c0_51 = arith.constant 0 : index
    %59 = vector.load %arg4[%c6, %c0_50, %c0_51] : memref<16x256x64xbf16, #tpu.memory_space<vmem>>, vector<1x256x64xbf16>
    %60 = vector.shape_cast %59 : vector<1x256x64xbf16> to vector<256x64xbf16>
    %cst_52 = arith.constant dense<0.000000e+00> : vector<32x64xf32>
    %61 = tpu.matmul %11, %60, %cst_52 {dimension_numbers = #tpu.dot_dimension_numbers<[1], [0], [0], [1], [0, 0, 1, 1], [], []>} : vector<32x256xbf16>, vector<256x64xbf16>, vector<32x64xf32> -> vector<32x64xf32>
    %c6_53 = arith.constant 6 : index
    %c0_54 = arith.constant 0 : index
    %c0_55 = arith.constant 0 : index
    %62 = vector.load %arg5[%c6_53, %c0_54, %c0_55] : memref<16x64x32xbf16, #tpu.memory_space<vmem>>, vector<1x64x32xbf16>
    %63 = vector.shape_cast %62 : vector<1x64x32xbf16> to vector<64x32xbf16>
    %64 = arith.truncf %61 : vector<32x64xf32> to vector<32x64xbf16>
    %cst_56 = arith.constant dense<0.000000e+00> : vector<64x64xf32>
    %65 = tpu.matmul %63, %64, %cst_56 {dimension_numbers = #tpu.dot_dimension_numbers<[1], [0], [0], [1], [0, 0, 1, 1], [], []>} : vector<64x32xbf16>, vector<32x64xbf16>, vector<64x64xf32> -> vector<64x64xf32>
    %66 = arith.addf %58, %65 : vector<64x64xf32>
    %c7 = arith.constant 7 : index
    %c0_57 = arith.constant 0 : index
    %c0_58 = arith.constant 0 : index
    %67 = vector.load %arg4[%c7, %c0_57, %c0_58] : memref<16x256x64xbf16, #tpu.memory_space<vmem>>, vector<1x256x64xbf16>
    %68 = vector.shape_cast %67 : vector<1x256x64xbf16> to vector<256x64xbf16>
    %cst_59 = arith.constant dense<0.000000e+00> : vector<32x64xf32>
    %69 = tpu.matmul %11, %68, %cst_59 {dimension_numbers = #tpu.dot_dimension_numbers<[1], [0], [0], [1], [0, 0, 1, 1], [], []>} : vector<32x256xbf16>, vector<256x64xbf16>, vector<32x64xf32> -> vector<32x64xf32>
    %c7_60 = arith.constant 7 : index
    %c0_61 = arith.constant 0 : index
    %c0_62 = arith.constant 0 : index
    %70 = vector.load %arg5[%c7_60, %c0_61, %c0_62] : memref<16x64x32xbf16, #tpu.memory_space<vmem>>, vector<1x64x32xbf16>
    %71 = vector.shape_cast %70 : vector<1x64x32xbf16> to vector<64x32xbf16>
    %72 = arith.truncf %69 : vector<32x64xf32> to vector<32x64xbf16>
    %cst_63 = arith.constant dense<0.000000e+00> : vector<64x64xf32>
    %73 = tpu.matmul %71, %72, %cst_63 {dimension_numbers = #tpu.dot_dimension_numbers<[1], [0], [0], [1], [0, 0, 1, 1], [], []>} : vector<64x32xbf16>, vector<32x64xbf16>, vector<64x64xf32> -> vector<64x64xf32>
    %74 = arith.addf %66, %73 : vector<64x64xf32>
    %c8 = arith.constant 8 : index
    %c0_64 = arith.constant 0 : index
    %c0_65 = arith.constant 0 : index
    %75 = vector.load %arg4[%c8, %c0_64, %c0_65] : memref<16x256x64xbf16, #tpu.memory_space<vmem>>, vector<1x256x64xbf16>
    %76 = vector.shape_cast %75 : vector<1x256x64xbf16> to vector<256x64xbf16>
    %cst_66 = arith.constant dense<0.000000e+00> : vector<32x64xf32>
    %77 = tpu.matmul %11, %76, %cst_66 {dimension_numbers = #tpu.dot_dimension_numbers<[1], [0], [0], [1], [0, 0, 1, 1], [], []>} : vector<32x256xbf16>, vector<256x64xbf16>, vector<32x64xf32> -> vector<32x64xf32>
    %c8_67 = arith.constant 8 : index
    %c0_68 = arith.constant 0 : index
    %c0_69 = arith.constant 0 : index
    %78 = vector.load %arg5[%c8_67, %c0_68, %c0_69] : memref<16x64x32xbf16, #tpu.memory_space<vmem>>, vector<1x64x32xbf16>
    %79 = vector.shape_cast %78 : vector<1x64x32xbf16> to vector<64x32xbf16>
    %80 = arith.truncf %77 : vector<32x64xf32> to vector<32x64xbf16>
    %cst_70 = arith.constant dense<0.000000e+00> : vector<64x64xf32>
    %81 = tpu.matmul %79, %80, %cst_70 {dimension_numbers = #tpu.dot_dimension_numbers<[1], [0], [0], [1], [0, 0, 1, 1], [], []>} : vector<64x32xbf16>, vector<32x64xbf16>, vector<64x64xf32> -> vector<64x64xf32>
    %82 = arith.addf %74, %81 : vector<64x64xf32>
    %c9 = arith.constant 9 : index
    %c0_71 = arith.constant 0 : index
    %c0_72 = arith.constant 0 : index
    %83 = vector.load %arg4[%c9, %c0_71, %c0_72] : memref<16x256x64xbf16, #tpu.memory_space<vmem>>, vector<1x256x64xbf16>
    %84 = vector.shape_cast %83 : vector<1x256x64xbf16> to vector<256x64xbf16>
    %cst_73 = arith.constant dense<0.000000e+00> : vector<32x64xf32>
    %85 = tpu.matmul %11, %84, %cst_73 {dimension_numbers = #tpu.dot_dimension_numbers<[1], [0], [0], [1], [0, 0, 1, 1], [], []>} : vector<32x256xbf16>, vector<256x64xbf16>, vector<32x64xf32> -> vector<32x64xf32>
    %c9_74 = arith.constant 9 : index
    %c0_75 = arith.constant 0 : index
    %c0_76 = arith.constant 0 : index
    %86 = vector.load %arg5[%c9_74, %c0_75, %c0_76] : memref<16x64x32xbf16, #tpu.memory_space<vmem>>, vector<1x64x32xbf16>
    %87 = vector.shape_cast %86 : vector<1x64x32xbf16> to vector<64x32xbf16>
    %88 = arith.truncf %85 : vector<32x64xf32> to vector<32x64xbf16>
    %cst_77 = arith.constant dense<0.000000e+00> : vector<64x64xf32>
    %89 = tpu.matmul %87, %88, %cst_77 {dimension_numbers = #tpu.dot_dimension_numbers<[1], [0], [0], [1], [0, 0, 1, 1], [], []>} : vector<64x32xbf16>, vector<32x64xbf16>, vector<64x64xf32> -> vector<64x64xf32>
    %90 = arith.addf %82, %89 : vector<64x64xf32>
    %c10 = arith.constant 10 : index
    %c0_78 = arith.constant 0 : index
    %c0_79 = arith.constant 0 : index
    %91 = vector.load %arg4[%c10, %c0_78, %c0_79] : memref<16x256x64xbf16, #tpu.memory_space<vmem>>, vector<1x256x64xbf16>
    %92 = vector.shape_cast %91 : vector<1x256x64xbf16> to vector<256x64xbf16>
    %cst_80 = arith.constant dense<0.000000e+00> : vector<32x64xf32>
    %93 = tpu.matmul %11, %92, %cst_80 {dimension_numbers = #tpu.dot_dimension_numbers<[1], [0], [0], [1], [0, 0, 1, 1], [], []>} : vector<32x256xbf16>, vector<256x64xbf16>, vector<32x64xf32> -> vector<32x64xf32>
    %c10_81 = arith.constant 10 : index
    %c0_82 = arith.constant 0 : index
    %c0_83 = arith.constant 0 : index
    %94 = vector.load %arg5[%c10_81, %c0_82, %c0_83] : memref<16x64x32xbf16, #tpu.memory_space<vmem>>, vector<1x64x32xbf16>
    %95 = vector.shape_cast %94 : vector<1x64x32xbf16> to vector<64x32xbf16>
    %96 = arith.truncf %93 : vector<32x64xf32> to vector<32x64xbf16>
    %cst_84 = arith.constant dense<0.000000e+00> : vector<64x64xf32>
    %97 = tpu.matmul %95, %96, %cst_84 {dimension_numbers = #tpu.dot_dimension_numbers<[1], [0], [0], [1], [0, 0, 1, 1], [], []>} : vector<64x32xbf16>, vector<32x64xbf16>, vector<64x64xf32> -> vector<64x64xf32>
    %98 = arith.addf %90, %97 : vector<64x64xf32>
    %c11 = arith.constant 11 : index
    %c0_85 = arith.constant 0 : index
    %c0_86 = arith.constant 0 : index
    %99 = vector.load %arg4[%c11, %c0_85, %c0_86] : memref<16x256x64xbf16, #tpu.memory_space<vmem>>, vector<1x256x64xbf16>
    %100 = vector.shape_cast %99 : vector<1x256x64xbf16> to vector<256x64xbf16>
    %cst_87 = arith.constant dense<0.000000e+00> : vector<32x64xf32>
    %101 = tpu.matmul %11, %100, %cst_87 {dimension_numbers = #tpu.dot_dimension_numbers<[1], [0], [0], [1], [0, 0, 1, 1], [], []>} : vector<32x256xbf16>, vector<256x64xbf16>, vector<32x64xf32> -> vector<32x64xf32>
    %c11_88 = arith.constant 11 : index
    %c0_89 = arith.constant 0 : index
    %c0_90 = arith.constant 0 : index
    %102 = vector.load %arg5[%c11_88, %c0_89, %c0_90] : memref<16x64x32xbf16, #tpu.memory_space<vmem>>, vector<1x64x32xbf16>
    %103 = vector.shape_cast %102 : vector<1x64x32xbf16> to vector<64x32xbf16>
    %104 = arith.truncf %101 : vector<32x64xf32> to vector<32x64xbf16>
    %cst_91 = arith.constant dense<0.000000e+00> : vector<64x64xf32>
    %105 = tpu.matmul %103, %104, %cst_91 {dimension_numbers = #tpu.dot_dimension_numbers<[1], [0], [0], [1], [0, 0, 1, 1], [], []>} : vector<64x32xbf16>, vector<32x64xbf16>, vector<64x64xf32> -> vector<64x64xf32>
    %106 = arith.addf %98, %105 : vector<64x64xf32>
    %c12 = arith.constant 12 : index
    %c0_92 = arith.constant 0 : index
    %c0_93 = arith.constant 0 : index
    %107 = vector.load %arg4[%c12, %c0_92, %c0_93] : memref<16x256x64xbf16, #tpu.memory_space<vmem>>, vector<1x256x64xbf16>
    %108 = vector.shape_cast %107 : vector<1x256x64xbf16> to vector<256x64xbf16>
    %cst_94 = arith.constant dense<0.000000e+00> : vector<32x64xf32>
    %109 = tpu.matmul %11, %108, %cst_94 {dimension_numbers = #tpu.dot_dimension_numbers<[1], [0], [0], [1], [0, 0, 1, 1], [], []>} : vector<32x256xbf16>, vector<256x64xbf16>, vector<32x64xf32> -> vector<32x64xf32>
    %c12_95 = arith.constant 12 : index
    %c0_96 = arith.constant 0 : index
    %c0_97 = arith.constant 0 : index
    %110 = vector.load %arg5[%c12_95, %c0_96, %c0_97] : memref<16x64x32xbf16, #tpu.memory_space<vmem>>, vector<1x64x32xbf16>
    %111 = vector.shape_cast %110 : vector<1x64x32xbf16> to vector<64x32xbf16>
    %112 = arith.truncf %109 : vector<32x64xf32> to vector<32x64xbf16>
    %cst_98 = arith.constant dense<0.000000e+00> : vector<64x64xf32>
    %113 = tpu.matmul %111, %112, %cst_98 {dimension_numbers = #tpu.dot_dimension_numbers<[1], [0], [0], [1], [0, 0, 1, 1], [], []>} : vector<64x32xbf16>, vector<32x64xbf16>, vector<64x64xf32> -> vector<64x64xf32>
    %114 = arith.addf %106, %113 : vector<64x64xf32>
    %c13 = arith.constant 13 : index
    %c0_99 = arith.constant 0 : index
    %c0_100 = arith.constant 0 : index
    %115 = vector.load %arg4[%c13, %c0_99, %c0_100] : memref<16x256x64xbf16, #tpu.memory_space<vmem>>, vector<1x256x64xbf16>
    %116 = vector.shape_cast %115 : vector<1x256x64xbf16> to vector<256x64xbf16>
    %cst_101 = arith.constant dense<0.000000e+00> : vector<32x64xf32>
    %117 = tpu.matmul %11, %116, %cst_101 {dimension_numbers = #tpu.dot_dimension_numbers<[1], [0], [0], [1], [0, 0, 1, 1], [], []>} : vector<32x256xbf16>, vector<256x64xbf16>, vector<32x64xf32> -> vector<32x64xf32>
    %c13_102 = arith.constant 13 : index
    %c0_103 = arith.constant 0 : index
    %c0_104 = arith.constant 0 : index
    %118 = vector.load %arg5[%c13_102, %c0_103, %c0_104] : memref<16x64x32xbf16, #tpu.memory_space<vmem>>, vector<1x64x32xbf16>
    %119 = vector.shape_cast %118 : vector<1x64x32xbf16> to vector<64x32xbf16>
    %120 = arith.truncf %117 : vector<32x64xf32> to vector<32x64xbf16>
    %cst_105 = arith.constant dense<0.000000e+00> : vector<64x64xf32>
    %121 = tpu.matmul %119, %120, %cst_105 {dimension_numbers = #tpu.dot_dimension_numbers<[1], [0], [0], [1], [0, 0, 1, 1], [], []>} : vector<64x32xbf16>, vector<32x64xbf16>, vector<64x64xf32> -> vector<64x64xf32>
    %122 = arith.addf %114, %121 : vector<64x64xf32>
    %c14 = arith.constant 14 : index
    %c0_106 = arith.constant 0 : index
    %c0_107 = arith.constant 0 : index
    %123 = vector.load %arg4[%c14, %c0_106, %c0_107] : memref<16x256x64xbf16, #tpu.memory_space<vmem>>, vector<1x256x64xbf16>
    %124 = vector.shape_cast %123 : vector<1x256x64xbf16> to vector<256x64xbf16>
    %cst_108 = arith.constant dense<0.000000e+00> : vector<32x64xf32>
    %125 = tpu.matmul %11, %124, %cst_108 {dimension_numbers = #tpu.dot_dimension_numbers<[1], [0], [0], [1], [0, 0, 1, 1], [], []>} : vector<32x256xbf16>, vector<256x64xbf16>, vector<32x64xf32> -> vector<32x64xf32>
    %c14_109 = arith.constant 14 : index
    %c0_110 = arith.constant 0 : index
    %c0_111 = arith.constant 0 : index
    %126 = vector.load %arg5[%c14_109, %c0_110, %c0_111] : memref<16x64x32xbf16, #tpu.memory_space<vmem>>, vector<1x64x32xbf16>
    %127 = vector.shape_cast %126 : vector<1x64x32xbf16> to vector<64x32xbf16>
    %128 = arith.truncf %125 : vector<32x64xf32> to vector<32x64xbf16>
    %cst_112 = arith.constant dense<0.000000e+00> : vector<64x64xf32>
    %129 = tpu.matmul %127, %128, %cst_112 {dimension_numbers = #tpu.dot_dimension_numbers<[1], [0], [0], [1], [0, 0, 1, 1], [], []>} : vector<64x32xbf16>, vector<32x64xbf16>, vector<64x64xf32> -> vector<64x64xf32>
    %130 = arith.addf %122, %129 : vector<64x64xf32>
    %c15 = arith.constant 15 : index
    %c0_113 = arith.constant 0 : index
    %c0_114 = arith.constant 0 : index
    %131 = vector.load %arg4[%c15, %c0_113, %c0_114] : memref<16x256x64xbf16, #tpu.memory_space<vmem>>, vector<1x256x64xbf16>
    %132 = vector.shape_cast %131 : vector<1x256x64xbf16> to vector<256x64xbf16>
    %cst_115 = arith.constant dense<0.000000e+00> : vector<32x64xf32>
    %133 = tpu.matmul %11, %132, %cst_115 {dimension_numbers = #tpu.dot_dimension_numbers<[1], [0], [0], [1], [0, 0, 1, 1], [], []>} : vector<32x256xbf16>, vector<256x64xbf16>, vector<32x64xf32> -> vector<32x64xf32>
    %c15_116 = arith.constant 15 : index
    %c0_117 = arith.constant 0 : index
    %c0_118 = arith.constant 0 : index
    %134 = vector.load %arg5[%c15_116, %c0_117, %c0_118] : memref<16x64x32xbf16, #tpu.memory_space<vmem>>, vector<1x64x32xbf16>
    %135 = vector.shape_cast %134 : vector<1x64x32xbf16> to vector<64x32xbf16>
    %136 = arith.truncf %133 : vector<32x64xf32> to vector<32x64xbf16>
    %cst_119 = arith.constant dense<0.000000e+00> : vector<64x64xf32>
    %137 = tpu.matmul %135, %136, %cst_119 {dimension_numbers = #tpu.dot_dimension_numbers<[1], [0], [0], [1], [0, 0, 1, 1], [], []>} : vector<64x32xbf16>, vector<32x64xbf16>, vector<64x64xf32> -> vector<64x64xf32>
    %138 = arith.addf %130, %137 : vector<64x64xf32>
    %c0_120 = arith.constant 0 : index
    %c0_121 = arith.constant 0 : index
    %139 = vector.load %arg6[%c0_120, %c0_121] : memref<16x64xf32, #tpu.memory_space<vmem>>, vector<16x64xf32>
    %c0_122 = arith.constant 0 : index
    %c0_123 = arith.constant 0 : index
    %140 = vector.load %arg7[%c0_122, %c0_123] : memref<64x16xf32, #tpu.memory_space<vmem>>, vector<64x16xf32>
    %cst_124 = arith.constant dense<0.000000e+00> : vector<64xf32>
    %141 = vector.multi_reduction <add>, %138, %cst_124 [1] : vector<64x64xf32> to vector<64xf32>
    %142 = vector.shape_cast %141 : vector<64xf32> to vector<64x1xf32>
    %143 = arith.mulf %138, %138 : vector<64x64xf32>
    %cst_125 = arith.constant dense<0.000000e+00> : vector<64xf32>
    %144 = vector.multi_reduction <add>, %143, %cst_125 [1] : vector<64x64xf32> to vector<64xf32>
    %145 = vector.shape_cast %144 : vector<64xf32> to vector<64x1xf32>
    %146 = tpu.concatenate %142, %145 in 1 : vector<64x1xf32>, vector<64x1xf32> -> vector<64x2xf32>
    %cst_126 = arith.constant dense<0.000000e+00> : vector<16x2xf32>
    %147 = tpu.matmul %139, %146, %cst_126 {dimension_numbers = #tpu.dot_dimension_numbers<[1], [0], [0], [1], [0, 0, 1, 1], [], []>} : vector<16x64xf32>, vector<64x2xf32>, vector<16x2xf32> -> vector<16x2xf32>
    %148 = vector.extract_strided_slice %147 {offsets = [0, 0], sizes = [16, 1], strides = [1, 1]} : vector<16x2xf32> to vector<16x1xf32>
    %cst_127 = arith.constant 3.906250e-03 : f32
    %149 = vector.broadcast %cst_127 : f32 to vector<16x1xf32>
    %150 = arith.mulf %148, %149 : vector<16x1xf32>
    %151 = vector.extract_strided_slice %147 {offsets = [0, 1], sizes = [16, 1], strides = [1, 1]} : vector<16x2xf32> to vector<16x1xf32>
    %cst_128 = arith.constant 3.906250e-03 : f32
    %152 = vector.broadcast %cst_128 : f32 to vector<16x1xf32>
    %153 = arith.mulf %151, %152 : vector<16x1xf32>
    %154 = arith.mulf %150, %150 : vector<16x1xf32>
    %155 = arith.subf %153, %154 : vector<16x1xf32>
    %cst_129 = arith.constant 0.000000e+00 : f32
    %156 = vector.broadcast %cst_129 : f32 to vector<16x1xf32>
    %157 = arith.maximumf %155, %156 : vector<16x1xf32>
    %cst_130 = arith.constant 9.99999974E-6 : f32
    %158 = vector.broadcast %cst_130 : f32 to vector<16x1xf32>
    %159 = arith.addf %157, %158 : vector<16x1xf32>
    %160 = math.rsqrt %159 : vector<16x1xf32>
    %161 = tpu.concatenate %150, %160 in 1 : vector<16x1xf32>, vector<16x1xf32> -> vector<16x2xf32>
    %cst_131 = arith.constant dense<0.000000e+00> : vector<64x2xf32>
    %162 = tpu.matmul %140, %161, %cst_131 {dimension_numbers = #tpu.dot_dimension_numbers<[1], [0], [0], [1], [0, 0, 1, 1], [], []>} : vector<64x16xf32>, vector<16x2xf32>, vector<64x2xf32> -> vector<64x2xf32>
    %163 = vector.extract_strided_slice %162 {offsets = [0, 0], sizes = [64, 1], strides = [1, 1]} : vector<64x2xf32> to vector<64x1xf32>
    %164 = vector.broadcast %163 : vector<64x1xf32> to vector<64x64xf32>
    %165 = arith.subf %138, %164 : vector<64x64xf32>
    %166 = vector.extract_strided_slice %162 {offsets = [0, 1], sizes = [64, 1], strides = [1, 1]} : vector<64x2xf32> to vector<64x1xf32>
    %167 = vector.broadcast %166 : vector<64x1xf32> to vector<64x64xf32>
    %168 = arith.mulf %165, %167 : vector<64x64xf32>
    %cst_132 = arith.constant 0.000000e+00 : f32
    %169 = vector.broadcast %cst_132 : f32 to vector<64x64xf32>
    %170 = arith.cmpf oge, %168, %169 : vector<64x64xf32>
    %cst_133 = arith.constant 2.000000e-01 : f32
    %171 = vector.broadcast %cst_133 : f32 to vector<64x64xf32>
    %172 = arith.mulf %171, %168 : vector<64x64xf32>
    %173 = arith.select %170, %168, %172 : vector<64x64xi1>, vector<64x64xf32>
    %174 = vector.extract_strided_slice %173 {offsets = [0, 0], sizes = [4, 64], strides = [1, 1]} : vector<64x64xf32> to vector<4x64xf32>
    %175 = arith.truncf %174 : vector<4x64xf32> to vector<4x64xbf16>
    %c0_134 = arith.constant 0 : index
    %c0_135 = arith.constant 0 : index
    %c0_136 = arith.constant 0 : index
    %176 = vector.load %arg8[%c0_134, %c0_135, %c0_136] : memref<16x64x512xbf16, #tpu.memory_space<vmem>>, vector<1x64x512xbf16>
    %177 = vector.shape_cast %176 : vector<1x64x512xbf16> to vector<64x512xbf16>
    %cst_137 = arith.constant dense<0.000000e+00> : vector<4x512xf32>
    %178 = tpu.matmul %175, %177, %cst_137 {dimension_numbers = #tpu.dot_dimension_numbers<[1], [0], [0], [1], [0, 0, 1, 1], [], []>} : vector<4x64xbf16>, vector<64x512xbf16>, vector<4x512xf32> -> vector<4x512xf32>
    %179 = vector.extract_strided_slice %173 {offsets = [4, 0], sizes = [4, 64], strides = [1, 1]} : vector<64x64xf32> to vector<4x64xf32>
    %180 = arith.truncf %179 : vector<4x64xf32> to vector<4x64xbf16>
    %c1_138 = arith.constant 1 : index
    %c0_139 = arith.constant 0 : index
    %c0_140 = arith.constant 0 : index
    %181 = vector.load %arg8[%c1_138, %c0_139, %c0_140] : memref<16x64x512xbf16, #tpu.memory_space<vmem>>, vector<1x64x512xbf16>
    %182 = vector.shape_cast %181 : vector<1x64x512xbf16> to vector<64x512xbf16>
    %cst_141 = arith.constant dense<0.000000e+00> : vector<4x512xf32>
    %183 = tpu.matmul %180, %182, %cst_141 {dimension_numbers = #tpu.dot_dimension_numbers<[1], [0], [0], [1], [0, 0, 1, 1], [], []>} : vector<4x64xbf16>, vector<64x512xbf16>, vector<4x512xf32> -> vector<4x512xf32>
    %184 = arith.addf %178, %183 : vector<4x512xf32>
    %185 = vector.extract_strided_slice %173 {offsets = [8, 0], sizes = [4, 64], strides = [1, 1]} : vector<64x64xf32> to vector<4x64xf32>
    %186 = arith.truncf %185 : vector<4x64xf32> to vector<4x64xbf16>
    %c2_142 = arith.constant 2 : index
    %c0_143 = arith.constant 0 : index
    %c0_144 = arith.constant 0 : index
    %187 = vector.load %arg8[%c2_142, %c0_143, %c0_144] : memref<16x64x512xbf16, #tpu.memory_space<vmem>>, vector<1x64x512xbf16>
    %188 = vector.shape_cast %187 : vector<1x64x512xbf16> to vector<64x512xbf16>
    %cst_145 = arith.constant dense<0.000000e+00> : vector<4x512xf32>
    %189 = tpu.matmul %186, %188, %cst_145 {dimension_numbers = #tpu.dot_dimension_numbers<[1], [0], [0], [1], [0, 0, 1, 1], [], []>} : vector<4x64xbf16>, vector<64x512xbf16>, vector<4x512xf32> -> vector<4x512xf32>
    %190 = arith.addf %184, %189 : vector<4x512xf32>
    %191 = vector.extract_strided_slice %173 {offsets = [12, 0], sizes = [4, 64], strides = [1, 1]} : vector<64x64xf32> to vector<4x64xf32>
    %192 = arith.truncf %191 : vector<4x64xf32> to vector<4x64xbf16>
    %c3_146 = arith.constant 3 : index
    %c0_147 = arith.constant 0 : index
    %c0_148 = arith.constant 0 : index
    %193 = vector.load %arg8[%c3_146, %c0_147, %c0_148] : memref<16x64x512xbf16, #tpu.memory_space<vmem>>, vector<1x64x512xbf16>
    %194 = vector.shape_cast %193 : vector<1x64x512xbf16> to vector<64x512xbf16>
    %cst_149 = arith.constant dense<0.000000e+00> : vector<4x512xf32>
    %195 = tpu.matmul %192, %194, %cst_149 {dimension_numbers = #tpu.dot_dimension_numbers<[1], [0], [0], [1], [0, 0, 1, 1], [], []>} : vector<4x64xbf16>, vector<64x512xbf16>, vector<4x512xf32> -> vector<4x512xf32>
    %196 = arith.addf %190, %195 : vector<4x512xf32>
    %197 = vector.extract_strided_slice %173 {offsets = [16, 0], sizes = [4, 64], strides = [1, 1]} : vector<64x64xf32> to vector<4x64xf32>
    %198 = arith.truncf %197 : vector<4x64xf32> to vector<4x64xbf16>
    %c4_150 = arith.constant 4 : index
    %c0_151 = arith.constant 0 : index
    %c0_152 = arith.constant 0 : index
    %199 = vector.load %arg8[%c4_150, %c0_151, %c0_152] : memref<16x64x512xbf16, #tpu.memory_space<vmem>>, vector<1x64x512xbf16>
    %200 = vector.shape_cast %199 : vector<1x64x512xbf16> to vector<64x512xbf16>
    %cst_153 = arith.constant dense<0.000000e+00> : vector<4x512xf32>
    %201 = tpu.matmul %198, %200, %cst_153 {dimension_numbers = #tpu.dot_dimension_numbers<[1], [0], [0], [1], [0, 0, 1, 1], [], []>} : vector<4x64xbf16>, vector<64x512xbf16>, vector<4x512xf32> -> vector<4x512xf32>
    %202 = arith.addf %196, %201 : vector<4x512xf32>
    %203 = vector.extract_strided_slice %173 {offsets = [20, 0], sizes = [4, 64], strides = [1, 1]} : vector<64x64xf32> to vector<4x64xf32>
    %204 = arith.truncf %203 : vector<4x64xf32> to vector<4x64xbf16>
    %c5_154 = arith.constant 5 : index
    %c0_155 = arith.constant 0 : index
    %c0_156 = arith.constant 0 : index
    %205 = vector.load %arg8[%c5_154, %c0_155, %c0_156] : memref<16x64x512xbf16, #tpu.memory_space<vmem>>, vector<1x64x512xbf16>
    %206 = vector.shape_cast %205 : vector<1x64x512xbf16> to vector<64x512xbf16>
    %cst_157 = arith.constant dense<0.000000e+00> : vector<4x512xf32>
    %207 = tpu.matmul %204, %206, %cst_157 {dimension_numbers = #tpu.dot_dimension_numbers<[1], [0], [0], [1], [0, 0, 1, 1], [], []>} : vector<4x64xbf16>, vector<64x512xbf16>, vector<4x512xf32> -> vector<4x512xf32>
    %208 = arith.addf %202, %207 : vector<4x512xf32>
    %209 = vector.extract_strided_slice %173 {offsets = [24, 0], sizes = [4, 64], strides = [1, 1]} : vector<64x64xf32> to vector<4x64xf32>
    %210 = arith.truncf %209 : vector<4x64xf32> to vector<4x64xbf16>
    %c6_158 = arith.constant 6 : index
    %c0_159 = arith.constant 0 : index
    %c0_160 = arith.constant 0 : index
    %211 = vector.load %arg8[%c6_158, %c0_159, %c0_160] : memref<16x64x512xbf16, #tpu.memory_space<vmem>>, vector<1x64x512xbf16>
    %212 = vector.shape_cast %211 : vector<1x64x512xbf16> to vector<64x512xbf16>
    %cst_161 = arith.constant dense<0.000000e+00> : vector<4x512xf32>
    %213 = tpu.matmul %210, %212, %cst_161 {dimension_numbers = #tpu.dot_dimension_numbers<[1], [0], [0], [1], [0, 0, 1, 1], [], []>} : vector<4x64xbf16>, vector<64x512xbf16>, vector<4x512xf32> -> vector<4x512xf32>
    %214 = arith.addf %208, %213 : vector<4x512xf32>
    %215 = vector.extract_strided_slice %173 {offsets = [28, 0], sizes = [4, 64], strides = [1, 1]} : vector<64x64xf32> to vector<4x64xf32>
    %216 = arith.truncf %215 : vector<4x64xf32> to vector<4x64xbf16>
    %c7_162 = arith.constant 7 : index
    %c0_163 = arith.constant 0 : index
    %c0_164 = arith.constant 0 : index
    %217 = vector.load %arg8[%c7_162, %c0_163, %c0_164] : memref<16x64x512xbf16, #tpu.memory_space<vmem>>, vector<1x64x512xbf16>
    %218 = vector.shape_cast %217 : vector<1x64x512xbf16> to vector<64x512xbf16>
    %cst_165 = arith.constant dense<0.000000e+00> : vector<4x512xf32>
    %219 = tpu.matmul %216, %218, %cst_165 {dimension_numbers = #tpu.dot_dimension_numbers<[1], [0], [0], [1], [0, 0, 1, 1], [], []>} : vector<4x64xbf16>, vector<64x512xbf16>, vector<4x512xf32> -> vector<4x512xf32>
    %220 = arith.addf %214, %219 : vector<4x512xf32>
    %221 = vector.extract_strided_slice %173 {offsets = [32, 0], sizes = [4, 64], strides = [1, 1]} : vector<64x64xf32> to vector<4x64xf32>
    %222 = arith.truncf %221 : vector<4x64xf32> to vector<4x64xbf16>
    %c8_166 = arith.constant 8 : index
    %c0_167 = arith.constant 0 : index
    %c0_168 = arith.constant 0 : index
    %223 = vector.load %arg8[%c8_166, %c0_167, %c0_168] : memref<16x64x512xbf16, #tpu.memory_space<vmem>>, vector<1x64x512xbf16>
    %224 = vector.shape_cast %223 : vector<1x64x512xbf16> to vector<64x512xbf16>
    %cst_169 = arith.constant dense<0.000000e+00> : vector<4x512xf32>
    %225 = tpu.matmul %222, %224, %cst_169 {dimension_numbers = #tpu.dot_dimension_numbers<[1], [0], [0], [1], [0, 0, 1, 1], [], []>} : vector<4x64xbf16>, vector<64x512xbf16>, vector<4x512xf32> -> vector<4x512xf32>
    %226 = arith.addf %220, %225 : vector<4x512xf32>
    %227 = vector.extract_strided_slice %173 {offsets = [36, 0], sizes = [4, 64], strides = [1, 1]} : vector<64x64xf32> to vector<4x64xf32>
    %228 = arith.truncf %227 : vector<4x64xf32> to vector<4x64xbf16>
    %c9_170 = arith.constant 9 : index
    %c0_171 = arith.constant 0 : index
    %c0_172 = arith.constant 0 : index
    %229 = vector.load %arg8[%c9_170, %c0_171, %c0_172] : memref<16x64x512xbf16, #tpu.memory_space<vmem>>, vector<1x64x512xbf16>
    %230 = vector.shape_cast %229 : vector<1x64x512xbf16> to vector<64x512xbf16>
    %cst_173 = arith.constant dense<0.000000e+00> : vector<4x512xf32>
    %231 = tpu.matmul %228, %230, %cst_173 {dimension_numbers = #tpu.dot_dimension_numbers<[1], [0], [0], [1], [0, 0, 1, 1], [], []>} : vector<4x64xbf16>, vector<64x512xbf16>, vector<4x512xf32> -> vector<4x512xf32>
    %232 = arith.addf %226, %231 : vector<4x512xf32>
    %233 = vector.extract_strided_slice %173 {offsets = [40, 0], sizes = [4, 64], strides = [1, 1]} : vector<64x64xf32> to vector<4x64xf32>
    %234 = arith.truncf %233 : vector<4x64xf32> to vector<4x64xbf16>
    %c10_174 = arith.constant 10 : index
    %c0_175 = arith.constant 0 : index
    %c0_176 = arith.constant 0 : index
    %235 = vector.load %arg8[%c10_174, %c0_175, %c0_176] : memref<16x64x512xbf16, #tpu.memory_space<vmem>>, vector<1x64x512xbf16>
    %236 = vector.shape_cast %235 : vector<1x64x512xbf16> to vector<64x512xbf16>
    %cst_177 = arith.constant dense<0.000000e+00> : vector<4x512xf32>
    %237 = tpu.matmul %234, %236, %cst_177 {dimension_numbers = #tpu.dot_dimension_numbers<[1], [0], [0], [1], [0, 0, 1, 1], [], []>} : vector<4x64xbf16>, vector<64x512xbf16>, vector<4x512xf32> -> vector<4x512xf32>
    %238 = arith.addf %232, %237 : vector<4x512xf32>
    %239 = vector.extract_strided_slice %173 {offsets = [44, 0], sizes = [4, 64], strides = [1, 1]} : vector<64x64xf32> to vector<4x64xf32>
    %240 = arith.truncf %239 : vector<4x64xf32> to vector<4x64xbf16>
    %c11_178 = arith.constant 11 : index
    %c0_179 = arith.constant 0 : index
    %c0_180 = arith.constant 0 : index
    %241 = vector.load %arg8[%c11_178, %c0_179, %c0_180] : memref<16x64x512xbf16, #tpu.memory_space<vmem>>, vector<1x64x512xbf16>
    %242 = vector.shape_cast %241 : vector<1x64x512xbf16> to vector<64x512xbf16>
    %cst_181 = arith.constant dense<0.000000e+00> : vector<4x512xf32>
    %243 = tpu.matmul %240, %242, %cst_181 {dimension_numbers = #tpu.dot_dimension_numbers<[1], [0], [0], [1], [0, 0, 1, 1], [], []>} : vector<4x64xbf16>, vector<64x512xbf16>, vector<4x512xf32> -> vector<4x512xf32>
    %244 = arith.addf %238, %243 : vector<4x512xf32>
    %245 = vector.extract_strided_slice %173 {offsets = [48, 0], sizes = [4, 64], strides = [1, 1]} : vector<64x64xf32> to vector<4x64xf32>
    %246 = arith.truncf %245 : vector<4x64xf32> to vector<4x64xbf16>
    %c12_182 = arith.constant 12 : index
    %c0_183 = arith.constant 0 : index
    %c0_184 = arith.constant 0 : index
    %247 = vector.load %arg8[%c12_182, %c0_183, %c0_184] : memref<16x64x512xbf16, #tpu.memory_space<vmem>>, vector<1x64x512xbf16>
    %248 = vector.shape_cast %247 : vector<1x64x512xbf16> to vector<64x512xbf16>
    %cst_185 = arith.constant dense<0.000000e+00> : vector<4x512xf32>
    %249 = tpu.matmul %246, %248, %cst_185 {dimension_numbers = #tpu.dot_dimension_numbers<[1], [0], [0], [1], [0, 0, 1, 1], [], []>} : vector<4x64xbf16>, vector<64x512xbf16>, vector<4x512xf32> -> vector<4x512xf32>
    %250 = arith.addf %244, %249 : vector<4x512xf32>
    %251 = vector.extract_strided_slice %173 {offsets = [52, 0], sizes = [4, 64], strides = [1, 1]} : vector<64x64xf32> to vector<4x64xf32>
    %252 = arith.truncf %251 : vector<4x64xf32> to vector<4x64xbf16>
    %c13_186 = arith.constant 13 : index
    %c0_187 = arith.constant 0 : index
    %c0_188 = arith.constant 0 : index
    %253 = vector.load %arg8[%c13_186, %c0_187, %c0_188] : memref<16x64x512xbf16, #tpu.memory_space<vmem>>, vector<1x64x512xbf16>
    %254 = vector.shape_cast %253 : vector<1x64x512xbf16> to vector<64x512xbf16>
    %cst_189 = arith.constant dense<0.000000e+00> : vector<4x512xf32>
    %255 = tpu.matmul %252, %254, %cst_189 {dimension_numbers = #tpu.dot_dimension_numbers<[1], [0], [0], [1], [0, 0, 1, 1], [], []>} : vector<4x64xbf16>, vector<64x512xbf16>, vector<4x512xf32> -> vector<4x512xf32>
    %256 = arith.addf %250, %255 : vector<4x512xf32>
    %257 = vector.extract_strided_slice %173 {offsets = [56, 0], sizes = [4, 64], strides = [1, 1]} : vector<64x64xf32> to vector<4x64xf32>
    %258 = arith.truncf %257 : vector<4x64xf32> to vector<4x64xbf16>
    %c14_190 = arith.constant 14 : index
    %c0_191 = arith.constant 0 : index
    %c0_192 = arith.constant 0 : index
    %259 = vector.load %arg8[%c14_190, %c0_191, %c0_192] : memref<16x64x512xbf16, #tpu.memory_space<vmem>>, vector<1x64x512xbf16>
    %260 = vector.shape_cast %259 : vector<1x64x512xbf16> to vector<64x512xbf16>
    %cst_193 = arith.constant dense<0.000000e+00> : vector<4x512xf32>
    %261 = tpu.matmul %258, %260, %cst_193 {dimension_numbers = #tpu.dot_dimension_numbers<[1], [0], [0], [1], [0, 0, 1, 1], [], []>} : vector<4x64xbf16>, vector<64x512xbf16>, vector<4x512xf32> -> vector<4x512xf32>
    %262 = arith.addf %256, %261 : vector<4x512xf32>
    %263 = vector.extract_strided_slice %173 {offsets = [60, 0], sizes = [4, 64], strides = [1, 1]} : vector<64x64xf32> to vector<4x64xf32>
    %264 = arith.truncf %263 : vector<4x64xf32> to vector<4x64xbf16>
    %c15_194 = arith.constant 15 : index
    %c0_195 = arith.constant 0 : index
    %c0_196 = arith.constant 0 : index
    %265 = vector.load %arg8[%c15_194, %c0_195, %c0_196] : memref<16x64x512xbf16, #tpu.memory_space<vmem>>, vector<1x64x512xbf16>
    %266 = vector.shape_cast %265 : vector<1x64x512xbf16> to vector<64x512xbf16>
    %cst_197 = arith.constant dense<0.000000e+00> : vector<4x512xf32>
    %267 = tpu.matmul %264, %266, %cst_197 {dimension_numbers = #tpu.dot_dimension_numbers<[1], [0], [0], [1], [0, 0, 1, 1], [], []>} : vector<4x64xbf16>, vector<64x512xbf16>, vector<4x512xf32> -> vector<4x512xf32>
    %268 = arith.addf %262, %267 : vector<4x512xf32>
    %c0_198 = arith.constant 0 : index
    %c0_199 = arith.constant 0 : index
    %269 = vector.load %arg9[%c0_198, %c0_199] : memref<512x8xf32, #tpu.memory_space<vmem>>, vector<512x8xf32>
    %c0_200 = arith.constant 0 : index
    %c0_201 = arith.constant 0 : index
    %270 = vector.load %arg10[%c0_200, %c0_201] : memref<8x512xf32, #tpu.memory_space<vmem>>, vector<8x512xf32>
    %271 = arith.mulf %268, %268 : vector<4x512xf32>
    %272 = tpu.concatenate %268, %271 in 0 : vector<4x512xf32>, vector<4x512xf32> -> vector<8x512xf32>
    %cst_202 = arith.constant dense<0.000000e+00> : vector<8x8xf32>
    %273 = tpu.matmul %272, %269, %cst_202 {dimension_numbers = #tpu.dot_dimension_numbers<[1], [0], [0], [1], [0, 0, 1, 1], [], []>} : vector<8x512xf32>, vector<512x8xf32>, vector<8x8xf32> -> vector<8x8xf32>
    %274 = vector.extract_strided_slice %273 {offsets = [0, 0], sizes = [4, 8], strides = [1, 1]} : vector<8x8xf32> to vector<4x8xf32>
    %cst_203 = arith.constant 1.562500e-02 : f32
    %275 = vector.broadcast %cst_203 : f32 to vector<4x8xf32>
    %276 = arith.mulf %274, %275 : vector<4x8xf32>
    %277 = vector.extract_strided_slice %273 {offsets = [4, 0], sizes = [4, 8], strides = [1, 1]} : vector<8x8xf32> to vector<4x8xf32>
    %cst_204 = arith.constant 1.562500e-02 : f32
    %278 = vector.broadcast %cst_204 : f32 to vector<4x8xf32>
    %279 = arith.mulf %277, %278 : vector<4x8xf32>
    %280 = arith.mulf %276, %276 : vector<4x8xf32>
    %281 = arith.subf %279, %280 : vector<4x8xf32>
    %cst_205 = arith.constant 0.000000e+00 : f32
    %282 = vector.broadcast %cst_205 : f32 to vector<4x8xf32>
    %283 = arith.maximumf %281, %282 : vector<4x8xf32>
    %cst_206 = arith.constant 9.99999974E-6 : f32
    %284 = vector.broadcast %cst_206 : f32 to vector<4x8xf32>
    %285 = arith.addf %283, %284 : vector<4x8xf32>
    %286 = math.rsqrt %285 : vector<4x8xf32>
    %287 = tpu.concatenate %276, %286 in 0 : vector<4x8xf32>, vector<4x8xf32> -> vector<8x8xf32>
    %cst_207 = arith.constant dense<0.000000e+00> : vector<8x512xf32>
    %288 = tpu.matmul %287, %270, %cst_207 {dimension_numbers = #tpu.dot_dimension_numbers<[1], [0], [0], [1], [0, 0, 1, 1], [], []>} : vector<8x8xf32>, vector<8x512xf32>, vector<8x512xf32> -> vector<8x512xf32>
    %289 = vector.extract_strided_slice %288 {offsets = [0, 0], sizes = [4, 512], strides = [1, 1]} : vector<8x512xf32> to vector<4x512xf32>
    %290 = arith.subf %268, %289 : vector<4x512xf32>
    %291 = vector.extract_strided_slice %288 {offsets = [4, 0], sizes = [4, 512], strides = [1, 1]} : vector<8x512xf32> to vector<4x512xf32>
    %292 = arith.mulf %290, %291 : vector<4x512xf32>
    %cst_208 = arith.constant 0.000000e+00 : f32
    %293 = vector.broadcast %cst_208 : f32 to vector<4x512xf32>
    %294 = arith.cmpf oge, %292, %293 : vector<4x512xf32>
    %cst_209 = arith.constant 2.000000e-01 : f32
    %295 = vector.broadcast %cst_209 : f32 to vector<4x512xf32>
    %296 = arith.mulf %295, %292 : vector<4x512xf32>
    %297 = arith.select %294, %292, %296 : vector<4x512xi1>, vector<4x512xf32>
    %298 = arith.truncf %297 : vector<4x512xf32> to vector<4x512xbf16>
    %c0_210 = arith.constant 0 : index
    %c0_211 = arith.constant 0 : index
    %299 = vector.load %arg11[%c0_210, %c0_211] : memref<512x64xbf16, #tpu.memory_space<vmem>>, vector<512x64xbf16>
    %cst_212 = arith.constant dense<0.000000e+00> : vector<4x64xf32>
    %300 = tpu.matmul %298, %299, %cst_212 {dimension_numbers = #tpu.dot_dimension_numbers<[1], [0], [0], [1], [0, 0, 1, 1], [], []>} : vector<4x512xbf16>, vector<512x64xbf16>, vector<4x64xf32> -> vector<4x64xf32>
    %c0_213 = arith.constant 0 : index
    %c0_214 = arith.constant 0 : index
    %301 = vector.load %arg12[%c0_213, %c0_214] : memref<64x16xf32, #tpu.memory_space<vmem>>, vector<64x16xf32>
    %c0_215 = arith.constant 0 : index
    %c0_216 = arith.constant 0 : index
    %302 = vector.load %arg13[%c0_215, %c0_216] : memref<16x64xf32, #tpu.memory_space<vmem>>, vector<16x64xf32>
    %303 = arith.mulf %300, %300 : vector<4x64xf32>
    %304 = tpu.concatenate %300, %303 in 0 : vector<4x64xf32>, vector<4x64xf32> -> vector<8x64xf32>
    %cst_217 = arith.constant dense<0.000000e+00> : vector<8x16xf32>
    %305 = tpu.matmul %304, %301, %cst_217 {dimension_numbers = #tpu.dot_dimension_numbers<[1], [0], [0], [1], [0, 0, 1, 1], [], []>} : vector<8x64xf32>, vector<64x16xf32>, vector<8x16xf32> -> vector<8x16xf32>
    %306 = vector.extract_strided_slice %305 {offsets = [0, 0], sizes = [4, 16], strides = [1, 1]} : vector<8x16xf32> to vector<4x16xf32>
    %cst_218 = arith.constant 2.500000e-01 : f32
    %307 = vector.broadcast %cst_218 : f32 to vector<4x16xf32>
    %308 = arith.mulf %306, %307 : vector<4x16xf32>
    %309 = vector.extract_strided_slice %305 {offsets = [4, 0], sizes = [4, 16], strides = [1, 1]} : vector<8x16xf32> to vector<4x16xf32>
    %cst_219 = arith.constant 2.500000e-01 : f32
    %310 = vector.broadcast %cst_219 : f32 to vector<4x16xf32>
    %311 = arith.mulf %309, %310 : vector<4x16xf32>
    %312 = arith.mulf %308, %308 : vector<4x16xf32>
    %313 = arith.subf %311, %312 : vector<4x16xf32>
    %cst_220 = arith.constant 0.000000e+00 : f32
    %314 = vector.broadcast %cst_220 : f32 to vector<4x16xf32>
    %315 = arith.maximumf %313, %314 : vector<4x16xf32>
    %cst_221 = arith.constant 9.99999974E-6 : f32
    %316 = vector.broadcast %cst_221 : f32 to vector<4x16xf32>
    %317 = arith.addf %315, %316 : vector<4x16xf32>
    %318 = math.rsqrt %317 : vector<4x16xf32>
    %319 = tpu.concatenate %308, %318 in 0 : vector<4x16xf32>, vector<4x16xf32> -> vector<8x16xf32>
    %cst_222 = arith.constant dense<0.000000e+00> : vector<8x64xf32>
    %320 = tpu.matmul %319, %302, %cst_222 {dimension_numbers = #tpu.dot_dimension_numbers<[1], [0], [0], [1], [0, 0, 1, 1], [], []>} : vector<8x16xf32>, vector<16x64xf32>, vector<8x64xf32> -> vector<8x64xf32>
    %321 = vector.extract_strided_slice %320 {offsets = [0, 0], sizes = [4, 64], strides = [1, 1]} : vector<8x64xf32> to vector<4x64xf32>
    %322 = arith.subf %300, %321 : vector<4x64xf32>
    %323 = vector.extract_strided_slice %320 {offsets = [4, 0], sizes = [4, 64], strides = [1, 1]} : vector<8x64xf32> to vector<4x64xf32>
    %324 = arith.mulf %322, %323 : vector<4x64xf32>
    %cst_223 = arith.constant 0.000000e+00 : f32
    %325 = vector.broadcast %cst_223 : f32 to vector<4x64xf32>
    %326 = arith.cmpf oge, %324, %325 : vector<4x64xf32>
    %cst_224 = arith.constant 2.000000e-01 : f32
    %327 = vector.broadcast %cst_224 : f32 to vector<4x64xf32>
    %328 = arith.mulf %327, %324 : vector<4x64xf32>
    %329 = arith.select %326, %324, %328 : vector<4x64xi1>, vector<4x64xf32>
    %330 = arith.truncf %329 : vector<4x64xf32> to vector<4x64xbf16>
    %c0_225 = arith.constant 0 : index
    %c0_226 = arith.constant 0 : index
    %331 = vector.load %arg14[%c0_225, %c0_226] : memref<64x64xbf16, #tpu.memory_space<vmem>>, vector<64x64xbf16>
    %cst_227 = arith.constant dense<0.000000e+00> : vector<4x64xf32>
    %332 = tpu.matmul %330, %331, %cst_227 {dimension_numbers = #tpu.dot_dimension_numbers<[1], [0], [0], [1], [0, 0, 1, 1], [], []>} : vector<4x64xbf16>, vector<64x64xbf16>, vector<4x64xf32> -> vector<4x64xf32>
    %c0_228 = arith.constant 0 : index
    %c0_229 = arith.constant 0 : index
    %333 = vector.load %arg15[%c0_228, %c0_229] : memref<64x64xbf16, #tpu.memory_space<vmem>>, vector<64x64xbf16>
    %cst_230 = arith.constant dense<0.000000e+00> : vector<4x64xf32>
    %334 = tpu.matmul %330, %333, %cst_230 {dimension_numbers = #tpu.dot_dimension_numbers<[1], [0], [0], [1], [0, 0, 1, 1], [], []>} : vector<4x64xbf16>, vector<64x64xbf16>, vector<4x64xf32> -> vector<4x64xf32>
    %c2_i32 = arith.constant 2 : i32
    %335 = tpu.dynamic_rotate %334 by %c2_i32 dim 0 : vector<4x64xf32>, i32 -> vector<4x64xf32>
    %336 = arith.addf %332, %335 : vector<4x64xf32>
    %c0_231 = arith.constant 0 : index
    %c0_232 = arith.constant 0 : index
    %337 = vector.load %arg12[%c0_231, %c0_232] : memref<64x16xf32, #tpu.memory_space<vmem>>, vector<64x16xf32>
    %c0_233 = arith.constant 0 : index
    %c0_234 = arith.constant 0 : index
    %338 = vector.load %arg13[%c0_233, %c0_234] : memref<16x64xf32, #tpu.memory_space<vmem>>, vector<16x64xf32>
    %339 = arith.mulf %336, %336 : vector<4x64xf32>
    %340 = tpu.concatenate %336, %339 in 0 : vector<4x64xf32>, vector<4x64xf32> -> vector<8x64xf32>
    %cst_235 = arith.constant dense<0.000000e+00> : vector<8x16xf32>
    %341 = tpu.matmul %340, %337, %cst_235 {dimension_numbers = #tpu.dot_dimension_numbers<[1], [0], [0], [1], [0, 0, 1, 1], [], []>} : vector<8x64xf32>, vector<64x16xf32>, vector<8x16xf32> -> vector<8x16xf32>
    %342 = vector.extract_strided_slice %341 {offsets = [0, 0], sizes = [4, 16], strides = [1, 1]} : vector<8x16xf32> to vector<4x16xf32>
    %cst_236 = arith.constant 2.500000e-01 : f32
    %343 = vector.broadcast %cst_236 : f32 to vector<4x16xf32>
    %344 = arith.mulf %342, %343 : vector<4x16xf32>
    %345 = vector.extract_strided_slice %341 {offsets = [4, 0], sizes = [4, 16], strides = [1, 1]} : vector<8x16xf32> to vector<4x16xf32>
    %cst_237 = arith.constant 2.500000e-01 : f32
    %346 = vector.broadcast %cst_237 : f32 to vector<4x16xf32>
    %347 = arith.mulf %345, %346 : vector<4x16xf32>
    %348 = arith.mulf %344, %344 : vector<4x16xf32>
    %349 = arith.subf %347, %348 : vector<4x16xf32>
    %cst_238 = arith.constant 0.000000e+00 : f32
    %350 = vector.broadcast %cst_238 : f32 to vector<4x16xf32>
    %351 = arith.maximumf %349, %350 : vector<4x16xf32>
    %cst_239 = arith.constant 9.99999974E-6 : f32
    %352 = vector.broadcast %cst_239 : f32 to vector<4x16xf32>
    %353 = arith.addf %351, %352 : vector<4x16xf32>
    %354 = math.rsqrt %353 : vector<4x16xf32>
    %355 = tpu.concatenate %344, %354 in 0 : vector<4x16xf32>, vector<4x16xf32> -> vector<8x16xf32>
    %cst_240 = arith.constant dense<0.000000e+00> : vector<8x64xf32>
    %356 = tpu.matmul %355, %338, %cst_240 {dimension_numbers = #tpu.dot_dimension_numbers<[1], [0], [0], [1], [0, 0, 1, 1], [], []>} : vector<8x16xf32>, vector<16x64xf32>, vector<8x64xf32> -> vector<8x64xf32>
    %357 = vector.extract_strided_slice %356 {offsets = [0, 0], sizes = [4, 64], strides = [1, 1]} : vector<8x64xf32> to vector<4x64xf32>
    %358 = arith.subf %336, %357 : vector<4x64xf32>
    %359 = vector.extract_strided_slice %356 {offsets = [4, 0], sizes = [4, 64], strides = [1, 1]} : vector<8x64xf32> to vector<4x64xf32>
    %360 = arith.mulf %358, %359 : vector<4x64xf32>
    %cst_241 = arith.constant 0.000000e+00 : f32
    %361 = vector.broadcast %cst_241 : f32 to vector<4x64xf32>
    %362 = arith.cmpf oge, %360, %361 : vector<4x64xf32>
    %cst_242 = arith.constant 2.000000e-01 : f32
    %363 = vector.broadcast %cst_242 : f32 to vector<4x64xf32>
    %364 = arith.mulf %363, %360 : vector<4x64xf32>
    %365 = arith.select %362, %360, %364 : vector<4x64xi1>, vector<4x64xf32>
    %c0_243 = arith.constant 0 : index
    %c0_244 = arith.constant 0 : index
    %366 = vector.load %arg16[%c0_243, %c0_244] : memref<1x64xf32, #tpu.memory_space<vmem>>, vector<1x64xf32>
    %367 = vector.broadcast %366 : vector<1x64xf32> to vector<4x64xf32>
    %368 = arith.mulf %365, %367 : vector<4x64xf32>
    %cst_245 = arith.constant dense<0.000000e+00> : vector<4xf32>
    %369 = vector.multi_reduction <add>, %368, %cst_245 [1] : vector<4x64xf32> to vector<4xf32>
    %370 = vector.shape_cast %369 : vector<4xf32> to vector<4x1xf32>
    %371 = vector.extract_strided_slice %370 {offsets = [0, 0], sizes = [2, 1], strides = [1, 1]} : vector<4x1xf32> to vector<2x1xf32>
    %372 = vector.extract_strided_slice %370 {offsets = [2, 0], sizes = [2, 1], strides = [1, 1]} : vector<4x1xf32> to vector<2x1xf32>
    %373 = arith.subf %371, %372 : vector<2x1xf32>
    %cst_246 = arith.constant 5.000000e-01 : f32
    %374 = vector.broadcast %cst_246 : f32 to vector<2x1xf32>
    %375 = arith.mulf %374, %373 : vector<2x1xf32>
    %c0_247 = arith.constant 0 : index
    %c0_248 = arith.constant 0 : index
    %376 = vector.load %arg17[%c0_247, %c0_248] : memref<2x1xf32, #tpu.memory_space<vmem>>, vector<2x1xf32>
    tpu.vector_store %arg17[%c0_247, %c0_248], %375 {strides = array<i32>} : memref<2x1xf32, #tpu.memory_space<vmem>>, vector<2x1xf32>,
    return
  }
  func.func @transform_0(%arg0: i32) -> (i32, i32) {
    %c0_i32 = arith.constant 0 : i32
    %c0_i32_0 = arith.constant 0 : i32
    %c0_i32_1 = arith.constant 0 : i32
    return %c0_i32, %c0_i32_0 : i32, i32
  }
  func.func @transform_1(%arg0: i32) -> (i32, i32) {
    %c0_i32 = arith.constant 0 : i32
    %c0_i32_0 = arith.constant 0 : i32
    %c0_i32_1 = arith.constant 0 : i32
    return %c0_i32, %c0_i32_0 : i32, i32
  }
  func.func @transform_2(%arg0: i32) -> (i32, i32) {
    %c0_i32 = arith.constant 0 : i32
    %c0_i32_0 = arith.constant 0 : i32
    %c0_i32_1 = arith.constant 0 : i32
    return %c0_i32, %c0_i32_0 : i32, i32
  }
  func.func @transform_3(%arg0: i32) -> (i32, i32, i32) {
    %c0_i32 = arith.constant 0 : i32
    %c0_i32_0 = arith.constant 0 : i32
    %c0_i32_1 = arith.constant 0 : i32
    %c0_i32_2 = arith.constant 0 : i32
    return %c0_i32, %c0_i32_0, %c0_i32_1 : i32, i32, i32
  }
  func.func @transform_4(%arg0: i32) -> (i32, i32, i32) {
    %c0_i32 = arith.constant 0 : i32
    %c0_i32_0 = arith.constant 0 : i32
    %c0_i32_1 = arith.constant 0 : i32
    %c0_i32_2 = arith.constant 0 : i32
    return %c0_i32, %c0_i32_0, %c0_i32_1 : i32, i32, i32
  }
  func.func @transform_5(%arg0: i32) -> (i32, i32) {
    %c0_i32 = arith.constant 0 : i32
    %c0_i32_0 = arith.constant 0 : i32
    %c0_i32_1 = arith.constant 0 : i32
    return %c0_i32, %c0_i32_0 : i32, i32
  }
  func.func @transform_6(%arg0: i32) -> (i32, i32) {
    %c0_i32 = arith.constant 0 : i32
    %c0_i32_0 = arith.constant 0 : i32
    %c0_i32_1 = arith.constant 0 : i32
    return %c0_i32, %c0_i32_0 : i32, i32
  }
  func.func @transform_7(%arg0: i32) -> (i32, i32, i32) {
    %c0_i32 = arith.constant 0 : i32
    %c0_i32_0 = arith.constant 0 : i32
    %c0_i32_1 = arith.constant 0 : i32
    %c0_i32_2 = arith.constant 0 : i32
    return %c0_i32, %c0_i32_0, %c0_i32_1 : i32, i32, i32
  }
  func.func @transform_8(%arg0: i32) -> (i32, i32) {
    %c0_i32 = arith.constant 0 : i32
    %c0_i32_0 = arith.constant 0 : i32
    %c0_i32_1 = arith.constant 0 : i32
    return %c0_i32, %c0_i32_0 : i32, i32
  }
  func.func @transform_9(%arg0: i32) -> (i32, i32) {
    %c0_i32 = arith.constant 0 : i32
    %c0_i32_0 = arith.constant 0 : i32
    %c0_i32_1 = arith.constant 0 : i32
    return %c0_i32, %c0_i32_0 : i32, i32
  }
  func.func @transform_10(%arg0: i32) -> (i32, i32) {
    %c0_i32 = arith.constant 0 : i32
    %c0_i32_0 = arith.constant 0 : i32
    %c0_i32_1 = arith.constant 0 : i32
    return %c0_i32, %c0_i32_0 : i32, i32
  }
  func.func @transform_11(%arg0: i32) -> (i32, i32) {
    %c0_i32 = arith.constant 0 : i32
    %c0_i32_0 = arith.constant 0 : i32
    %c0_i32_1 = arith.constant 0 : i32
    return %c0_i32, %c0_i32_0 : i32, i32
  }
  func.func @transform_12(%arg0: i32) -> (i32, i32) {
    %c0_i32 = arith.constant 0 : i32
    %c0_i32_0 = arith.constant 0 : i32
    %c0_i32_1 = arith.constant 0 : i32
    return %c0_i32, %c0_i32_0 : i32, i32
  }
  func.func @transform_13(%arg0: i32) -> (i32, i32) {
    %c0_i32 = arith.constant 0 : i32
    %c0_i32_0 = arith.constant 0 : i32
    %c0_i32_1 = arith.constant 0 : i32
    return %c0_i32, %c0_i32_0 : i32, i32
  }
  func.func @transform_14(%arg0: i32) -> (i32, i32) {
    %c0_i32 = arith.constant 0 : i32
    %c0_i32_0 = arith.constant 0 : i32
    %c0_i32_1 = arith.constant 0 : i32
    return %c0_i32, %c0_i32_0 : i32, i32
  }
  func.func @transform_15(%arg0: i32) -> (i32, i32) {
    %c0_i32 = arith.constant 0 : i32
    %c0_i32_0 = arith.constant 0 : i32
    %c0_i32_1 = arith.constant 0 : i32
    return %c0_i32, %c0_i32_0 : i32, i32
  }
  func.func @transform_16(%arg0: i32) -> (i32, i32) {
    %c0_i32 = arith.constant 0 : i32
    %c0_i32_0 = arith.constant 0 : i32
    %c0_i32_1 = arith.constant 0 : i32
    return %c0_i32, %c0_i32_0 : i32, i32
  }
}

</mosaic_0001>

<bundles_post_ra>
// kernel: gan_cmp_d_old.1
= control target key start
LH: loop header
LB: loop body
LE: loop exit
PB: predicated region body
PF: predicated region fallthrough
CT: control target
= control target key end

     0   :  { %v13488_v1 = vmov 0   ;;  %vm244_vm0 = vcmask 523264   ;;  %vm728_vm9 = vcmask 261120   ;;  %vm5085_vm10 = vcmask 7168   ;;  %s13489_s27 = smov 1   ;;  %s16252_s0 = inlined_call_operand.vmem [shape: bf16[192,256], index: 0, kind: input, shape index: {}]   ;;  %s16253_s1 = inlined_call_operand.vmem [shape: bf16[32,192], index: 1, kind: input, shape index: {}]   ;;  %s16254_s2 = inlined_call_operand.vmem [shape: f32[32,1], index: 2, kind: input, shape index: {}]   ;;  %s16255_s3 = inlined_call_operand.vmem [shape: bf16[16,256,64], index: 3, kind: input, shape index: {}]   ;;  %s16256_s4 = inlined_call_operand.vmem [shape: bf16[16,64,32], index: 4, kind: input, shape index: {}]   ;;  %s16257_s5 = inlined_call_operand.vmem [shape: f32[16,64], index: 5, kind: input, shape index: {}]   ;;  %s16258_s6 = inlined_call_operand.vmem [shape: f32[64,16], index: 6, kind: input, shape index: {}]   ;;  %s16259_s7 = inlined_call_operand.vmem [shape: bf16[16,64,512], index: 7, kind: input, shape index: {}]   ;;  %s16260_s8 = inlined_call_operand.vmem [shape: f32[512,8], index: 8, kind: input, shape index: {}]   ;;  %s16261_s9 = inlined_call_operand.vmem [shape: f32[8,512], index: 9, kind: input, shape index: {}]   ;;  %s16262_s10 = inlined_call_operand.vmem [shape: bf16[512,64], index: 10, kind: input, shape index: {}]   ;;  %s16263_s11 = inlined_call_operand.vmem [shape: f32[64,16], index: 11, kind: input, shape index: {}]   ;;  %s16264_s12 = inlined_call_operand.vmem [shape: f32[16,64], index: 12, kind: input, shape index: {}]   ;;  %s16265_s14 = inlined_call_operand.vmem [shape: bf16[64,64], index: 14, kind: input, shape index: {}]   ;;  %s16266_s13 = inlined_call_operand.vmem [shape: bf16[64,64], index: 13, kind: input, shape index: {}]   ;;  %s16267_s15 = inlined_call_operand.vmem [shape: f32[1,64], index: 15, kind: input, shape index: {}]   ;;  %s16268_s16 = inlined_call_operand.vmem [shape: f32[2,1], index: 16, kind: output, shape index: {}]  }
   0x1   :  { %16270 = sst [smem:[#allocation2_spill]] %s16252_s0  ;;  %12688 = vset.pattern.permute.xlu0 %v13488_v1  ;;  %12689 = vset.pattern.permute.xlu1 %v13488_v1  ;;  %v12730_v12 = vld [vmem:[%s16253_s1 + $0x4] ss:$8 sps:$4 sm:$0xff]   ;;  %v84_v16 = vld [vmem:[%s16254_s2 + $0x10] sm:$0xff]  ;;  %v85_v20 = vld [vmem:[%s16254_s2 + $0x18] sm:$0xff]  ;;  %vm5197_vm11 = vcmask 130048  }
   0x2   :  { %s16271_s23 = sld [smem:[#allocation2_spill]]  ;;  %v82_v13 = vld [vmem:[%s16254_s2] sm:$0xff]  ;;  %9742 = vmatprep.mubr.msk.bf16.mxu0 %vm244_vm0, %v12730_v12  ;;  %v83_v17 = vld [vmem:[%s16254_s2 + $0x8] sm:$0xff]  ;;  %98 = vperm.xlu1 %12689, %v84_v16   ;;  %v12743_v27 = vld [vmem:[%s16255_s3 + $0x2d0] sm:$0xff]  }
   0x3   :  { %88 = vperm.xlu0 %12688, %v82_v13   ;;  %v12735_v19 = vld [vmem:[%s16255_s3 + $0x2c0] sm:$0xff]   ;;  %v12739_v23 = vld [vmem:[%s16255_s3 + $0x2c8] sm:$0xff]   ;;  %v12745_v29 = vld [vmem:[%s16255_s3 + $0x290] sm:$0xff]  }
   0x4   :  { %11485 = vmatprep.subr.bf16.mxu1 %v12735_v19  ;;  %v12737_v21 = vld [vmem:[%s16255_s3 + $0x280] sm:$0xff]   ;;  %v12741_v25 = vld [vmem:[%s16255_s3 + $0x288] sm:$0xff]   ;;  %v12747_v32 = vld [vmem:[%s16255_s3 + $0x2d8] sm:$0xff]  }
   0x5   :  { %11486 = vmatpush3.bf16.msra.mxu1 %v12737_v21  ;;  %v12749_v34 = vld [vmem:[%s16255_s3 + $0x298] sm:$0xff]   ;;  %v12750_v35 = vld [vmem:[%s16255_s3 + $0x2e0] sm:$0xff]   ;;  %v12754_v39 = vld [vmem:[%s16255_s3 + $0x2e8] sm:$0xff]  }
   0x6   :  { %103 = vperm.xlu1 %12689, %v85_v20   ;;  %11487 = vmatprep.subr.bf16.mxu1 %v12739_v23  ;;  %v12753_v38 = vld [vmem:[%s16255_s3 + $0x2a0] sm:$0xff]   ;;  %v12731_v43 = vld [vmem:[%s16253_s1 + $0x14] ss:$8 sps:$4 sm:$0xff]   ;;  %v12738_v45 = vld [vmem:[%s16255_s3 + $0x48] sm:$0xff]  }
   0x7   :  { %93 = vperm.xlu0 %12688, %v83_v17   ;;  %v12734_v41 = vld [vmem:[%s16255_s3 + $0x40] sm:$0xff]   ;;  %v12740_v46 = vld [vmem:[%s16255_s3 + $0x8] sm:$0xff]   ;;  %v12742_v47 = vld [vmem:[%s16255_s3 + $0x50] sm:$0xff]  }
   0x8   :  { %v12692_v0 = vld [vmem:[%s16271_s23 + $0x4] ss:$8 sps:$4 sm:$0xff]   ;;  %v12694_v2 = vld [vmem:[%s16271_s23] ss:$8 sps:$4 sm:$0xff]   ;;  %v12695_v3 = vld [vmem:[%s16271_s23 + $0x14] ss:$8 sps:$4 sm:$0xff]  }
   0x9   :  { %251 = vmatprep.subr.bf16.mxu0 %v12692_v0  ;;  %v12697_v4 = vld [vmem:[%s16271_s23 + $0x10] ss:$8 sps:$4 sm:$0xff]   ;;  %v12698_v5 = vld [vmem:[%s16271_s23 + $0x24] ss:$8 sps:$4 sm:$0xff]   ;;  %v12700_v6 = vld [vmem:[%s16271_s23 + $0x20] ss:$8 sps:$4 sm:$0xff]   ;;  %11488 = vmatpush3.bf16.msra.mxu1 %v12741_v25 }
   0xa   :  { %252 = vmatpush1.bf16.msra.mxu0 %v12694_v2  ;;  %v12701_v7 = vld [vmem:[%s16271_s23 + $0x34] ss:$8 sps:$4 sm:$0xff]   ;;  %v12703_v8 = vld [vmem:[%s16271_s23 + $0x30] ss:$8 sps:$4 sm:$0xff]   ;;  %v12704_v9 = vld [vmem:[%s16271_s23 + $0x44] ss:$8 sps:$4 sm:$0xff]   ;;  %11489 = vmatprep.subr.bf16.mxu1 %v12743_v27 }
   0xb   :  { %253 = vmatprep.subr.bf16.mxu0 %v12695_v3  ;;  %v12706_v10 = vld [vmem:[%s16271_s23 + $0x40] ss:$8 sps:$4 sm:$0xff]   ;;  %v12707_v11 = vld [vmem:[%s16271_s23 + $0x54] ss:$8 sps:$4 sm:$0xff]   ;;  %v12709_v14 = vld [vmem:[%s16271_s23 + $0x50] ss:$8 sps:$4 sm:$0xff]  }
   0xc   :  { %v12710_v15 = vld [vmem:[%s16271_s23 + $0x64] ss:$8 sps:$4 sm:$0xff]   ;;  %v12712_v18 = vld [vmem:[%s16271_s23 + $0x60] ss:$8 sps:$4 sm:$0xff]   ;;  %v12713_v22 = vld [vmem:[%s16271_s23 + $0x74] ss:$8 sps:$4 sm:$0xff]  }
   0xd   :  { %v12715_v24 = vld [vmem:[%s16271_s23 + $0x70] ss:$8 sps:$4 sm:$0xff]   ;;  %v12716_v26 = vld [vmem:[%s16271_s23 + $0x84] ss:$8 sps:$4 sm:$0xff]   ;;  %v12718_v28 = vld [vmem:[%s16271_s23 + $0x80] ss:$8 sps:$4 sm:$0xff]   ;;  %11490 = vmatpush3.bf16.msra.mxu1 %v12745_v29 }
   0xe   :  { %254 = vmatpush1.bf16.msra.mxu0 %v12697_v4  ;;  %v12719_v30 = vld [vmem:[%s16271_s23 + $0x94] ss:$8 sps:$4 sm:$0xff]   ;;  %v12721_v31 = vld [vmem:[%s16271_s23 + $0x90] ss:$8 sps:$4 sm:$0xff]   ;;  %v12722_v33 = vld [vmem:[%s16271_s23 + $0xa4] ss:$8 sps:$4 sm:$0xff]   ;;  %11491 = vmatprep.subr.bf16.mxu1 %v12747_v32 }
   0xf   :  { %255 = vmatprep.subr.bf16.mxu0 %v12698_v5  ;;  %v12724_v36 = vld [vmem:[%s16271_s23 + $0xa0] ss:$8 sps:$4 sm:$0xff]   ;;  %v12725_v37 = vld [vmem:[%s16271_s23 + $0xb4] ss:$8 sps:$4 sm:$0xff]   ;;  %v12727_v40 = vld [vmem:[%s16271_s23 + $0xb0] ss:$8 sps:$4 sm:$0xff]  }
  0x10   :  { %v12728_v42 = vld [vmem:[%s16253_s1] ss:$8 sps:$4 sm:$0xff]   ;;  %v12733_v48 = vld [vmem:[%s16253_s1 + $0x10] ss:$8 sps:$4 sm:$0xff]  }
  0x11   :  { %11492 = vmatpush3.bf16.msra.mxu1 %v12749_v34  ;;  %v12736_v44 = vld [vmem:[%s16255_s3] sm:$0xff]   ;;  %v12744_v49 = vld [vmem:[%s16255_s3 + $0x10] sm:$0xff]   ;;  %v12746_v50 = vld [vmem:[%s16255_s3 + $0x58] sm:$0xff]  }
  0x12   :  { %256 = vmatpush1.bf16.msra.mxu0 %v12700_v6  ;;  %11493 = vmatprep.subr.bf16.mxu1 %v12750_v35  ;;  %v12748_v51 = vld [vmem:[%s16255_s3 + $0x18] sm:$0xff]   ;;  %v12751_v52 = vld [vmem:[%s16255_s3 + $0x60] sm:$0xff]   ;;  %v12755_v54 = vld [vmem:[%s16255_s3 + $0x68] sm:$0xff]  }
  0x13   :  { %257 = vmatprep.subr.bf16.mxu0 %v12701_v7  ;;  %v12752_v53 = vld [vmem:[%s16255_s3 + $0x20] sm:$0xff]   ;;  %v12756_v55 = vld [vmem:[%s16255_s3 + $0x28] sm:$0xff]   ;;  %v12758_v57 = vld [vmem:[%s16255_s3 + $0x70] sm:$0xff]  }
  0x14   :  { %v12757_v56 = vld [vmem:[%s16255_s3 + $0x2a8] sm:$0xff]   ;;  %v12759_v58 = vld [vmem:[%s16255_s3 + $0x2f0] sm:$0xff]   ;;  %v12762_v61 = vld [vmem:[%s16255_s3 + $0x2f8] sm:$0xff]  }
  0x15   :  { %11494 = vmatpush3.bf16.msra.mxu1 %v12753_v38  ;;  %v12760_v59 = vld [vmem:[%s16255_s3 + $0x30] sm:$0xff]   ;;  %v12763_v62 = vld [vmem:[%s16255_s3 + $0x78] sm:$0xff]   ;;  %v12766_v2 = vld [vmem:[%s16255_s3 + $0x340] sm:$0xff]  }
  0x16   :  { %258 = vmatpush1.bf16.msra.mxu0 %v12703_v8  ;;  %11495 = vmatprep.subr.bf16.mxu1 %v12754_v39  ;;  %v12761_v60 = vld [vmem:[%s16255_s3 + $0x2b0] sm:$0xff]   ;;  %v12764_v63 = vld [vmem:[%s16255_s3 + $0x38] sm:$0xff]   ;;  %v12767_v3 = vld [vmem:[%s16255_s3 + $0xc0] sm:$0xff]  }
  0x17   :  { %259 = vmatprep.subr.bf16.mxu0 %v12704_v9  ;;  %v12765_v0 = vld [vmem:[%s16255_s3 + $0x2b8] sm:$0xff]   ;;  %v12768_v29 = vld [vmem:[%s16255_s3 + $0x80] sm:$0xff]   ;;  %v12771_v34 = vld [vmem:[%s16255_s3 + $0x348] sm:$0xff]  }
  0x19   :  { %11496 = vmatpush3.bf16.msra.mxu1 %v12757_v56  ;;  %v12780_v56 = vld [vmem:[%s16255_s3 + $0x98] sm:$0xff]  }
  0x1a   :  { %260 = vmatpush1.bf16.msra.mxu0 %v12706_v10  ;;  %11497 = vmatprep.subr.bf16.mxu1 %v12759_v58  ;;  %v12782_v58 = vld [vmem:[%s16255_s3 + $0xe0] sm:$0xff]  }
  0x1b   :  { %261 = vmatprep.subr.bf16.mxu0 %v12707_v11 }
  0x1d   :  { %11498 = vmatpush3.bf16.msra.mxu1 %v12761_v60  ;;  %v12784_v60 = vld [vmem:[%s16255_s3 + $0xa0] sm:$0xff]  }
  0x1e   :  { %262 = vmatpush1.bf16.msra.mxu0 %v12709_v14  ;;  %11499 = vmatprep.subr.bf16.mxu1 %v12762_v61  ;;  %v12785_v61 = vld [vmem:[%s16255_s3 + $0x320] sm:$0xff]  }
  0x1f   :  { %263 = vmatprep.subr.bf16.mxu0 %v12710_v15 }
  0x21   :  { %11500 = vmatpush3.bf16.msra.mxu1 %v12765_v0  ;;  %v12788_v0 = vld [vmem:[%s16255_s3 + $0xa8] sm:$0xff]  }
  0x22   :  { %264 = vmatpush1.bf16.msra.mxu0 %v12712_v18  ;;  %11519 = vmatprep.subr.bf16.mxu1 %v12766_v2  ;;  %v12789_v2 = vld [vmem:[%s16255_s3 + $0x328] sm:$0xff]  }
  0x23   :  { %265 = vmatprep.subr.bf16.mxu0 %v12713_v22 }
  0x26   :  { %266 = vmatpush1.bf16.msra.mxu0 %v12715_v24 }
  0x27   :  { %267 = vmatprep.subr.bf16.mxu0 %v12716_v26 }
  0x2a   :  { %268 = vmatpush1.bf16.msra.mxu0 %v12718_v28 }
  0x2b   :  { %269 = vmatprep.subr.bf16.mxu0 %v12719_v30  ;;  %v12769_v30 = vld [vmem:[%s16255_s3 + $0x300] sm:$0xff]  }
  0x2e   :  { %270 = vmatpush1.bf16.msra.mxu0 %v12721_v31 }
  0x2f   :  { %271 = vmatprep.subr.bf16.mxu0 %v12722_v33  ;;  %v12770_v33 = vld [vmem:[%s16255_s3 + $0xc8] sm:$0xff]  }
  0x32   :  { %272 = vmatpush1.bf16.msra.mxu0 %v12724_v36 }
  0x33   :  { %273 = vmatprep.subr.bf16.mxu0 %v12725_v37 }
  0x36   :  { %274 = vmatpush1.bf16.msra.mxu0 %v12727_v40 }
  0x37   :  { %11315 = vmatprep.subr.bf16.mxu0 %v12734_v41 }
  0x39   :  { %284 = vmatmul.mubr.bf16.vlgmr.msra.gmra.mrb[0].mxu0 %v12728_v42  ;;  %v12772_v42 = vld [vmem:[%s16255_s3 + $0x88] sm:$0xff]  }
  0x3a   :  { %9743 = vmatprep.mubr.msk.bf16.mxu0 %vm244_vm0, %v12731_v43  ;;  %11316 = vmatpush3.bf16.msra.mxu0 %v12736_v44  ;;  %v12773_v43 = vld [vmem:[%s16255_s3 + $0x308] sm:$0xff]  }
  0x3b   :  { %11317 = vmatprep.subr.bf16.mxu0 %v12738_v45 }
  0x3e   :  { %11318 = vmatpush3.bf16.msra.mxu0 %v12740_v46  ;;  %v12774_v46 = vld [vmem:[%s16255_s3 + $0xd0] sm:$0xff]  }
  0x3f   :  { %11319 = vmatprep.subr.bf16.mxu0 %v12742_v47  ;;  %v12775_v47 = vld [vmem:[%s16255_s3 + $0x350] sm:$0xff]  }
  0x41   :  { %294 = vmatmul.mubr.bf16.gmra.mrb[4].mxu0 %v12733_v48 }
  0x42   :  { %11320 = vmatpush3.bf16.msra.mxu0 %v12744_v49 }
  0x43   :  { %11321 = vmatprep.subr.bf16.mxu0 %v12746_v50 }
  0x46   :  { %11322 = vmatpush3.bf16.msra.mxu0 %v12748_v51 }
  0x47   :  { %11323 = vmatprep.subr.bf16.mxu0 %v12751_v52  ;;  %v12776_v52 = vld [vmem:[%s16255_s3 + $0x90] sm:$0xff]  }
  0x4a   :  { %11324 = vmatpush3.bf16.msra.mxu0 %v12752_v53  ;;  %v12777_v53 = vld [vmem:[%s16255_s3 + $0x310] sm:$0xff]  }
  0x4b   :  { %11325 = vmatprep.subr.bf16.mxu0 %v12755_v54  ;;  %v12778_v54 = vld [vmem:[%s16255_s3 + $0xd8] sm:$0xff]  }
  0x4e   :  { %11326 = vmatpush3.bf16.msra.mxu0 %v12756_v55  ;;  %v12779_v55 = vld [vmem:[%s16255_s3 + $0x358] sm:$0xff]  }
  0x4f   :  { %11327 = vmatprep.subr.bf16.mxu0 %v12758_v57  ;;  %v12781_v57 = vld [vmem:[%s16255_s3 + $0x318] sm:$0xff]  }
  0x52   :  { %11328 = vmatpush3.bf16.msra.mxu0 %v12760_v59  ;;  %v12783_v59 = vld [vmem:[%s16255_s3 + $0x360] sm:$0xff]  }
  0x53   :  { %11329 = vmatprep.subr.bf16.mxu0 %v12763_v62  ;;  %v12786_v62 = vld [vmem:[%s16255_s3 + $0xe8] sm:$0xff]  }
  0x56   :  { %11330 = vmatpush3.bf16.msra.mxu0 %v12764_v63  ;;  %v12787_v63 = vld [vmem:[%s16255_s3 + $0x368] sm:$0xff]  }
  0x57   :  { %11343 = vmatprep.subr.bf16.mxu0 %v12767_v3  ;;  %v12790_v3 = vld [vmem:[%s16255_s3 + $0xf0] sm:$0xff]  }
  0x81   :  { %v99_v8 = vpop.permute.xlu1 %98 }
  0x82   :  { %v89_v4 = vpop.permute.xlu0 %88 }
  0x85   :  { %v104_v25 = vpop.permute.xlu1 %103 }
  0x86   :  { %v94_v9 = vpop.permute.xlu0 %93 }
 0x10c   :  { %v285_v5 = vpop.f32.mrb[0].mxu0 }
 0x10d   :  { %v286_v6 = vadd.f32 %v285_v5, %v89_v4  ;;  %v287_v7 = vpop.f32.mrb[1].mxu0  ;;  %v12792_v5 = vld [vmem:[%s16255_s3 + $0xb0] sm:$0xff]  }
 0x10e   :  { %v288_v10 = vadd.f32 %v287_v7, %v89_v4  ;;  %v289_v11 = vpop.f32.mrb[2].mxu0  ;;  %v12791_v4 = vld [vmem:[%s16255_s3 + $0x370] sm:$0xff]   ;;  %v12794_v7 = vld [vmem:[%s16255_s3 + $0xf8] sm:$0xff]  }
 0x10f   :  { %v312_v12 = vmul.f32 0.2, %v286_v6  ;;  %v290_v13 = vadd.f32 %v289_v11, %v94_v9  ;;  %v291_v14 = vpop.f32.mrb[3].mxu0  ;;  %vm304_vm1 = vcmp.ge.f32.partialorder %v286_v6, 0.0  ;;  %v12798_v11 = vld [vmem:[%s16255_s3 + $0x440] sm:$0xff]  }
 0x110   :  { %v313_v15 = vmul.f32 0.2, %v288_v10  ;;  %v292_v16 = vadd.f32 %v291_v14, %v94_v9  ;;  %vm305_vm2 = vcmp.ge.f32.partialorder %v288_v10, 0.0  ;;  %v12796_v9 = vld [vmem:[%s16255_s3 + $0xb8] sm:$0xff]   ;;  %v12801_v14 = vld [vmem:[%s16255_s3 + $0x408] sm:$0xff]  }
 0x111   :  { %vm306_vm3 = vcmp.ge.f32.partialorder %v290_v13, 0.0  ;;  %v314_v17 = vmul.f32 0.2, %v290_v13  ;;  %v320_v19 = vsel %vm304_vm1, %v286_v6, %v312_v12  ;;  %v12793_v6 = vld [vmem:[%s16255_s3 + $0x330] sm:$0xff]   ;;  %v12799_v12 = vld [vmem:[%s16255_s3 + $0x400] sm:$0xff]  }
 0x112   :  { %vm307_vm4 = vcmp.ge.f32.partialorder %v292_v16, 0.0  ;;  %v315_v18 = vmul.f32 0.2, %v292_v16  ;;  %v321_v21 = vsel %vm305_vm2, %v288_v10, %v313_v15  ;;  %v12797_v10 = vld [vmem:[%s16255_s3 + $0x338] sm:$0xff]   ;;  %v12802_v15 = vld [vmem:[%s16255_s3 + $0x450] sm:$0xff]  }
 0x113   :  { %v322_v20 = vsel %vm306_vm3, %v290_v13, %v314_v17  ;;  %v12800_v13 = vld [vmem:[%s16255_s3 + $0x448] sm:$0xff]   ;;  %v12804_v17 = vld [vmem:[%s16255_s3 + $0x458] sm:$0xff]  }
 0x114   :  { %v13781_v22 = vpack.c.bf16 %v322_v20, %v320_v19  ;;  %v323_v23 = vsel %vm307_vm4, %v292_v16, %v315_v18  ;;  %v295_v24 = vpop.f32.mrb[4].mxu0  ;;  %v12803_v16 = vld [vmem:[%s16255_s3 + $0x410] sm:$0xff]   ;;  %v12805_v18 = vld [vmem:[%s16255_s3 + $0x418] sm:$0xff]   ;;  %v12806_v19 = vld [vmem:[%s16255_s3 + $0x460] sm:$0xff]  }
 0x115   :  { %v13783_v26 = vpack.c.bf16 %v323_v23, %v321_v21  ;;  %v296_v27 = vadd.f32 %v295_v24, %v99_v8  ;;  %v297_v28 = vpop.f32.mrb[5].mxu0  ;;  %v12807_v20 = vld [vmem:[%s16255_s3 + $0x420] sm:$0xff]   ;;  %v12808_v21 = vld [vmem:[%s16255_s3 + $0x468] sm:$0xff]   ;;  %v12810_v24 = vld [vmem:[%s16255_s3 + $0x470] sm:$0xff]  }
 0x116   :  { %v298_v31 = vadd.f32 %v297_v28, %v99_v8  ;;  %v299_v32 = vpop.f32.mrb[6].mxu0  ;;  %v12795_v8 = vld [vmem:[%s16255_s3 + $0x378] sm:$0xff]   ;;  %v12809_v23 = vld [vmem:[%s16255_s3 + $0x428] sm:$0xff]  }
 0x117   :  { %vm308_vm5 = vcmp.ge.f32.partialorder %v296_v27, 0.0  ;;  %v316_v35 = vmul.f32 0.2, %v296_v27  ;;  %v300_v36 = vadd.f32 %v299_v32, %v104_v25  ;;  %v301_v37 = vpop.f32.mrb[7].mxu0  ;;  %492 = vmatprep.mubr.bf16.mxu0 %v13783_v26  ;;  %1946 = vmatprep.mubr.bf16.mxu1 %v13783_v26  ;;  %v12813_v28 = vld [vmem:[%s16255_s3 + $0x438] sm:$0xff]   ;;  %v12817_v32 = vld [vmem:[%s16255_s3 + $0x488] sm:$0xff]  }
 0x118   :  { %vm309_vm6 = vcmp.ge.f32.partialorder %v298_v31, 0.0  ;;  %v317_v38 = vmul.f32 0.2, %v298_v31  ;;  %v302_v39 = vadd.f32 %v301_v37, %v104_v25  ;;  %493 = vmatmul.mubr.bf16.vlgmr.msra.gmra.mrb[8].mxu0 %v13781_v22  ;;  %1947 = vmatmul.mubr.bf16.vlgmr.msra.gmra.mrb[0].mxu1 %v13781_v22  ;;  %v12811_v25 = vld [vmem:[%s16255_s3 + $0x430] sm:$0xff]   ;;  %v12822_v37 = vld [vmem:[%s16255_s3 + $0x4e0] sm:$0xff]  }
 0x119   :  { %v324_v40 = vsel %vm308_vm5, %v296_v27, %v316_v35  ;;  %vm310_vm7 = vcmp.ge.f32.partialorder %v300_v36, 0.0  ;;  %v318_v41 = vmul.f32 0.2, %v300_v36  ;;  %11344 = vmatpush3.bf16.msra.mxu0 %v12768_v29  ;;  %11520 = vmatpush3.bf16.msra.mxu1 %v12769_v30  ;;  %v12812_v27 = vld [vmem:[%s16255_s3 + $0x478] sm:$0xff]   ;;  %v12814_v29 = vld [vmem:[%s16255_s3 + $0x4c0] sm:$0xff]   ;;  %vm8514_vm5 = vcmask 1043456  }
 0x11a   :  { %v325_v44 = vsel %vm309_vm6, %v298_v31, %v317_v38  ;;  %vm311_vm8 = vcmp.ge.f32.partialorder %v302_v39, 0.0  ;;  %v319_v45 = vmul.f32 0.2, %v302_v39  ;;  %11345 = vmatprep.subr.bf16.mxu0 %v12770_v33  ;;  %11521 = vmatprep.subr.bf16.mxu1 %v12771_v34  ;;  %v12815_v30 = vld [vmem:[%s16255_s3 + $0x480] sm:$0xff]   ;;  %v12816_v31 = vld [vmem:[%s16255_s3 + $0x4c8] sm:$0xff]   ;;  %v12818_v33 = vld [vmem:[%s16255_s3 + $0x4d0] sm:$0xff]  }
 0x11b   :  { %v326_v48 = vsel %vm310_vm7, %v300_v36, %v318_v41  ;;  %v12819_v34 = vld [vmem:[%s16255_s3 + $0x490] sm:$0xff]   ;;  %v12820_v35 = vld [vmem:[%s16255_s3 + $0x4d8] sm:$0xff]   ;;  %v12823_v38 = vld [vmem:[%s16255_s3 + $0x4a0] sm:$0xff]   ;;  %vm8669_vm6 = vcmask 64512  }
 0x11c   :  { %v13813_v49 = vpack.c.bf16 %v326_v48, %v324_v40  ;;  %v327_v50 = vsel %vm311_vm8, %v302_v39, %v319_v45  ;;  %v12821_v36 = vld [vmem:[%s16255_s3 + $0x498] sm:$0xff]   ;;  %v12824_v39 = vld [vmem:[%s16255_s3 + $0x4e8] sm:$0xff]   ;;  %v12826_v41 = vld [vmem:[%s16255_s3 + $0x4f0] sm:$0xff]  }
 0x11d   :  { %v13815_v51 = vpack.c.bf16 %v327_v50, %v325_v44  ;;  %11346 = vmatpush3.bf16.msra.mxu0 %v12772_v42  ;;  %11522 = vmatpush3.bf16.msra.mxu1 %v12773_v43  ;;  %v12825_v40 = vld [vmem:[%s16255_s3 + $0x4a8] sm:$0xff]   ;;  %v12827_v42 = vld [vmem:[%s16255_s3 + $0x4b0] sm:$0xff]   ;;  %v12828_v43 = vld [vmem:[%s16255_s3 + $0x4f8] sm:$0xff]  }
 0x11e   :  { %11347 = vmatprep.subr.bf16.mxu0 %v12774_v46  ;;  %11523 = vmatprep.subr.bf16.mxu1 %v12775_v47  ;;  %v12829_v44 = vld [vmem:[%s16255_s3 + $0x4b8] sm:$0xff]   ;;  %v12830_v45 = vld [vmem:[%s16255_s3 + $0x540] sm:$0xff]   ;;  %v12832_v47 = vld [vmem:[%s16255_s3 + $0x548] sm:$0xff]  }
 0x11f   :  { %500 = vmatprep.mubr.bf16.mxu0 %v13815_v51  ;;  %1954 = vmatprep.mubr.bf16.mxu1 %v13815_v51  ;;  %v12831_v46 = vld [vmem:[%s16255_s3 + $0x500] sm:$0xff]   ;;  %v12833_v48 = vld [vmem:[%s16255_s3 + $0x508] sm:$0xff]   ;;  %v12834_v50 = vld [vmem:[%s16255_s3 + $0x550] sm:$0xff]  }
 0x120   :  { %501 = vmatmul.mubr.bf16.gmra.mrb[12].mxu0 %v13813_v49  ;;  %1955 = vmatmul.mubr.bf16.gmra.mrb[4].mxu1 %v13813_v49 }
 0x121   :  { %11348 = vmatpush3.bf16.msra.mxu0 %v12776_v52  ;;  %11524 = vmatpush3.bf16.msra.mxu1 %v12777_v53  ;;  %v12835_v52 = vld [vmem:[%s16255_s3 + $0x510] sm:$0xff]   ;;  %v12836_v53 = vld [vmem:[%s16255_s3 + $0x558] sm:$0xff]  }
 0x122   :  { %680 = vmatprep.mubr.bf16.mxu0 %v13783_v26  ;;  %2240 = vmatprep.mubr.bf16.mxu1 %v13783_v26 }
 0x123   :  { %11349 = vmatprep.subr.bf16.mxu0 %v12778_v54  ;;  %11525 = vmatprep.subr.bf16.mxu1 %v12779_v55  ;;  %v12837_v54 = vld [vmem:[%s16255_s3 + $0x518] sm:$0xff]   ;;  %v12838_v55 = vld [vmem:[%s16255_s3 + $0x560] sm:$0xff]  }
 0x125   :  { %11350 = vmatpush3.bf16.msra.mxu0 %v12780_v56  ;;  %11526 = vmatpush3.bf16.msra.mxu1 %v12781_v57  ;;  %v12839_v56 = vld [vmem:[%s16255_s3 + $0x520] sm:$0xff]   ;;  %v12840_v57 = vld [vmem:[%s16255_s3 + $0x568] sm:$0xff]  }
 0x126   :  { %11351 = vmatprep.subr.bf16.mxu0 %v12782_v58  ;;  %11527 = vmatprep.subr.bf16.mxu1 %v12783_v59  ;;  %v12841_v58 = vld [vmem:[%s16255_s3 + $0x528] sm:$0xff]   ;;  %v12842_v59 = vld [vmem:[%s16255_s3 + $0x570] sm:$0xff]  }
 0x129   :  { %11352 = vmatpush3.bf16.msra.mxu0 %v12784_v60  ;;  %11528 = vmatpush3.bf16.msra.mxu1 %v12785_v61  ;;  %v12843_v60 = vld [vmem:[%s16255_s3 + $0x530] sm:$0xff]   ;;  %v12844_v61 = vld [vmem:[%s16255_s3 + $0x578] sm:$0xff]  }
 0x12a   :  { %11353 = vmatprep.subr.bf16.mxu0 %v12786_v62  ;;  %11529 = vmatprep.subr.bf16.mxu1 %v12787_v63  ;;  %v12845_v62 = vld [vmem:[%s16255_s3 + $0x538] sm:$0xff]   ;;  %v12846_v63 = vld [vmem:[%s16255_s3 + $0x640] sm:$0xff]  }
 0x12d   :  { %11354 = vmatpush3.bf16.msra.mxu0 %v12788_v0  ;;  %11530 = vmatpush3.bf16.msra.mxu1 %v12789_v2  ;;  %v12847_v0 = vld [vmem:[%s16255_s3 + $0x600] sm:$0xff]   ;;  %v12848_v2 = vld [vmem:[%s16255_s3 + $0x648] sm:$0xff]  }
 0x12e   :  { %11355 = vmatprep.subr.bf16.mxu0 %v12790_v3  ;;  %11531 = vmatprep.subr.bf16.mxu1 %v12791_v4  ;;  %v12849_v3 = vld [vmem:[%s16255_s3 + $0x608] sm:$0xff]   ;;  %v12850_v4 = vld [vmem:[%s16255_s3 + $0x650] sm:$0xff]  }
 0x131   :  { %11356 = vmatpush3.bf16.msra.mxu0 %v12792_v5  ;;  %11532 = vmatpush3.bf16.msra.mxu1 %v12793_v6  ;;  %v12851_v5 = vld [vmem:[%s16255_s3 + $0x610] sm:$0xff]   ;;  %v12894_v6 = vld [vmem:[%s16256_s4 + $0x20] sm:$0xff]  }
 0x132   :  { %11357 = vmatprep.subr.bf16.mxu0 %v12794_v7  ;;  %11533 = vmatprep.subr.bf16.mxu1 %v12795_v8  ;;  %v12852_v7 = vld [vmem:[%s16255_s3 + $0x658] sm:$0xff]  }
 0x133   :  { %v12853_v8 = vld [vmem:[%s16255_s3 + $0x618] sm:$0xff]  }
 0x135   :  { %11358 = vmatpush3.bf16.msra.mxu0 %v12796_v9  ;;  %11534 = vmatpush3.bf16.msra.mxu1 %v12797_v10  ;;  %v12854_v9 = vld [vmem:[%s16255_s3 + $0x660] sm:$0xff]  }
 0x136   :  { %11587 = vmatprep.subr.bf16.mxu1 %v12798_v11  ;;  %v12855_v10 = vld [vmem:[%s16255_s3 + $0x620] sm:$0xff]   ;;  %v12856_v11 = vld [vmem:[%s16255_s3 + $0x668] sm:$0xff]  }
 0x138   :  { %681 = vmatmul.mubr.bf16.vlgmr.msra.gmra.mrb[16].mxu0 %v13781_v22  ;;  %2241 = vmatmul.mubr.bf16.vlgmr.msra.gmra.mrb[8].mxu1 %v13781_v22 }
 0x139   :  { %688 = vmatprep.mubr.bf16.mxu0 %v13815_v51  ;;  %2248 = vmatprep.mubr.bf16.mxu1 %v13815_v51 }
 0x13a   :  { %11588 = vmatpush3.bf16.msra.mxu1 %v12799_v12  ;;  %v12857_v12 = vld [vmem:[%s16255_s3 + $0x628] sm:$0xff]  }
 0x13b   :  { %11589 = vmatprep.subr.bf16.mxu1 %v12800_v13  ;;  %v12858_v13 = vld [vmem:[%s16255_s3 + $0x670] sm:$0xff]  }
 0x13e   :  { %11590 = vmatpush3.bf16.msra.mxu1 %v12801_v14  ;;  %v12859_v14 = vld [vmem:[%s16255_s3 + $0x630] sm:$0xff]  }
 0x13f   :  { %11591 = vmatprep.subr.bf16.mxu1 %v12802_v15  ;;  %v12860_v15 = vld [vmem:[%s16255_s3 + $0x678] sm:$0xff]  }
 0x140   :  { %689 = vmatmul.mubr.bf16.gmra.mrb[20].mxu0 %v13813_v49  ;;  %2249 = vmatmul.mubr.bf16.gmra.mrb[12].mxu1 %v13813_v49 }
 0x141   :  { %2828 = vmatprep.mubr.bf16.mxu1 %v13783_v26  ;;  %12031 = vmatprep.mubr.msk.bf16.mxu0 %vm728_vm9, %v12894_v6 }
 0x142   :  { %11592 = vmatpush3.bf16.msra.mxu1 %v12803_v16  ;;  %v12861_v16 = vld [vmem:[%s16255_s3 + $0x638] sm:$0xff]  }
 0x143   :  { %11593 = vmatprep.subr.bf16.mxu1 %v12804_v17  ;;  %v12862_v17 = vld [vmem:[%s16255_s3 + $0x6c0] sm:$0xff]  }
 0x146   :  { %11594 = vmatpush3.bf16.msra.mxu1 %v12805_v18  ;;  %v12863_v18 = vld [vmem:[%s16255_s3 + $0x680] sm:$0xff]  }
 0x147   :  { %11595 = vmatprep.subr.bf16.mxu1 %v12806_v19  ;;  %v12864_v19 = vld [vmem:[%s16255_s3 + $0x6c8] sm:$0xff]  }
 0x14a   :  { %11596 = vmatpush3.bf16.msra.mxu1 %v12807_v20  ;;  %v12865_v20 = vld [vmem:[%s16255_s3 + $0x688] sm:$0xff]  }
 0x14b   :  { %11597 = vmatprep.subr.bf16.mxu1 %v12808_v21  ;;  %v12866_v21 = vld [vmem:[%s16255_s3 + $0x6d0] sm:$0xff]  }
 0x14e   :  { %11598 = vmatpush3.bf16.msra.mxu1 %v12809_v23  ;;  %v12867_v23 = vld [vmem:[%s16255_s3 + $0x690] sm:$0xff]  }
 0x14f   :  { %11599 = vmatprep.subr.bf16.mxu1 %v12810_v24  ;;  %v12868_v24 = vld [vmem:[%s16255_s3 + $0x6d8] sm:$0xff]  }
 0x152   :  { %11600 = vmatpush3.bf16.msra.mxu1 %v12811_v25  ;;  %v12869_v25 = vld [vmem:[%s16255_s3 + $0x698] sm:$0xff]  }
 0x153   :  { %11601 = vmatprep.subr.bf16.mxu1 %v12812_v27  ;;  %v12870_v27 = vld [vmem:[%s16255_s3 + $0x6e0] sm:$0xff]  }
 0x156   :  { %11602 = vmatpush3.bf16.msra.mxu1 %v12813_v28  ;;  %v12871_v28 = vld [vmem:[%s16255_s3 + $0x6a0] sm:$0xff]  }
 0x157   :  { %11621 = vmatprep.subr.bf16.mxu1 %v12814_v29  ;;  %v12872_v29 = vld [vmem:[%s16255_s3 + $0x6e8] sm:$0xff]  }
 0x159   :  { %2829 = vmatmul.mubr.bf16.vlgmr.msra.gmra.mrb[16].mxu1 %v13781_v22 }
 0x15a   :  { %2836 = vmatprep.mubr.bf16.mxu1 %v13815_v51  ;;  %11622 = vmatpush3.bf16.msra.mxu1 %v12815_v30  ;;  %v12873_v30 = vld [vmem:[%s16255_s3 + $0x6a8] sm:$0xff]  }
 0x15b   :  { %11623 = vmatprep.subr.bf16.mxu1 %v12816_v31  ;;  %v12874_v31 = vld [vmem:[%s16255_s3 + $0x6f0] sm:$0xff]  }
 0x15e   :  { %11624 = vmatpush3.bf16.msra.mxu1 %v12817_v32  ;;  %v12875_v32 = vld [vmem:[%s16255_s3 + $0x6b0] sm:$0xff]  }
 0x15f   :  { %11625 = vmatprep.subr.bf16.mxu1 %v12818_v33  ;;  %v12876_v33 = vld [vmem:[%s16255_s3 + $0x6f8] sm:$0xff]  }
 0x161   :  { %2837 = vmatmul.mubr.bf16.gmra.mrb[20].mxu1 %v13813_v49 }
 0x162   :  { %11626 = vmatpush3.bf16.msra.mxu1 %v12819_v34  ;;  %3122 = vmatprep.mubr.bf16.mxu1 %v13783_v26  ;;  %v12877_v34 = vld [vmem:[%s16255_s3 + $0x6b8] sm:$0xff]  }
 0x163   :  { %11627 = vmatprep.subr.bf16.mxu1 %v12820_v35  ;;  %v12878_v35 = vld [vmem:[%s16255_s3 + $0x740] sm:$0xff]  }
 0x166   :  { %11628 = vmatpush3.bf16.msra.mxu1 %v12821_v36  ;;  %v12879_v36 = vld [vmem:[%s16255_s3 + $0x700] sm:$0xff]  }
 0x167   :  { %11629 = vmatprep.subr.bf16.mxu1 %v12822_v37  ;;  %v12880_v37 = vld [vmem:[%s16255_s3 + $0x748] sm:$0xff]  }
 0x16a   :  { %11630 = vmatpush3.bf16.msra.mxu1 %v12823_v38  ;;  %v12881_v38 = vld [vmem:[%s16255_s3 + $0x708] sm:$0xff]  }
 0x16b   :  { %11631 = vmatprep.subr.bf16.mxu1 %v12824_v39  ;;  %v12882_v39 = vld [vmem:[%s16255_s3 + $0x750] sm:$0xff]  }
 0x16e   :  { %11632 = vmatpush3.bf16.msra.mxu1 %v12825_v40  ;;  %v12883_v40 = vld [vmem:[%s16255_s3 + $0x710] sm:$0xff]  }
 0x16f   :  { %11633 = vmatprep.subr.bf16.mxu1 %v12826_v41  ;;  %v12884_v41 = vld [vmem:[%s16255_s3 + $0x758] sm:$0xff]  }
 0x172   :  { %11634 = vmatpush3.bf16.msra.mxu1 %v12827_v42  ;;  %v12885_v42 = vld [vmem:[%s16255_s3 + $0x718] sm:$0xff]  }
 0x173   :  { %11635 = vmatprep.subr.bf16.mxu1 %v12828_v43  ;;  %v12886_v43 = vld [vmem:[%s16255_s3 + $0x760] sm:$0xff]  }
 0x176   :  { %11636 = vmatpush3.bf16.msra.mxu1 %v12829_v44  ;;  %v12887_v44 = vld [vmem:[%s16255_s3 + $0x720] sm:$0xff]  }
 0x177   :  { %11655 = vmatprep.subr.bf16.mxu1 %v12830_v45  ;;  %v12888_v45 = vld [vmem:[%s16255_s3 + $0x768] sm:$0xff]  }
 0x179   :  { %3123 = vmatmul.mubr.bf16.vlgmr.msra.gmra.mrb[24].mxu1 %v13781_v22 }
 0x17a   :  { %3130 = vmatprep.mubr.bf16.mxu1 %v13815_v51  ;;  %11656 = vmatpush3.bf16.msra.mxu1 %v12831_v46  ;;  %v12889_v46 = vld [vmem:[%s16255_s3 + $0x728] sm:$0xff]  }
 0x17b   :  { %11657 = vmatprep.subr.bf16.mxu1 %v12832_v47 }
 0x17e   :  { %11658 = vmatpush3.bf16.msra.mxu1 %v12833_v48 }
 0x17f   :  { %11659 = vmatprep.subr.bf16.mxu1 %v12834_v50  ;;  %v12890_v50 = vld [vmem:[%s16255_s3 + $0x770] sm:$0xff]  }
 0x181   :  { %3131 = vmatmul.mubr.bf16.gmra.mrb[28].mxu1 %v13813_v49 }
 0x182   :  { %11660 = vmatpush3.bf16.msra.mxu1 %v12835_v52  ;;  %3416 = vmatprep.mubr.bf16.mxu1 %v13783_v26 }
 0x183   :  { %11661 = vmatprep.subr.bf16.mxu1 %v12836_v53 }
 0x186   :  { %11662 = vmatpush3.bf16.msra.mxu1 %v12837_v54 }
 0x187   :  { %11663 = vmatprep.subr.bf16.mxu1 %v12838_v55 }
 0x18a   :  { %11664 = vmatpush3.bf16.msra.mxu1 %v12839_v56 }
 0x18b   :  { %11665 = vmatprep.subr.bf16.mxu1 %v12840_v57 }
 0x18e   :  { %11666 = vmatpush3.bf16.msra.mxu1 %v12841_v58 }
 0x18f   :  { %11667 = vmatprep.subr.bf16.mxu1 %v12842_v59 }
 0x192   :  { %11668 = vmatpush3.bf16.msra.mxu1 %v12843_v60  ;;  %v12891_v60 = vld [vmem:[%s16255_s3 + $0x730] sm:$0xff]  }
 0x193   :  { %11669 = vmatprep.subr.bf16.mxu1 %v12844_v61 }
 0x196   :  { %11670 = vmatpush3.bf16.msra.mxu1 %v12845_v62 }
 0x197   :  { %11723 = vmatprep.subr.bf16.mxu1 %v12846_v63  ;;  %v12892_v63 = vld [vmem:[%s16255_s3 + $0x778] sm:$0xff]  }
 0x199   :  { %3417 = vmatmul.mubr.bf16.vlgmr.msra.gmra.mrb[32].mxu1 %v13781_v22 }
 0x19a   :  { %3424 = vmatprep.mubr.bf16.mxu1 %v13815_v51  ;;  %11724 = vmatpush3.bf16.msra.mxu1 %v12847_v0 }
 0x19b   :  { %11725 = vmatprep.subr.bf16.mxu1 %v12848_v2 }
 0x19e   :  { %11726 = vmatpush3.bf16.msra.mxu1 %v12849_v3  ;;  %v12893_v3 = vld [vmem:[%s16255_s3 + $0x738] sm:$0xff]  }
 0x19f   :  { %11727 = vmatprep.subr.bf16.mxu1 %v12850_v4 }
 0x1a1   :  { %3425 = vmatmul.mubr.bf16.gmra.mrb[36].mxu1 %v13813_v49 }
 0x1a2   :  { %11728 = vmatpush3.bf16.msra.mxu1 %v12851_v5  ;;  %4004 = vmatprep.mubr.bf16.mxu1 %v13783_v26 }
 0x1a3   :  { %11729 = vmatprep.subr.bf16.mxu1 %v12852_v7 }
 0x1a6   :  { %11730 = vmatpush3.bf16.msra.mxu1 %v12853_v8 }
 0x1a7   :  { %11731 = vmatprep.subr.bf16.mxu1 %v12854_v9 }
 0x1aa   :  { %11732 = vmatpush3.bf16.msra.mxu1 %v12855_v10 }
 0x1ab   :  { %11733 = vmatprep.subr.bf16.mxu1 %v12856_v11 }
 0x1ae   :  { %11734 = vmatpush3.bf16.msra.mxu1 %v12857_v12 }
 0x1af   :  { %11735 = vmatprep.subr.bf16.mxu1 %v12858_v13 }
 0x1b2   :  { %11736 = vmatpush3.bf16.msra.mxu1 %v12859_v14 }
 0x1b3   :  { %11737 = vmatprep.subr.bf16.mxu1 %v12860_v15 }
 0x1b6   :  { %11738 = vmatpush3.bf16.msra.mxu1 %v12861_v16 }
 0x1b7   :  { %11757 = vmatprep.subr.bf16.mxu1 %v12862_v17 }
 0x1b9   :  { %4005 = vmatmul.mubr.bf16.vlgmr.msra.gmra.mrb[40].mxu1 %v13781_v22 }
 0x1ba   :  { %4012 = vmatprep.mubr.bf16.mxu1 %v13815_v51  ;;  %11758 = vmatpush3.bf16.msra.mxu1 %v12863_v18 }
 0x1bb   :  { %11759 = vmatprep.subr.bf16.mxu1 %v12864_v19 }
 0x1be   :  { %11760 = vmatpush3.bf16.msra.mxu1 %v12865_v20 }
 0x1bf   :  { %11761 = vmatprep.subr.bf16.mxu1 %v12866_v21 }
 0x1c1   :  { %4013 = vmatmul.mubr.bf16.gmra.mrb[44].mxu1 %v13813_v49 }
 0x1c2   :  { %11762 = vmatpush3.bf16.msra.mxu1 %v12867_v23  ;;  %4298 = vmatprep.mubr.bf16.mxu1 %v13783_v26 }
 0x1c3   :  { %11763 = vmatprep.subr.bf16.mxu1 %v12868_v24 }
 0x1c6   :  { %11764 = vmatpush3.bf16.msra.mxu1 %v12869_v25 }
 0x1c7   :  { %11765 = vmatprep.subr.bf16.mxu1 %v12870_v27 }
 0x1ca   :  { %11766 = vmatpush3.bf16.msra.mxu1 %v12871_v28 }
 0x1cb   :  { %11767 = vmatprep.subr.bf16.mxu1 %v12872_v29 }
 0x1ce   :  { %11768 = vmatpush3.bf16.msra.mxu1 %v12873_v30 }
 0x1cf   :  { %11769 = vmatprep.subr.bf16.mxu1 %v12874_v31 }
 0x1d2   :  { %11770 = vmatpush3.bf16.msra.mxu1 %v12875_v32 }
 0x1d3   :  { %11771 = vmatprep.subr.bf16.mxu1 %v12876_v33 }
 0x1d6   :  { %11772 = vmatpush3.bf16.msra.mxu1 %v12877_v34 }
 0x1d7   :  { %11791 = vmatprep.subr.bf16.mxu1 %v12878_v35 }
 0x1d9   :  { %4299 = vmatmul.mubr.bf16.vlgmr.msra.gmra.mrb[48].mxu1 %v13781_v22 }
 0x1da   :  { %4306 = vmatprep.mubr.bf16.mxu1 %v13815_v51  ;;  %11792 = vmatpush3.bf16.msra.mxu1 %v12879_v36 }
 0x1db   :  { %11793 = vmatprep.subr.bf16.mxu1 %v12880_v37 }
 0x1de   :  { %11794 = vmatpush3.bf16.msra.mxu1 %v12881_v38 }
 0x1df   :  { %11795 = vmatprep.subr.bf16.mxu1 %v12882_v39 }
 0x1e1   :  { %4307 = vmatmul.mubr.bf16.gmra.mrb[52].mxu1 %v13813_v49 }
 0x1e2   :  { %11796 = vmatpush3.bf16.msra.mxu1 %v12883_v40  ;;  %4592 = vmatprep.mubr.bf16.mxu1 %v13783_v26 }
 0x1e3   :  { %11797 = vmatprep.subr.bf16.mxu1 %v12884_v41 }
 0x1e6   :  { %11798 = vmatpush3.bf16.msra.mxu1 %v12885_v42 }
 0x1e7   :  { %11799 = vmatprep.subr.bf16.mxu1 %v12886_v43 }
 0x1ea   :  { %11800 = vmatpush3.bf16.msra.mxu1 %v12887_v44 }
 0x1eb   :  { %v11331_v47 = vpop.f32.mrb[8].mxu0  ;;  %v11501_v48 = vpop.f32.mrb[0].mxu1  ;;  %11801 = vmatprep.subr.bf16.mxu1 %v12888_v45 }
 0x1ec   :  { %v11332_v52 = vpop.f32.mrb[9].mxu0  ;;  %v11502_v53 = vpop.f32.mrb[1].mxu1 }
 0x1ed   :  { %v11333_v54 = vadd.f32 %v11332_v52, %v11331_v47  ;;  %v11503_v55 = vadd.f32 %v11502_v53, %v11501_v48  ;;  %v11334_v56 = vpop.f32.mrb[10].mxu0  ;;  %v11504_v57 = vpop.f32.mrb[2].mxu1  ;;  %v12895_v48 = vld [vmem:[%s16256_s4 + $0x28] sm:$0xff]   ;;  %v12899_v52 = vld [vmem:[%s16255_s3 + $0x140] sm:$0xff]   ;;  %v12897_v53 = vld [vmem:[%s16256_s4 + $0x38] sm:$0xff]  }
 0x1ee   :  { %11802 = vmatpush3.bf16.msra.mxu1 %v12889_v46  ;;  %v11335_v58 = vpop.f32.mrb[11].mxu0  ;;  %v11505_v59 = vpop.f32.mrb[3].mxu1 }
 0x1ef   :  { %v11336_v61 = vadd.f32 %v11335_v58, %v11334_v56  ;;  %v11506_v62 = vadd.f32 %v11505_v59, %v11504_v57  ;;  %11803 = vmatprep.subr.bf16.mxu1 %v12890_v50  ;;  %v12896_v50 = vld [vmem:[%s16256_s4 + $0x30] sm:$0xff]   ;;  %v12901_v57 = vld [vmem:[%s16255_s3 + $0x100] sm:$0xff]  }
 0x1f0   :  { %v12904_v58 = vld [vmem:[%s16256_s4 + $0x10] sm:$0xff]  }
 0x1f1   :  { %v517_v0 = vpack.c.bf16 %v11336_v61, %v11333_v54  ;;  %v14205_v2 = vpack.c.bf16 %v11506_v62, %v11503_v55  ;;  %v12898_v54 = vld [vmem:[%s16256_s4] sm:$0xff]   ;;  %v12900_v55 = vld [vmem:[%s16256_s4 + $0x8] sm:$0xff]  }
 0x1f2   :  { %11804 = vmatpush3.bf16.msra.mxu1 %v12891_v60  ;;  %v12902_v60 = vld [vmem:[%s16255_s3 + $0x148] sm:$0xff]  }
 0x1f3   :  { %11805 = vmatprep.subr.bf16.mxu1 %v12892_v63  ;;  %v11337_v4 = vpop.f32.mrb[12].mxu0  ;;  %v11507_v5 = vpop.f32.mrb[4].mxu1 }
 0x1f4   :  { %v11338_v6 = vpop.f32.mrb[13].mxu0  ;;  %v11508_v7 = vpop.f32.mrb[5].mxu1 }
 0x1f5   :  { %v11339_v8 = vadd.f32 %v11338_v6, %v11337_v4  ;;  %v11509_v9 = vadd.f32 %v11508_v7, %v11507_v5  ;;  %v11340_v10 = vpop.f32.mrb[14].mxu0  ;;  %v11510_v11 = vpop.f32.mrb[6].mxu1  ;;  %v12905_v4 = vld [vmem:[%s16255_s3 + $0x150] sm:$0xff]   ;;  %v12906_v6 = vld [vmem:[%s16256_s4 + $0x18] sm:$0xff]  }
 0x1f6   :  { %11806 = vmatpush3.bf16.msra.mxu1 %v12893_v3  ;;  %v11341_v12 = vpop.f32.mrb[15].mxu0  ;;  %v11511_v13 = vpop.f32.mrb[7].mxu1  ;;  %v12903_v3 = vld [vmem:[%s16255_s3 + $0x108] sm:$0xff]  }
 0x1f7   :  { %v11342_v14 = vadd.f32 %v11341_v12, %v11340_v10  ;;  %v11512_v15 = vadd.f32 %v11511_v13, %v11510_v11  ;;  %v12908_v10 = vld [vmem:[%s16255_s3 + $0x158] sm:$0xff]  }
 0x1f9   :  { %4593 = vmatmul.mubr.bf16.vlgmr.msra.gmra.mrb[56].mxu1 %v13781_v22  ;;  %v518_v16 = vpack.c.bf16 %v11342_v14, %v11339_v8  ;;  %v14211_v17 = vpack.c.bf16 %v11512_v15, %v11509_v9  ;;  %v12907_v8 = vld [vmem:[%s16255_s3 + $0x110] sm:$0xff]   ;;  %v12909_v15 = vld [vmem:[%s16255_s3 + $0x118] sm:$0xff]  }
 0x1fa   :  { %4600 = vmatprep.mubr.bf16.mxu1 %v13815_v51 }
 0x201   :  { %4601 = vmatmul.mubr.bf16.gmra.mrb[60].mxu1 %v13813_v49 }
 0x20b   :  { %v11359_v18 = vpop.f32.mrb[16].mxu0  ;;  %v11535_v19 = vpop.f32.mrb[8].mxu1 }
 0x20c   :  { %v11360_v20 = vpop.f32.mrb[17].mxu0  ;;  %v11536_v21 = vpop.f32.mrb[9].mxu1 }
 0x20d   :  { %v11361_v23 = vadd.f32 %v11360_v20, %v11359_v18  ;;  %v11537_v24 = vadd.f32 %v11536_v21, %v11535_v19  ;;  %v11362_v25 = vpop.f32.mrb[18].mxu0  ;;  %v11538_v27 = vpop.f32.mrb[10].mxu1  ;;  %v12911_v19 = vld [vmem:[%s16255_s3 + $0x120] sm:$0xff]   ;;  %v12912_v20 = vld [vmem:[%s16255_s3 + $0x168] sm:$0xff]  }
 0x20e   :  { %v11363_v28 = vpop.f32.mrb[19].mxu0  ;;  %v11539_v29 = vpop.f32.mrb[11].mxu1  ;;  %v12913_v21 = vld [vmem:[%s16255_s3 + $0x128] sm:$0xff]  }
 0x20f   :  { %v11364_v30 = vadd.f32 %v11363_v28, %v11362_v25  ;;  %v11540_v31 = vadd.f32 %v11539_v29, %v11538_v27  ;;  %v12916_v25 = vld [vmem:[%s16255_s3 + $0x178] sm:$0xff]  }
 0x210   :  { %v12917_v27 = vld [vmem:[%s16255_s3 + $0x138] sm:$0xff]  }
 0x211   :  { %v706_v32 = vpack.c.bf16 %v11364_v30, %v11361_v23  ;;  %v14215_v33 = vpack.c.bf16 %v11540_v31, %v11537_v24  ;;  %v12914_v23 = vld [vmem:[%s16255_s3 + $0x170] sm:$0xff]  }
 0x212   :  { %v12915_v24 = vld [vmem:[%s16255_s3 + $0x130] sm:$0xff]  }
 0x213   :  { %v11365_v34 = vpop.f32.mrb[20].mxu0  ;;  %12027 = vmatprep.subr.bf16.mxu0 %v706_v32  ;;  %v11541_v35 = vpop.f32.mrb[12].mxu1 }
 0x214   :  { %v11366_v36 = vpop.f32.mrb[21].mxu0  ;;  %12028 = vmatpush3.bf16.msra.mxu0 %v706_v32  ;;  %v11542_v37 = vpop.f32.mrb[13].mxu1 }
 0x215   :  { %v11367_v38 = vadd.f32 %v11366_v36, %v11365_v34  ;;  %v11543_v39 = vadd.f32 %v11542_v37, %v11541_v35  ;;  %v11368_v40 = vpop.f32.mrb[22].mxu0  ;;  %v11544_v41 = vpop.f32.mrb[14].mxu1 }
 0x216   :  { %v11369_v42 = vpop.f32.mrb[23].mxu0  ;;  %v11545_v43 = vpop.f32.mrb[15].mxu1 }
 0x217   :  { %v11370_v44 = vadd.f32 %v11369_v42, %v11368_v40  ;;  %v11546_v45 = vadd.f32 %v11545_v43, %v11544_v41 }
 0x219   :  { %v707_v46 = vpack.c.bf16 %v11370_v44, %v11367_v38  ;;  %v14217_v47 = vpack.c.bf16 %v11546_v45, %v11543_v39 }
 0x21b   :  { %12029 = vmatprep.subr.bf16.mxu0 %v707_v46 }
 0x21c   :  { %12030 = vmatpush3.bf16.msra.mxu0 %v707_v46 }
 0x21d   :  { %12039 = vmatprep.subr.bf16.mxu0 %v517_v0 }
 0x21f   :  { %12032 = vmatmul.mubr.msk.bf16.vlgmr.msra.gmra.mrb[24].mxu0 %vm728_vm9, %v12895_v48 }
 0x220   :  { %12040 = vmatpush3.bf16.msra.mxu0 %v517_v0  ;;  %12035 = vmatprep.mubr.msk.bf16.mxu0 %vm728_vm9, %v12896_v50 }
 0x221   :  { %12041 = vmatprep.subr.bf16.mxu0 %v518_v16 }
 0x224   :  { %12042 = vmatpush3.bf16.msra.mxu0 %v518_v16  ;;  %v12910_v16 = vld [vmem:[%s16255_s3 + $0x160] sm:$0xff]  }
 0x225   :  { %11383 = vmatprep.subr.bf16.mxu0 %v12899_v52 }
 0x227   :  { %12036 = vmatmul.mubr.msk.bf16.gmra.mrb[28].mxu0 %vm728_vm9, %v12897_v53 }
 0x228   :  { %12043 = vmatprep.mubr.msk.bf16.mxu0 %vm728_vm9, %v12898_v54 }
 0x22c   :  { %v11603_v56 = vpop.f32.mrb[16].mxu1 }
 0x22d   :  { %v11604_v59 = vpop.f32.mrb[17].mxu1 }
 0x22e   :  { %v11605_v61 = vadd.f32 %v11604_v59, %v11603_v56  ;;  %v11606_v62 = vpop.f32.mrb[18].mxu1 }
 0x22f   :  { %v11607_v63 = vpop.f32.mrb[19].mxu1  ;;  %12044 = vmatmul.mubr.msk.bf16.vlgmr.msra.gmra.mrb[24].mxu0 %vm728_vm9, %v12900_v55 }
 0x230   :  { %v11608_v0 = vadd.f32 %v11607_v63, %v11606_v62  ;;  %11384 = vmatpush3.bf16.msra.mxu0 %v12901_v57  ;;  %12047 = vmatprep.mubr.msk.bf16.mxu0 %vm728_vm9, %v12904_v58 }
 0x231   :  { %11385 = vmatprep.subr.bf16.mxu0 %v12902_v60 }
 0x232   :  { %v14258_v5 = vpack.c.bf16 %v11608_v0, %v11605_v61 }
 0x234   :  { %11386 = vmatpush3.bf16.msra.mxu0 %v12903_v3  ;;  %v11609_v7 = vpop.f32.mrb[20].mxu1 }
 0x235   :  { %v11610_v9 = vpop.f32.mrb[21].mxu1  ;;  %11387 = vmatprep.subr.bf16.mxu0 %v12905_v4 }
 0x236   :  { %v11611_v11 = vadd.f32 %v11610_v9, %v11609_v7  ;;  %v11612_v12 = vpop.f32.mrb[22].mxu1 }
 0x237   :  { %v11613_v13 = vpop.f32.mrb[23].mxu1  ;;  %12048 = vmatmul.mubr.msk.bf16.gmra.mrb[28].mxu0 %vm728_vm9, %v12906_v6 }
 0x238   :  { %v11614_v14 = vadd.f32 %v11613_v13, %v11612_v12  ;;  %11388 = vmatpush3.bf16.msra.mxu0 %v12907_v8  ;;  %1064 = vmatprep.mubr.bf16.mxu0 %v13783_v26 }
 0x239   :  { %11389 = vmatprep.subr.bf16.mxu0 %v12908_v10 }
 0x23a   :  { %v14277_v18 = vpack.c.bf16 %v11614_v14, %v11611_v11 }
 0x23c   :  { %11390 = vmatpush3.bf16.msra.mxu0 %v12909_v15 }
 0x23d   :  { %11391 = vmatprep.subr.bf16.mxu0 %v12910_v16 }
 0x240   :  { %11392 = vmatpush3.bf16.msra.mxu0 %v12911_v19 }
 0x241   :  { %11393 = vmatprep.subr.bf16.mxu0 %v12912_v20 }
 0x244   :  { %11394 = vmatpush3.bf16.msra.mxu0 %v12913_v21 }
 0x245   :  { %11395 = vmatprep.subr.bf16.mxu0 %v12914_v23  ;;  %v12918_v23 = vld [vmem:[%s16256_s4 + $0x40] sm:$0xff]  }
 0x248   :  { %11396 = vmatpush3.bf16.msra.mxu0 %v12915_v24 }
 0x249   :  { %11397 = vmatprep.subr.bf16.mxu0 %v12916_v25 }
 0x24c   :  { %11398 = vmatpush3.bf16.msra.mxu0 %v12917_v27  ;;  %v11637_v28 = vpop.f32.mrb[24].mxu1 }
 0x24d   :  { %v11638_v29 = vpop.f32.mrb[25].mxu1 }
 0x24e   :  { %v11639_v30 = vadd.f32 %v11638_v29, %v11637_v28  ;;  %v11640_v31 = vpop.f32.mrb[26].mxu1 }
 0x24f   :  { %1065 = vmatmul.mubr.bf16.vlgmr.msra.gmra.mrb[32].mxu0 %v13781_v22  ;;  %v11641_v32 = vpop.f32.mrb[27].mxu1 }
 0x250   :  { %v11642_v34 = vadd.f32 %v11641_v32, %v11640_v31  ;;  %1072 = vmatprep.mubr.bf16.mxu0 %v13815_v51 }
 0x252   :  { %v14302_v35 = vpack.c.bf16 %v11642_v34, %v11639_v30 }
 0x254   :  { %v11643_v36 = vpop.f32.mrb[28].mxu1 }
 0x255   :  { %v11644_v37 = vpop.f32.mrb[29].mxu1 }
 0x256   :  { %v11645_v38 = vadd.f32 %v11644_v37, %v11643_v36  ;;  %v11646_v39 = vpop.f32.mrb[30].mxu1 }
 0x257   :  { %1073 = vmatmul.mubr.bf16.gmra.mrb[36].mxu0 %v13813_v49  ;;  %v11647_v40 = vpop.f32.mrb[31].mxu1 }
 0x258   :  { %v11648_v41 = vadd.f32 %v11647_v40, %v11646_v39  ;;  %12055 = vmatprep.mubr.msk.bf16.mxu0 %vm728_vm9, %v12918_v23  ;;  %v12929_v23 = vld [vmem:[%s16255_s3 + $0x198] sm:$0xff]  }
 0x25a   :  { %v14305_v42 = vpack.c.bf16 %v11648_v41, %v11645_v38 }
 0x26c   :  { %v11671_v43 = vpop.f32.mrb[32].mxu1 }
 0x26d   :  { %v11672_v44 = vpop.f32.mrb[33].mxu1 }
 0x26e   :  { %v11673_v45 = vadd.f32 %v11672_v44, %v11671_v43  ;;  %v11674_v46 = vpop.f32.mrb[34].mxu1 }
 0x26f   :  { %v11675_v48 = vpop.f32.mrb[35].mxu1 }
 0x270   :  { %v11676_v50 = vadd.f32 %v11675_v48, %v11674_v46 }
 0x272   :  { %v14307_v52 = vpack.c.bf16 %v11676_v50, %v11673_v45 }
 0x274   :  { %v11677_v53 = vpop.f32.mrb[36].mxu1 }
 0x275   :  { %v11678_v54 = vpop.f32.mrb[37].mxu1 }
 0x276   :  { %v11679_v55 = vadd.f32 %v11678_v54, %v11677_v53  ;;  %v11680_v56 = vpop.f32.mrb[38].mxu1 }
 0x277   :  { %v11681_v57 = vpop.f32.mrb[39].mxu1 }
 0x278   :  { %v11682_v58 = vadd.f32 %v11681_v57, %v11680_v56 }
 0x27a   :  { %v14309_v59 = vpack.c.bf16 %v11682_v58, %v11679_v55 }
 0x28c   :  { %v11739_v60 = vpop.f32.mrb[40].mxu1 }
 0x28d   :  { %v11740_v61 = vpop.f32.mrb[41].mxu1 }
 0x28e   :  { %v11741_v62 = vadd.f32 %v11740_v61, %v11739_v60  ;;  %v11742_v63 = vpop.f32.mrb[42].mxu1 }
 0x28f   :  { %v11743_v0 = vpop.f32.mrb[43].mxu1 }
 0x290   :  { %v11744_v3 = vadd.f32 %v11743_v0, %v11742_v63 }
 0x292   :  { %v14311_v4 = vpack.c.bf16 %v11744_v3, %v11741_v62 }
 0x294   :  { %v11745_v6 = vpop.f32.mrb[44].mxu1 }
 0x295   :  { %v11746_v7 = vpop.f32.mrb[45].mxu1 }
 0x296   :  { %v11747_v8 = vadd.f32 %v11746_v7, %v11745_v6  ;;  %v11748_v9 = vpop.f32.mrb[46].mxu1 }
 0x297   :  { %v11749_v10 = vpop.f32.mrb[47].mxu1 }
 0x298   :  { %v11750_v11 = vadd.f32 %v11749_v10, %v11748_v9  ;;  %v12919_v9 = vld [vmem:[%s16256_s4 + $0x48] sm:$0xff]   ;;  %v12921_v10 = vld [vmem:[%s16255_s3 + $0x180] sm:$0xff]  }
 0x29a   :  { %v14313_v12 = vpack.c.bf16 %v11750_v11, %v11747_v8  ;;  %v12920_v8 = vld [vmem:[%s16255_s3 + $0x1c0] sm:$0xff]   ;;  %v12924_v11 = vld [vmem:[%s16256_s4 + $0x50] sm:$0xff]  }
 0x2ac   :  { %v11773_v13 = vpop.f32.mrb[48].mxu1 }
 0x2ad   :  { %v11774_v14 = vpop.f32.mrb[49].mxu1 }
 0x2ae   :  { %v11775_v15 = vadd.f32 %v11774_v14, %v11773_v13  ;;  %v11776_v16 = vpop.f32.mrb[50].mxu1  ;;  %v12922_v13 = vld [vmem:[%s16255_s3 + $0x1c8] sm:$0xff]  }
 0x2af   :  { %v11777_v19 = vpop.f32.mrb[51].mxu1  ;;  %v12923_v14 = vld [vmem:[%s16255_s3 + $0x188] sm:$0xff]  }
 0x2b0   :  { %v11778_v20 = vadd.f32 %v11777_v19, %v11776_v16  ;;  %v12925_v16 = vld [vmem:[%s16256_s4 + $0x58] sm:$0xff]   ;;  %v12927_v19 = vld [vmem:[%s16255_s3 + $0x190] sm:$0xff]  }
 0x2b2   :  { %v14315_v21 = vpack.c.bf16 %v11778_v20, %v11775_v15  ;;  %v12926_v15 = vld [vmem:[%s16255_s3 + $0x1d0] sm:$0xff]   ;;  %v12928_v20 = vld [vmem:[%s16255_s3 + $0x1d8] sm:$0xff]  }
 0x2b4   :  { %v11779_v24 = vpop.f32.mrb[52].mxu1 }
 0x2b5   :  { %v11780_v25 = vpop.f32.mrb[53].mxu1 }
 0x2b6   :  { %v11781_v27 = vadd.f32 %v11780_v25, %v11779_v24  ;;  %v11782_v28 = vpop.f32.mrb[54].mxu1  ;;  %v12930_v24 = vld [vmem:[%s16255_s3 + $0x1e0] sm:$0xff]  }
 0x2b7   :  { %v11783_v29 = vpop.f32.mrb[55].mxu1  ;;  %v12931_v25 = vld [vmem:[%s16255_s3 + $0x1a0] sm:$0xff]  }
 0x2b8   :  { %v11784_v30 = vadd.f32 %v11783_v29, %v11782_v28  ;;  %v12933_v28 = vld [vmem:[%s16255_s3 + $0x1a8] sm:$0xff]   ;;  %v12934_v29 = vld [vmem:[%s16255_s3 + $0x1f0] sm:$0xff]  }
 0x2ba   :  { %v14321_v31 = vpack.c.bf16 %v11784_v30, %v11781_v27  ;;  %v12932_v27 = vld [vmem:[%s16255_s3 + $0x1e8] sm:$0xff]   ;;  %v12935_v30 = vld [vmem:[%s16255_s3 + $0x1b0] sm:$0xff]  }
 0x2cc   :  { %v11807_v32 = vpop.f32.mrb[56].mxu1 }
 0x2cd   :  { %v11808_v34 = vpop.f32.mrb[57].mxu1 }
 0x2ce   :  { %v11809_v36 = vadd.f32 %v11808_v34, %v11807_v32  ;;  %v11810_v37 = vpop.f32.mrb[58].mxu1  ;;  %v12936_v32 = vld [vmem:[%s16255_s3 + $0x1f8] sm:$0xff]  }
 0x2cf   :  { %v11811_v38 = vpop.f32.mrb[59].mxu1  ;;  %v12937_v34 = vld [vmem:[%s16255_s3 + $0x1b8] sm:$0xff]  }
 0x2d0   :  { %v11812_v39 = vadd.f32 %v11811_v38, %v11810_v37 }
 0x2d2   :  { %v14323_v40 = vpack.c.bf16 %v11812_v39, %v11809_v36  ;;  %v12938_v36 = vld [vmem:[%s16256_s4 + $0x60] sm:$0xff]  }
 0x2d4   :  { %v11813_v41 = vpop.f32.mrb[60].mxu1 }
 0x2d5   :  { %v11814_v43 = vpop.f32.mrb[61].mxu1 }
 0x2d6   :  { %v11815_v44 = vadd.f32 %v11814_v43, %v11813_v41  ;;  %v11816_v45 = vpop.f32.mrb[62].mxu1 }
 0x2d7   :  { %v11817_v46 = vpop.f32.mrb[63].mxu1 }
 0x2d8   :  { %v11818_v48 = vadd.f32 %v11817_v46, %v11816_v45 }
 0x2da   :  { %v14325_v50 = vpack.c.bf16 %v11818_v48, %v11815_v44 }
 0x322   :  { %v11399_v53 = vpop.f32.mrb[32].mxu0 }
 0x323   :  { %v11400_v54 = vpop.f32.mrb[33].mxu0 }
 0x324   :  { %v11401_v55 = vadd.f32 %v11400_v54, %v11399_v53  ;;  %v11402_v56 = vpop.f32.mrb[34].mxu0 }
 0x325   :  { %v11403_v57 = vpop.f32.mrb[35].mxu0 }
 0x326   :  { %v11404_v58 = vadd.f32 %v11403_v57, %v11402_v56 }
 0x328   :  { %v1090_v60 = vpack.c.bf16 %v11404_v58, %v11401_v55  ;;  %v12940_v58 = vld [vmem:[%s16255_s3 + $0x240] sm:$0xff]  }
 0x32a   :  { %v11405_v61 = vpop.f32.mrb[36].mxu0  ;;  %12051 = vmatprep.subr.bf16.mxu0 %v1090_v60 }
 0x32b   :  { %v11406_v62 = vpop.f32.mrb[37].mxu0  ;;  %12052 = vmatpush3.bf16.msra.mxu0 %v1090_v60  ;;  %v12939_v60 = vld [vmem:[%s16256_s4 + $0x68] sm:$0xff]  }
 0x32c   :  { %v11407_v63 = vadd.f32 %v11406_v62, %v11405_v61  ;;  %v11408_v0 = vpop.f32.mrb[38].mxu0  ;;  %v12941_v61 = vld [vmem:[%s16255_s3 + $0x200] sm:$0xff]   ;;  %v12944_v62 = vld [vmem:[%s16256_s4 + $0x70] sm:$0xff]  }
 0x32d   :  { %v11409_v3 = vpop.f32.mrb[39].mxu0 }
 0x32e   :  { %v11410_v6 = vadd.f32 %v11409_v3, %v11408_v0  ;;  %v12943_v0 = vld [vmem:[%s16255_s3 + $0x208] sm:$0xff]   ;;  %v12946_v3 = vld [vmem:[%s16255_s3 + $0x250] sm:$0xff]  }
 0x330   :  { %v1091_v7 = vpack.c.bf16 %v11410_v6, %v11407_v63  ;;  %v12942_v63 = vld [vmem:[%s16255_s3 + $0x248] sm:$0xff]   ;;  %v12945_v6 = vld [vmem:[%s16256_s4 + $0x78] sm:$0xff]  }
 0x332   :  { %12053 = vmatprep.subr.bf16.mxu0 %v1091_v7 }
 0x333   :  { %12054 = vmatpush3.bf16.msra.mxu0 %v1091_v7  ;;  %v12947_v7 = vld [vmem:[%s16255_s3 + $0x210] sm:$0xff]  }
 0x334   :  { %11417 = vmatprep.subr.bf16.mxu0 %v12920_v8  ;;  %v12948_v8 = vld [vmem:[%s16255_s3 + $0x258] sm:$0xff]  }
 0x336   :  { %12056 = vmatmul.mubr.msk.bf16.vlgmr.msra.gmra.mrb[24].mxu0 %vm728_vm9, %v12919_v9  ;;  %v12949_v9 = vld [vmem:[%s16255_s3 + $0x218] sm:$0xff]  }
 0x337   :  { %11418 = vmatpush3.bf16.msra.mxu0 %v12921_v10  ;;  %12059 = vmatprep.mubr.msk.bf16.mxu0 %vm728_vm9, %v12924_v11  ;;  %v12950_v10 = vld [vmem:[%s16255_s3 + $0x260] sm:$0xff]  }
 0x338   :  { %11419 = vmatprep.subr.bf16.mxu0 %v12922_v13  ;;  %v12951_v11 = vld [vmem:[%s16255_s3 + $0x220] sm:$0xff]   ;;  %v12952_v13 = vld [vmem:[%s16255_s3 + $0x268] sm:$0xff]  }
 0x33b   :  { %11420 = vmatpush3.bf16.msra.mxu0 %v12923_v14  ;;  %v12953_v14 = vld [vmem:[%s16255_s3 + $0x228] sm:$0xff]  }
 0x33c   :  { %11421 = vmatprep.subr.bf16.mxu0 %v12926_v15  ;;  %v12954_v15 = vld [vmem:[%s16255_s3 + $0x270] sm:$0xff]  }
 0x33e   :  { %12060 = vmatmul.mubr.msk.bf16.gmra.mrb[28].mxu0 %vm728_vm9, %v12925_v16  ;;  %v12955_v16 = vld [vmem:[%s16255_s3 + $0x230] sm:$0xff]  }
 0x33f   :  { %11422 = vmatpush3.bf16.msra.mxu0 %v12927_v19  ;;  %1358 = vmatprep.mubr.bf16.mxu0 %v13783_v26  ;;  %v12956_v19 = vld [vmem:[%s16255_s3 + $0x278] sm:$0xff]  }
 0x340   :  { %11423 = vmatprep.subr.bf16.mxu0 %v12928_v20  ;;  %v12957_v20 = vld [vmem:[%s16255_s3 + $0x238] sm:$0xff]  }
 0x343   :  { %11424 = vmatpush3.bf16.msra.mxu0 %v12929_v23  ;;  %v12958_v23 = vld [vmem:[%s16256_s4 + $0x80] sm:$0xff]  }
 0x344   :  { %11425 = vmatprep.subr.bf16.mxu0 %v12930_v24 }
 0x347   :  { %11426 = vmatpush3.bf16.msra.mxu0 %v12931_v25 }
 0x348   :  { %11427 = vmatprep.subr.bf16.mxu0 %v12932_v27 }
 0x34b   :  { %11428 = vmatpush3.bf16.msra.mxu0 %v12933_v28 }
 0x34c   :  { %11429 = vmatprep.subr.bf16.mxu0 %v12934_v29 }
 0x34f   :  { %11430 = vmatpush3.bf16.msra.mxu0 %v12935_v30 }
 0x350   :  { %11431 = vmatprep.subr.bf16.mxu0 %v12936_v32 }
 0x353   :  { %11432 = vmatpush3.bf16.msra.mxu0 %v12937_v34 }
 0x356   :  { %1359 = vmatmul.mubr.bf16.vlgmr.msra.gmra.mrb[40].mxu0 %v13781_v22 }
 0x357   :  { %1366 = vmatprep.mubr.bf16.mxu0 %v13815_v51 }
 0x35e   :  { %1367 = vmatmul.mubr.bf16.gmra.mrb[44].mxu0 %v13813_v49 }
 0x35f   :  { %12067 = vmatprep.mubr.msk.bf16.mxu0 %vm728_vm9, %v12938_v36 }
 0x429   :  { %v11433_v37 = vpop.f32.mrb[40].mxu0 }
 0x42a   :  { %v11434_v38 = vpop.f32.mrb[41].mxu0 }
 0x42b   :  { %v11435_v39 = vadd.f32 %v11434_v38, %v11433_v37  ;;  %v11436_v41 = vpop.f32.mrb[42].mxu0 }
 0x42c   :  { %v11437_v43 = vpop.f32.mrb[43].mxu0 }
 0x42d   :  { %v11438_v44 = vadd.f32 %v11437_v43, %v11436_v41 }
 0x42f   :  { %v1384_v45 = vpack.c.bf16 %v11438_v44, %v11435_v39  ;;  %v12959_v44 = vld [vmem:[%s16256_s4 + $0x88] sm:$0xff]  }
 0x431   :  { %v11439_v46 = vpop.f32.mrb[44].mxu0  ;;  %12063 = vmatprep.subr.bf16.mxu0 %v1384_v45 }
 0x432   :  { %v11440_v48 = vpop.f32.mrb[45].mxu0  ;;  %12064 = vmatpush3.bf16.msra.mxu0 %v1384_v45  ;;  %v12960_v45 = vld [vmem:[%s16256_s4 + $0x90] sm:$0xff]  }
 0x433   :  { %v11441_v53 = vadd.f32 %v11440_v48, %v11439_v46  ;;  %v11442_v54 = vpop.f32.mrb[46].mxu0  ;;  %v12961_v46 = vld [vmem:[%s16256_s4 + $0x98] sm:$0xff]   ;;  %v12962_v48 = vld [vmem:[%s16256_s4 + $0xa0] sm:$0xff]  }
 0x434   :  { %v11443_v55 = vpop.f32.mrb[47].mxu0 }
 0x435   :  { %v11444_v56 = vadd.f32 %v11443_v55, %v11442_v54  ;;  %v12965_v54 = vld [vmem:[%s16256_s4 + $0xb8] sm:$0xff]   ;;  %v12966_v55 = vld [vmem:[%s16256_s4 + $0xc0] sm:$0xff]  }
 0x437   :  { %v1385_v57 = vpack.c.bf16 %v11444_v56, %v11441_v53  ;;  %v12964_v53 = vld [vmem:[%s16256_s4 + $0xb0] sm:$0xff]   ;;  %v12969_v56 = vld [vmem:[%s16255_s3 + $0x380] sm:$0xff]  }
 0x439   :  { %12065 = vmatprep.subr.bf16.mxu0 %v1385_v57 }
 0x43a   :  { %12066 = vmatpush3.bf16.msra.mxu0 %v1385_v57  ;;  %v12970_v57 = vld [vmem:[%s16255_s3 + $0x3c8] sm:$0xff]  }
 0x43b   :  { %11451 = vmatprep.subr.bf16.mxu0 %v12940_v58  ;;  %v12971_v58 = vld [vmem:[%s16255_s3 + $0x388] sm:$0xff]  }
 0x43d   :  { %12068 = vmatmul.mubr.msk.bf16.vlgmr.msra.gmra.mrb[24].mxu0 %vm728_vm9, %v12939_v60  ;;  %v12973_v60 = vld [vmem:[%s16255_s3 + $0x3d0] sm:$0xff]  }
 0x43e   :  { %11452 = vmatpush3.bf16.msra.mxu0 %v12941_v61  ;;  %12071 = vmatprep.mubr.msk.bf16.mxu0 %vm728_vm9, %v12944_v62  ;;  %v12974_v61 = vld [vmem:[%s16256_s4 + $0xd8] sm:$0xff]   ;;  %v12975_v62 = vld [vmem:[%s16255_s3 + $0x390] sm:$0xff]  }
 0x43f   :  { %11453 = vmatprep.subr.bf16.mxu0 %v12942_v63  ;;  %v12976_v63 = vld [vmem:[%s16255_s3 + $0x3d8] sm:$0xff]  }
 0x442   :  { %11454 = vmatpush3.bf16.msra.mxu0 %v12943_v0  ;;  %v12977_v0 = vld [vmem:[%s16255_s3 + $0x398] sm:$0xff]  }
 0x443   :  { %11455 = vmatprep.subr.bf16.mxu0 %v12946_v3  ;;  %v12978_v3 = vld [vmem:[%s16255_s3 + $0x3e0] sm:$0xff]  }
 0x445   :  { %12072 = vmatmul.mubr.msk.bf16.gmra.mrb[28].mxu0 %vm728_vm9, %v12945_v6  ;;  %v12979_v6 = vld [vmem:[%s16255_s3 + $0x3a0] sm:$0xff]  }
 0x446   :  { %11456 = vmatpush3.bf16.msra.mxu0 %v12947_v7  ;;  %1652 = vmatprep.mubr.bf16.mxu0 %v13783_v26  ;;  %v12980_v7 = vld [vmem:[%s16255_s3 + $0x3e8] sm:$0xff]  }
 0x447   :  { %11457 = vmatprep.subr.bf16.mxu0 %v12948_v8  ;;  %v12981_v8 = vld [vmem:[%s16255_s3 + $0x3a8] sm:$0xff]  }
 0x44a   :  { %11458 = vmatpush3.bf16.msra.mxu0 %v12949_v9  ;;  %v12982_v9 = vld [vmem:[%s16255_s3 + $0x3f0] sm:$0xff]  }
 0x44b   :  { %11459 = vmatprep.subr.bf16.mxu0 %v12950_v10  ;;  %v12983_v10 = vld [vmem:[%s16255_s3 + $0x3b0] sm:$0xff]  }
 0x44e   :  { %11460 = vmatpush3.bf16.msra.mxu0 %v12951_v11  ;;  %v12984_v11 = vld [vmem:[%s16255_s3 + $0x3f8] sm:$0xff]  }
 0x44f   :  { %11461 = vmatprep.subr.bf16.mxu0 %v12952_v13  ;;  %v12985_v13 = vld [vmem:[%s16255_s3 + $0x3b8] sm:$0xff]  }
 0x452   :  { %11462 = vmatpush3.bf16.msra.mxu0 %v12953_v14  ;;  %v12986_v14 = vld [vmem:[%s16256_s4 + $0xe0] sm:$0xff]  }
 0x453   :  { %11463 = vmatprep.subr.bf16.mxu0 %v12954_v15 }
 0x456   :  { %11464 = vmatpush3.bf16.msra.mxu0 %v12955_v16 }
 0x457   :  { %11465 = vmatprep.subr.bf16.mxu0 %v12956_v19 }
 0x45a   :  { %11466 = vmatpush3.bf16.msra.mxu0 %v12957_v20 }
 0x45d   :  { %1653 = vmatmul.mubr.bf16.vlgmr.msra.gmra.mrb[48].mxu0 %v13781_v22 }
 0x45e   :  { %1660 = vmatprep.mubr.bf16.mxu0 %v13815_v51 }
 0x465   :  { %1661 = vmatmul.mubr.bf16.gmra.mrb[52].mxu0 %v13813_v49 }
 0x466   :  { %12079 = vmatprep.mubr.msk.bf16.mxu0 %vm728_vm9, %v12958_v23 }
 0x530   :  { %v11467_v24 = vpop.f32.mrb[48].mxu0 }
 0x531   :  { %v11468_v25 = vpop.f32.mrb[49].mxu0 }
 0x532   :  { %v11469_v27 = vadd.f32 %v11468_v25, %v11467_v24  ;;  %v11470_v28 = vpop.f32.mrb[50].mxu0 }
 0x533   :  { %v11471_v29 = vpop.f32.mrb[51].mxu0 }
 0x534   :  { %v11472_v30 = vadd.f32 %v11471_v29, %v11470_v28 }
 0x536   :  { %v1678_v32 = vpack.c.bf16 %v11472_v30, %v11469_v27 }
 0x538   :  { %v11473_v34 = vpop.f32.mrb[52].mxu0  ;;  %12075 = vmatprep.subr.bf16.mxu0 %v1678_v32 }
 0x539   :  { %v11474_v36 = vpop.f32.mrb[53].mxu0  ;;  %12076 = vmatpush3.bf16.msra.mxu0 %v1678_v32 }
 0x53a   :  { %v11475_v37 = vadd.f32 %v11474_v36, %v11473_v34  ;;  %v11476_v38 = vpop.f32.mrb[54].mxu0 }
 0x53b   :  { %v11477_v39 = vpop.f32.mrb[55].mxu0 }
 0x53c   :  { %v11478_v41 = vadd.f32 %v11477_v39, %v11476_v38  ;;  %v12988_v38 = vld [vmem:[%s16256_s4 + $0xf0] sm:$0xff]   ;;  %v12989_v39 = vld [vmem:[%s16256_s4 + $0xf8] sm:$0xff]  }
 0x53e   :  { %v1679_v43 = vpack.c.bf16 %v11478_v41, %v11475_v37  ;;  %v12987_v37 = vld [vmem:[%s16256_s4 + $0xe8] sm:$0xff]   ;;  %v12990_v41 = vld [vmem:[%s16256_s4 + $0x100] sm:$0xff]  }
 0x540   :  { %12077 = vmatprep.subr.bf16.mxu0 %v1679_v43 }
 0x541   :  { %12078 = vmatpush3.bf16.msra.mxu0 %v1679_v43  ;;  %v12992_v43 = vld [vmem:[%s16256_s4 + $0x110] sm:$0xff]  }
 0x542   :  { %12087 = vmatprep.subr.bf16.mxu0 %v14205_v2 }
 0x544   :  { %12080 = vmatmul.mubr.msk.bf16.vlgmr.msra.gmra.mrb[24].mxu0 %vm728_vm9, %v12959_v44  ;;  %v12994_v44 = vld [vmem:[%s16256_s4 + $0x120] sm:$0xff]  }
 0x545   :  { %12088 = vmatpush3.bf16.msra.mxu0 %v14205_v2  ;;  %12083 = vmatprep.mubr.msk.bf16.mxu0 %vm728_vm9, %v12960_v45  ;;  %v12963_v2 = vld [vmem:[%s16256_s4 + $0xa8] sm:$0xff]   ;;  %v12996_v45 = vld [vmem:[%s16256_s4 + $0x130] sm:$0xff]  }
 0x546   :  { %12089 = vmatprep.subr.bf16.mxu0 %v14211_v17 }
 0x549   :  { %12090 = vmatpush3.bf16.msra.mxu0 %v14211_v17  ;;  %v12967_v17 = vld [vmem:[%s16255_s3 + $0x3c0] sm:$0xff]  }
 0x54a   :  { %12099 = vmatprep.subr.bf16.mxu0 %v14215_v33 }
 0x54c   :  { %12084 = vmatmul.mubr.msk.bf16.gmra.mrb[28].mxu0 %vm728_vm9, %v12961_v46  ;;  %v12997_v46 = vld [vmem:[%s16256_s4 + $0x138] sm:$0xff]  }
 0x54d   :  { %12091 = vmatprep.mubr.msk.bf16.mxu0 %vm728_vm9, %v12962_v48  ;;  %v12998_v48 = vld [vmem:[%s16256_s4 + $0x140] sm:$0xff]  }
 0x554   :  { %12092 = vmatmul.mubr.msk.bf16.vlgmr.msra.gmra.mrb[24].mxu0 %vm728_vm9, %v12963_v2  ;;  %v13001_v2 = vld [vmem:[%s16255_s3 + $0x580] sm:$0xff]  }
 0x555   :  { %12100 = vmatpush3.bf16.msra.mxu0 %v14215_v33  ;;  %12095 = vmatprep.mubr.msk.bf16.mxu0 %vm728_vm9, %v12964_v53  ;;  %v12968_v33 = vld [vmem:[%s16256_s4 + $0xc8] sm:$0xff]  }
 0x556   :  { %12101 = vmatprep.subr.bf16.mxu0 %v14217_v47  ;;  %v13002_v53 = vld [vmem:[%s16255_s3 + $0x5c8] sm:$0xff]  }
 0x559   :  { %12102 = vmatpush3.bf16.msra.mxu0 %v14217_v47  ;;  %v12972_v47 = vld [vmem:[%s16256_s4 + $0xd0] sm:$0xff]  }
 0x55a   :  { %11553 = vmatprep.subr.bf16.mxu0 %v12967_v17  ;;  %v13003_v17 = vld [vmem:[%s16255_s3 + $0x588] sm:$0xff]  }
 0x55c   :  { %12096 = vmatmul.mubr.msk.bf16.gmra.mrb[28].mxu0 %vm728_vm9, %v12965_v54  ;;  %v13005_v54 = vld [vmem:[%s16255_s3 + $0x5d0] sm:$0xff]  }
 0x55d   :  { %12103 = vmatprep.mubr.msk.bf16.mxu0 %vm728_vm9, %v12966_v55  ;;  %v13006_v55 = vld [vmem:[%s16256_s4 + $0x158] sm:$0xff]  }
 0x564   :  { %12104 = vmatmul.mubr.msk.bf16.vlgmr.msra.gmra.mrb[24].mxu0 %vm728_vm9, %v12968_v33  ;;  %v13007_v33 = vld [vmem:[%s16255_s3 + $0x590] sm:$0xff]  }
 0x565   :  { %11554 = vmatpush3.bf16.msra.mxu0 %v12969_v56  ;;  %12107 = vmatprep.mubr.msk.bf16.mxu0 %vm728_vm9, %v12972_v47  ;;  %v13008_v56 = vld [vmem:[%s16255_s3 + $0x5d8] sm:$0xff]  }
 0x566   :  { %11555 = vmatprep.subr.bf16.mxu0 %v12970_v57  ;;  %v13009_v47 = vld [vmem:[%s16255_s3 + $0x598] sm:$0xff]   ;;  %v13010_v57 = vld [vmem:[%s16255_s3 + $0x5e0] sm:$0xff]  }
 0x569   :  { %11556 = vmatpush3.bf16.msra.mxu0 %v12971_v58  ;;  %v13011_v58 = vld [vmem:[%s16255_s3 + $0x5a0] sm:$0xff]  }
 0x56a   :  { %11557 = vmatprep.subr.bf16.mxu0 %v12973_v60  ;;  %v13012_v60 = vld [vmem:[%s16255_s3 + $0x5e8] sm:$0xff]  }
 0x56c   :  { %12108 = vmatmul.mubr.msk.bf16.gmra.mrb[28].mxu0 %vm728_vm9, %v12974_v61  ;;  %v13013_v61 = vld [vmem:[%s16255_s3 + $0x5a8] sm:$0xff]  }
 0x56d   :  { %11558 = vmatpush3.bf16.msra.mxu0 %v12975_v62  ;;  %2534 = vmatprep.mubr.bf16.mxu0 %v13783_v26  ;;  %v13014_v62 = vld [vmem:[%s16255_s3 + $0x5f0] sm:$0xff]  }
 0x56e   :  { %11559 = vmatprep.subr.bf16.mxu0 %v12976_v63  ;;  %v13015_v63 = vld [vmem:[%s16255_s3 + $0x5b0] sm:$0xff]  }
 0x571   :  { %11560 = vmatpush3.bf16.msra.mxu0 %v12977_v0  ;;  %v13016_v0 = vld [vmem:[%s16255_s3 + $0x5f8] sm:$0xff]  }
 0x572   :  { %11561 = vmatprep.subr.bf16.mxu0 %v12978_v3  ;;  %v13017_v3 = vld [vmem:[%s16255_s3 + $0x5b8] sm:$0xff]  }
 0x575   :  { %11562 = vmatpush3.bf16.msra.mxu0 %v12979_v6  ;;  %v13018_v6 = vld [vmem:[%s16256_s4 + $0x160] sm:$0xff]  }
 0x576   :  { %11563 = vmatprep.subr.bf16.mxu0 %v12980_v7 }
 0x579   :  { %11564 = vmatpush3.bf16.msra.mxu0 %v12981_v8 }
 0x57a   :  { %11565 = vmatprep.subr.bf16.mxu0 %v12982_v9 }
 0x57d   :  { %11566 = vmatpush3.bf16.msra.mxu0 %v12983_v10 }
 0x57e   :  { %11567 = vmatprep.subr.bf16.mxu0 %v12984_v11 }
 0x581   :  { %11568 = vmatpush3.bf16.msra.mxu0 %v12985_v13 }
 0x584   :  { %2535 = vmatmul.mubr.bf16.vlgmr.msra.gmra.mrb[56].mxu0 %v13781_v22 }
 0x585   :  { %2542 = vmatprep.mubr.bf16.mxu0 %v13815_v51 }
 0x58c   :  { %2543 = vmatmul.mubr.bf16.gmra.mrb[60].mxu0 %v13813_v49 }
 0x58d   :  { %12115 = vmatprep.mubr.msk.bf16.mxu0 %vm728_vm9, %v12986_v14 }
 0x657   :  { %v11569_v15 = vpop.f32.mrb[56].mxu0 }
 0x658   :  { %v11570_v16 = vpop.f32.mrb[57].mxu0 }
 0x659   :  { %v11571_v19 = vadd.f32 %v11570_v16, %v11569_v15  ;;  %v11572_v20 = vpop.f32.mrb[58].mxu0 }
 0x65a   :  { %v11573_v23 = vpop.f32.mrb[59].mxu0 }
 0x65b   :  { %v11574_v24 = vadd.f32 %v11573_v23, %v11572_v20 }
 0x65d   :  { %v2560_v25 = vpack.c.bf16 %v11574_v24, %v11571_v19 }
 0x65f   :  { %v11575_v27 = vpop.f32.mrb[60].mxu0  ;;  %12111 = vmatprep.subr.bf16.mxu0 %v2560_v25 }
 0x660   :  { %v11576_v28 = vpop.f32.mrb[61].mxu0  ;;  %12112 = vmatpush3.bf16.msra.mxu0 %v2560_v25 }
 0x661   :  { %v11577_v29 = vadd.f32 %v11576_v28, %v11575_v27  ;;  %v11578_v30 = vpop.f32.mrb[62].mxu0  ;;  %v13019_v27 = vld [vmem:[%s16256_s4 + $0x168] sm:$0xff]   ;;  %v13020_v28 = vld [vmem:[%s16256_s4 + $0x170] sm:$0xff]  }
 0x662   :  { %v11579_v32 = vpop.f32.mrb[63].mxu0 }
 0x663   :  { %v11580_v34 = vadd.f32 %v11579_v32, %v11578_v30  ;;  %v13022_v30 = vld [vmem:[%s16256_s4 + $0x180] sm:$0xff]   ;;  %v13024_v32 = vld [vmem:[%s16256_s4 + $0x190] sm:$0xff]  }
 0x665   :  { %v2561_v36 = vpack.c.bf16 %v11580_v34, %v11577_v29  ;;  %v13021_v29 = vld [vmem:[%s16256_s4 + $0x178] sm:$0xff]   ;;  %v13026_v34 = vld [vmem:[%s16256_s4 + $0x1a0] sm:$0xff]  }
 0x667   :  { %12113 = vmatprep.subr.bf16.mxu0 %v2561_v36 }
 0x668   :  { %12114 = vmatpush3.bf16.msra.mxu0 %v2561_v36  ;;  %v13028_v36 = vld [vmem:[%s16256_s4 + $0x1b0] sm:$0xff]  }
 0x669   :  { %12123 = vmatprep.subr.bf16.mxu0 %v14258_v5 }
 0x66b   :  { %12116 = vmatmul.mubr.msk.bf16.vlgmr.msra.gmra.mrb[24].mxu0 %vm728_vm9, %v12987_v37  ;;  %v13029_v37 = vld [vmem:[%s16256_s4 + $0x1b8] sm:$0xff]  }
 0x66c   :  { %12124 = vmatpush3.bf16.msra.mxu0 %v14258_v5  ;;  %12119 = vmatprep.mubr.msk.bf16.mxu0 %vm728_vm9, %v12988_v38  ;;  %v12991_v5 = vld [vmem:[%s16256_s4 + $0x108] sm:$0xff]   ;;  %v13030_v38 = vld [vmem:[%s16256_s4 + $0x1c0] sm:$0xff]  }
 0x66d   :  { %12125 = vmatprep.subr.bf16.mxu0 %v14277_v18 }
 0x670   :  { %12126 = vmatpush3.bf16.msra.mxu0 %v14277_v18  ;;  %v12993_v18 = vld [vmem:[%s16256_s4 + $0x118] sm:$0xff]  }
 0x671   :  { %12135 = vmatprep.subr.bf16.mxu0 %v14302_v35 }
 0x673   :  { %12120 = vmatmul.mubr.msk.bf16.gmra.mrb[28].mxu0 %vm728_vm9, %v12989_v39  ;;  %v13033_v39 = vld [vmem:[%s16255_s3 + $0x780] sm:$0xff]  }
 0x674   :  { %12127 = vmatprep.mubr.msk.bf16.mxu0 %vm728_vm9, %v12990_v41  ;;  %v13034_v41 = vld [vmem:[%s16255_s3 + $0x7c8] sm:$0xff]  }
 0x67b   :  { %12128 = vmatmul.mubr.msk.bf16.vlgmr.msra.gmra.mrb[24].mxu0 %vm728_vm9, %v12991_v5  ;;  %v13035_v5 = vld [vmem:[%s16255_s3 + $0x788] sm:$0xff]  }
 0x67c   :  { %12136 = vmatpush3.bf16.msra.mxu0 %v14302_v35  ;;  %12131 = vmatprep.mubr.msk.bf16.mxu0 %vm728_vm9, %v12992_v43  ;;  %v12995_v35 = vld [vmem:[%s16256_s4 + $0x128] sm:$0xff]   ;;  %v13037_v43 = vld [vmem:[%s16255_s3 + $0x7d0] sm:$0xff]  }
 0x67d   :  { %12137 = vmatprep.subr.bf16.mxu0 %v14305_v42 }
 0x680   :  { %12138 = vmatpush3.bf16.msra.mxu0 %v14305_v42  ;;  %v12999_v42 = vld [vmem:[%s16255_s3 + $0x5c0] sm:$0xff]  }
 0x681   :  { %12147 = vmatprep.subr.bf16.mxu0 %v14307_v52 }
 0x683   :  { %12132 = vmatmul.mubr.msk.bf16.gmra.mrb[28].mxu0 %vm728_vm9, %v12993_v18  ;;  %v13038_v18 = vld [vmem:[%s16256_s4 + $0x1d8] sm:$0xff]  }
 0x684   :  { %12139 = vmatprep.mubr.msk.bf16.mxu0 %vm728_vm9, %v12994_v44  ;;  %v13039_v44 = vld [vmem:[%s16255_s3 + $0x790] sm:$0xff]  }
 0x68b   :  { %12140 = vmatmul.mubr.msk.bf16.vlgmr.msra.gmra.mrb[24].mxu0 %vm728_vm9, %v12995_v35  ;;  %v13040_v35 = vld [vmem:[%s16255_s3 + $0x7d8] sm:$0xff]  }
 0x68c   :  { %12148 = vmatpush3.bf16.msra.mxu0 %v14307_v52  ;;  %12143 = vmatprep.mubr.msk.bf16.mxu0 %vm728_vm9, %v12996_v45  ;;  %v13000_v52 = vld [vmem:[%s16256_s4 + $0x148] sm:$0xff]   ;;  %v13041_v45 = vld [vmem:[%s16255_s3 + $0x798] sm:$0xff]  }
 0x68d   :  { %12149 = vmatprep.subr.bf16.mxu0 %v14309_v59 }
 0x690   :  { %12150 = vmatpush3.bf16.msra.mxu0 %v14309_v59  ;;  %v13004_v59 = vld [vmem:[%s16256_s4 + $0x150] sm:$0xff]  }
 0x691   :  { %11689 = vmatprep.subr.bf16.mxu0 %v12999_v42  ;;  %v13042_v42 = vld [vmem:[%s16255_s3 + $0x7e0] sm:$0xff]  }
 0x693   :  { %12144 = vmatmul.mubr.msk.bf16.gmra.mrb[28].mxu0 %vm728_vm9, %v12997_v46  ;;  %v13043_v46 = vld [vmem:[%s16255_s3 + $0x7a0] sm:$0xff]  }
 0x694   :  { %12151 = vmatprep.mubr.msk.bf16.mxu0 %vm728_vm9, %v12998_v48  ;;  %v13044_v48 = vld [vmem:[%s16255_s3 + $0x7e8] sm:$0xff]  }
 0x69b   :  { %12152 = vmatmul.mubr.msk.bf16.vlgmr.msra.gmra.mrb[24].mxu0 %vm728_vm9, %v13000_v52  ;;  %v13046_v52 = vld [vmem:[%s16255_s3 + $0x7f0] sm:$0xff]  }
 0x69c   :  { %11690 = vmatpush3.bf16.msra.mxu0 %v13001_v2  ;;  %12155 = vmatprep.mubr.msk.bf16.mxu0 %vm728_vm9, %v13004_v59  ;;  %v13047_v2 = vld [vmem:[%s16255_s3 + $0x7b0] sm:$0xff]   ;;  %v13048_v59 = vld [vmem:[%s16255_s3 + $0x7f8] sm:$0xff]  }
 0x69d   :  { %11691 = vmatprep.subr.bf16.mxu0 %v13002_v53  ;;  %v13049_v53 = vld [vmem:[%s16255_s3 + $0x7b8] sm:$0xff]  }
 0x6a0   :  { %11692 = vmatpush3.bf16.msra.mxu0 %v13003_v17  ;;  %v13050_v17 = vld [vmem:[%s16256_s4 + $0x1e0] sm:$0xff]  }
 0x6a1   :  { %11693 = vmatprep.subr.bf16.mxu0 %v13005_v54 }
 0x6a3   :  { %12156 = vmatmul.mubr.msk.bf16.gmra.mrb[28].mxu0 %vm728_vm9, %v13006_v55 }
 0x6a4   :  { %11694 = vmatpush3.bf16.msra.mxu0 %v13007_v33  ;;  %3710 = vmatprep.mubr.bf16.mxu0 %v13783_v26 }
 0x6a5   :  { %11695 = vmatprep.subr.bf16.mxu0 %v13008_v56 }
 0x6a8   :  { %11696 = vmatpush3.bf16.msra.mxu0 %v13009_v47 }
 0x6a9   :  { %11697 = vmatprep.subr.bf16.mxu0 %v13010_v57 }
 0x6ac   :  { %11698 = vmatpush3.bf16.msra.mxu0 %v13011_v58 }
 0x6ad   :  { %11699 = vmatprep.subr.bf16.mxu0 %v13012_v60 }
 0x6b0   :  { %11700 = vmatpush3.bf16.msra.mxu0 %v13013_v61 }
 0x6b1   :  { %11701 = vmatprep.subr.bf16.mxu0 %v13014_v62 }
 0x6b4   :  { %11702 = vmatpush3.bf16.msra.mxu0 %v13015_v63 }
 0x6b5   :  { %11703 = vmatprep.subr.bf16.mxu0 %v13016_v0  ;;  %v13051_v0 = vld [vmem:[%s16256_s4 + $0x1e8] sm:$0xff]  }
 0x6b8   :  { %11704 = vmatpush3.bf16.msra.mxu0 %v13017_v3  ;;  %v13052_v3 = vld [vmem:[%s16256_s4 + $0x1f0] sm:$0xff]  }
 0x6bb   :  { %3711 = vmatmul.mubr.bf16.vlgmr.msra.gmra.mrb[64].mxu0 %v13781_v22 }
 0x6bc   :  { %3718 = vmatprep.mubr.bf16.mxu0 %v13815_v51 }
 0x6c3   :  { %3719 = vmatmul.mubr.bf16.gmra.mrb[68].mxu0 %v13813_v49 }
 0x6c4   :  { %12163 = vmatprep.mubr.msk.bf16.mxu0 %vm728_vm9, %v13018_v6  ;;  %v13053_v6 = vld [vmem:[%s16256_s4 + $0x1f8] sm:$0xff]  }
 0x78e   :  { %v11705_v7 = vpop.f32.mrb[64].mxu0 }
 0x78f   :  { %v11706_v8 = vpop.f32.mrb[65].mxu0 }
 0x790   :  { %v11707_v9 = vadd.f32 %v11706_v8, %v11705_v7  ;;  %v11708_v10 = vpop.f32.mrb[66].mxu0 }
 0x791   :  { %v11709_v11 = vpop.f32.mrb[67].mxu0 }
 0x792   :  { %v11710_v13 = vadd.f32 %v11709_v11, %v11708_v10 }
 0x794   :  { %v3736_v14 = vpack.c.bf16 %v11710_v13, %v11707_v9 }
 0x796   :  { %v11711_v15 = vpop.f32.mrb[68].mxu0  ;;  %12159 = vmatprep.subr.bf16.mxu0 %v3736_v14 }
 0x797   :  { %v11712_v16 = vpop.f32.mrb[69].mxu0  ;;  %12160 = vmatpush3.bf16.msra.mxu0 %v3736_v14 }
 0x798   :  { %v11713_v19 = vadd.f32 %v11712_v16, %v11711_v15  ;;  %v11714_v20 = vpop.f32.mrb[70].mxu0 }
 0x799   :  { %v11715_v23 = vpop.f32.mrb[71].mxu0 }
 0x79a   :  { %v11716_v24 = vadd.f32 %v11715_v23, %v11714_v20 }
 0x79c   :  { %v3737_v25 = vpack.c.bf16 %v11716_v24, %v11713_v19 }
 0x79e   :  { %12161 = vmatprep.subr.bf16.mxu0 %v3737_v25 }
 0x79f   :  { %12162 = vmatpush3.bf16.msra.mxu0 %v3737_v25 }
 0x7a0   :  { %12171 = vmatprep.subr.bf16.mxu0 %v14311_v4 }
 0x7a2   :  { %12164 = vmatmul.mubr.msk.bf16.vlgmr.msra.gmra.mrb[24].mxu0 %vm728_vm9, %v13019_v27 }
 0x7a3   :  { %12172 = vmatpush3.bf16.msra.mxu0 %v14311_v4  ;;  %12167 = vmatprep.mubr.msk.bf16.mxu0 %vm728_vm9, %v13020_v28  ;;  %v13023_v4 = vld [vmem:[%s16256_s4 + $0x188] sm:$0xff]  }
 0x7a4   :  { %12173 = vmatprep.subr.bf16.mxu0 %v14313_v12 }
 0x7a7   :  { %12174 = vmatpush3.bf16.msra.mxu0 %v14313_v12  ;;  %v13025_v12 = vld [vmem:[%s16256_s4 + $0x198] sm:$0xff]  }
 0x7a8   :  { %12183 = vmatprep.subr.bf16.mxu0 %v14315_v21 }
 0x7aa   :  { %12168 = vmatmul.mubr.msk.bf16.gmra.mrb[28].mxu0 %vm728_vm9, %v13021_v29 }
 0x7ab   :  { %12175 = vmatprep.mubr.msk.bf16.mxu0 %vm728_vm9, %v13022_v30 }
 0x7b2   :  { %12176 = vmatmul.mubr.msk.bf16.vlgmr.msra.gmra.mrb[24].mxu0 %vm728_vm9, %v13023_v4 }
 0x7b3   :  { %12184 = vmatpush3.bf16.msra.mxu0 %v14315_v21  ;;  %12179 = vmatprep.mubr.msk.bf16.mxu0 %vm728_vm9, %v13024_v32  ;;  %v13027_v21 = vld [vmem:[%s16256_s4 + $0x1a8] sm:$0xff]  }
 0x7b4   :  { %12185 = vmatprep.subr.bf16.mxu0 %v14321_v31 }
 0x7b7   :  { %12186 = vmatpush3.bf16.msra.mxu0 %v14321_v31  ;;  %v13031_v31 = vld [vmem:[%s16255_s3 + $0x7c0] sm:$0xff]  }
 0x7b8   :  { %12195 = vmatprep.subr.bf16.mxu0 %v14323_v40 }
 0x7ba   :  { %12180 = vmatmul.mubr.msk.bf16.gmra.mrb[28].mxu0 %vm728_vm9, %v13025_v12 }
 0x7bb   :  { %12187 = vmatprep.mubr.msk.bf16.mxu0 %vm728_vm9, %v13026_v34 }
 0x7c2   :  { %12188 = vmatmul.mubr.msk.bf16.vlgmr.msra.gmra.mrb[24].mxu0 %vm728_vm9, %v13027_v21 }
 0x7c3   :  { %12196 = vmatpush3.bf16.msra.mxu0 %v14323_v40  ;;  %12191 = vmatprep.mubr.msk.bf16.mxu0 %vm728_vm9, %v13028_v36  ;;  %v13032_v40 = vld [vmem:[%s16256_s4 + $0x1c8] sm:$0xff]  }
 0x7c4   :  { %12197 = vmatprep.subr.bf16.mxu0 %v14325_v50 }
 0x7c7   :  { %12198 = vmatpush3.bf16.msra.mxu0 %v14325_v50  ;;  %v13036_v50 = vld [vmem:[%s16256_s4 + $0x1d0] sm:$0xff]  }
 0x7c8   :  { %11825 = vmatprep.subr.bf16.mxu0 %v13031_v31 }
 0x7ca   :  { %12192 = vmatmul.mubr.msk.bf16.gmra.mrb[28].mxu0 %vm728_vm9, %v13029_v37 }
 0x7cb   :  { %12199 = vmatprep.mubr.msk.bf16.mxu0 %vm728_vm9, %v13030_v38 }
 0x7d2   :  { %12200 = vmatmul.mubr.msk.bf16.vlgmr.msra.gmra.mrb[24].mxu0 %vm728_vm9, %v13032_v40 }
 0x7d3   :  { %11826 = vmatpush3.bf16.msra.mxu0 %v13033_v39  ;;  %12203 = vmatprep.mubr.msk.bf16.mxu0 %vm728_vm9, %v13036_v50 }
 0x7d4   :  { %11827 = vmatprep.subr.bf16.mxu0 %v13034_v41 }
 0x7d7   :  { %11828 = vmatpush3.bf16.msra.mxu0 %v13035_v5 }
 0x7d8   :  { %11829 = vmatprep.subr.bf16.mxu0 %v13037_v43  ;;  %v5019_v43 = vld [vmem:[%s16257_s5] sm:$0xff] }
 0x7d9   :  { %12235 = vmatprep.mubr.msk.f32.mxu1 %vm244_vm0, %v5019_v43  ;;  %v5027_v43 = vld [vmem:[%s16258_s6 + $0x30] sm:$0xff] }
 0x7da   :  { %12204 = vmatmul.mubr.msk.bf16.gmra.mrb[28].mxu0 %vm728_vm9, %v13038_v18 }
 0x7db   :  { %11830 = vmatpush3.bf16.msra.mxu0 %v13039_v44  ;;  %4886 = vmatprep.mubr.bf16.mxu0 %v13783_v26  ;;  %v13045_v26 = vld [vmem:[%s16255_s3 + $0x7a8] sm:$0xff]  }
 0x7dc   :  { %11831 = vmatprep.subr.bf16.mxu0 %v13040_v35 }
 0x7df   :  { %11832 = vmatpush3.bf16.msra.mxu0 %v13041_v45 }
 0x7e0   :  { %11833 = vmatprep.subr.bf16.mxu0 %v13042_v42 }
 0x7e3   :  { %11834 = vmatpush3.bf16.msra.mxu0 %v13043_v46 }
 0x7e4   :  { %11835 = vmatprep.subr.bf16.mxu0 %v13044_v48 }
 0x7e7   :  { %11836 = vmatpush3.bf16.msra.mxu0 %v13045_v26 }
 0x7e8   :  { %11837 = vmatprep.subr.bf16.mxu0 %v13046_v52 }
 0x7eb   :  { %11838 = vmatpush3.bf16.msra.mxu0 %v13047_v2 }
 0x7ec   :  { %11839 = vmatprep.subr.bf16.mxu0 %v13048_v59 }
 0x7ef   :  { %11840 = vmatpush3.bf16.msra.mxu0 %v13049_v53 }
 0x7f2   :  { %4887 = vmatmul.mubr.bf16.vlgmr.msra.gmra.mrb[72].mxu0 %v13781_v22 }
 0x7f3   :  { %4894 = vmatprep.mubr.bf16.mxu0 %v13815_v51 }
 0x7fa   :  { %4895 = vmatmul.mubr.bf16.gmra.mrb[76].mxu0 %v13813_v49 }
 0x7fb   :  { %12211 = vmatprep.mubr.msk.bf16.mxu0 %vm728_vm9, %v13050_v17 }
 0x8c5   :  { %v11841_v54 = vpop.f32.mrb[72].mxu0 }
 0x8c6   :  { %v11842_v55 = vpop.f32.mrb[73].mxu0 }
 0x8c7   :  { %v11843_v33 = vadd.f32 %v11842_v55, %v11841_v54  ;;  %v11844_v56 = vpop.f32.mrb[74].mxu0 }
 0x8c8   :  { %v11845_v47 = vpop.f32.mrb[75].mxu0 }
 0x8c9   :  { %v11846_v57 = vadd.f32 %v11845_v47, %v11844_v56 }
 0x8cb   :  { %v4912_v58 = vpack.c.bf16 %v11846_v57, %v11843_v33 }
 0x8cd   :  { %v11847_v60 = vpop.f32.mrb[76].mxu0  ;;  %12207 = vmatprep.subr.bf16.mxu0 %v4912_v58 }
 0x8ce   :  { %v11848_v22 = vpop.f32.mrb[77].mxu0  ;;  %12208 = vmatpush3.bf16.msra.mxu0 %v4912_v58 }
 0x8cf   :  { %v11849_v51 = vadd.f32 %v11848_v22, %v11847_v60  ;;  %v11850_v61 = vpop.f32.mrb[78].mxu0 }
 0x8d0   :  { %v11851_v49 = vpop.f32.mrb[79].mxu0 }
 0x8d1   :  { %v11852_v62 = vadd.f32 %v11851_v49, %v11850_v61 }
 0x8d3   :  { %v4913_v63 = vpack.c.bf16 %v11852_v62, %v11849_v51 }
 0x8d5   :  { %12209 = vmatprep.subr.bf16.mxu0 %v4913_v63 }
 0x8d6   :  { %12210 = vmatpush3.bf16.msra.mxu0 %v4913_v63 }
 0x8d9   :  { %12212 = vmatmul.mubr.msk.bf16.vlgmr.msra.gmra.mrb[24].mxu0 %vm728_vm9, %v13051_v0 }
 0x8da   :  { %12215 = vmatprep.mubr.msk.bf16.mxu0 %vm728_vm9, %v13052_v3  ;;  %v5020_v3 = vld [vmem:[%s16257_s5 + $0x8] sm:$0xff] }
 0x8e1   :  { %12216 = vmatmul.mubr.msk.bf16.gmra.mrb[28].mxu0 %vm728_vm9, %v13053_v6 }
 0x8e2   :  { %5590 = vmatprep.mubr.bf16.mxu0 %v13488_v1 }
 0x9ac   :  { %v14840_v7 = vpop.f32.mrb[24].mxu0 }
 0x9ad   :  { %v14842_v8 = vpop.f32.mrb[25].mxu0  ;;  %v5035_v9 = vsel %vm244_vm0, %v14840_v7, 0.0  ;;  %v5055_v10 = vmul.f32 %v14840_v7, %v14840_v7 }
 0x9ae   :  { %5036 = vadd.xlane.f32.xlu1 %v5035_v9  ;;  %v14848_v11 = vpop.f32.mrb[26].mxu0  ;;  %v5029_v13 = vsel %vm244_vm0, %v14842_v8, 0.0  ;;  %v5053_v19 = vmul.f32 %v14842_v8, %v14842_v8 }
 0x9af   :  { %5030 = vadd.xlane.f32.xlu0 %v5029_v13  ;;  %v14852_v14 = vpop.f32.mrb[27].mxu0  ;;  %v5067_v15 = vsel %vm244_vm0, %v5055_v10, 0.0  ;;  %v5038_v16 = vsel %vm244_vm0, %v14848_v11, 0.0  ;;  %v5056_v28 = vmul.f32 %v14848_v11, %v14848_v11 }
 0x9b0   :  { %v5032_v24 = vsel %vm244_vm0, %v14852_v14, 0.0  ;;  %v5061_v27 = vsel %vm244_vm0, %v5053_v19, 0.0  ;;  %v5054_v32 = vmul.f32 %v14852_v14, %v14852_v14  ;;  %v5021_v19 = vld [vmem:[%s16258_s6] sm:$0xff] }
 0x9b1   :  { %v5070_v4 = vsel %vm244_vm0, %v5056_v28, 0.0 }
 0x9b2   :  { %5068 = vadd.xlane.f32.xlu1 %v5067_v15  ;;  %v5064_v21 = vsel %vm244_vm0, %v5054_v32, 0.0 }
 0x9b3   :  { %5039 = vadd.xlane.f32.xlu0 %v5038_v16 }
 0x9b4   :  { %v14859_v20 = vpop.f32.mrb[28].mxu0 }
 0x9b5   :  { %v14861_v23 = vpop.f32.mrb[29].mxu0  ;;  %v5047_v30 = vsel %vm244_vm0, %v14859_v20, 0.0  ;;  %v5059_v31 = vmul.f32 %v14859_v20, %v14859_v20 }
 0x9b6   :  { %5033 = vadd.xlane.f32.xlu1 %v5032_v24  ;;  %v14865_v25 = vpop.f32.mrb[30].mxu0  ;;  %v5041_v12 = vsel %vm244_vm0, %v14861_v23, 0.0  ;;  %v5057_v34 = vmul.f32 %v14861_v23, %v14861_v23 }
 0x9b7   :  { %5062 = vadd.xlane.f32.xlu0 %v5061_v27  ;;  %v14870_v29 = vpop.f32.mrb[31].mxu0  ;;  %v5050_v37 = vsel %vm244_vm0, %v14865_v25, 0.0  ;;  %v5079_v38 = vsel %vm244_vm0, %v5059_v31, 0.0  ;;  %v5060_v41 = vmul.f32 %v14865_v25, %v14865_v25 }
 0x9b8   :  { %v5073_v36 = vsel %vm244_vm0, %v5057_v34, 0.0  ;;  %v5044_v40 = vsel %vm244_vm0, %v14870_v29, 0.0  ;;  %v5058_v39 = vmul.f32 %v14870_v29, %v14870_v29 }
 0x9b9   :  { %v5082_v5 = vsel %vm244_vm0, %v5060_v41, 0.0  ;;  %v5025_v41 = vld [vmem:[%s16258_s6 + $0x20] sm:$0xff] }
 0x9ba   :  { %5048 = vadd.xlane.f32.xlu1 %v5047_v30  ;;  %v5076_v50 = vsel %vm244_vm0, %v5058_v39, 0.0  ;;  %v5023_v39 = vld [vmem:[%s16258_s6 + $0x10] sm:$0xff] }
 0x9bb   :  { %5071 = vadd.xlane.f32.xlu0 %v5070_v4 }
 0x9be   :  { %5042 = vadd.xlane.f32.xlu1 %v5041_v12 }
 0x9bf   :  { %5065 = vadd.xlane.f32.xlu0 %v5064_v21 }
 0x9c2   :  { %5074 = vadd.xlane.f32.xlu1 %v5073_v36 }
 0x9c3   :  { %5051 = vadd.xlane.f32.xlu0 %v5050_v37 }
 0x9c6   :  { %5080 = vadd.xlane.f32.xlu1 %v5079_v38 }
 0x9c7   :  { %5045 = vadd.xlane.f32.xlu0 %v5044_v40  ;;  %v5022_v40 = vld [vmem:[%s16258_s6 + $0x8] sm:$0xff] }
 0x9cb   :  { %5077 = vadd.xlane.f32.xlu0 %v5076_v50  ;;  %v5024_v50 = vld [vmem:[%s16258_s6 + $0x18] sm:$0xff] }
 0x9cf   :  { %5083 = vadd.xlane.f32.xlu0 %v5082_v5  ;;  %v5026_v5 = vld [vmem:[%s16258_s6 + $0x28] sm:$0xff] }
 0xa3b   :  { %v5037_v18 = vpop.xlane.xlu1 %5036 }
 0xa3c   :  { %v5031_v44 = vpop.xlane.xlu0 %5030 }
 0xa3f   :  { %v5069_v35 = vpop.xlane.xlu1 %5068 }
 0xa40   :  { %v5040_v45 = vpop.xlane.xlu0 %5039  ;;  %v5088_v55 = vsel %vm5085_vm10, %v5037_v18, %v5069_v35  ;;  %v5028_v18 = vld [vmem:[%s16258_s6 + $0x38] sm:$0xff] }
 0xa41   :  { %v13056_v35 = vld [vmem:[%s16259_s7 + $0x8c] ss:$16 sps:$4 sm:$0xff]  }
 0xa43   :  { %v5034_v42 = vpop.xlane.xlu1 %5033 }
 0xa44   :  { %v5063_v46 = vpop.xlane.xlu0 %5062 }
 0xa45   :  { %v5086_v2 = vsel %vm5085_vm10, %v5031_v44, %v5063_v46  ;;  %v13054_v44 = vld [vmem:[%s16259_s7 + $0x88] ss:$16 sps:$4 sm:$0xff]  }
 0xa47   :  { %v5049_v48 = vpop.xlane.xlu1 %5048 }
 0xa48   :  { %v5072_v26 = vpop.xlane.xlu0 %5071 }
 0xa49   :  { %v5089_v59 = vsel %vm5085_vm10, %v5040_v45, %v5072_v26  ;;  %v13057_v45 = vld [vmem:[%s16259_s7 + $0x80] ss:$16 sps:$4 sm:$0xff]   ;;  %v13062_v26 = vld [vmem:[%s16259_s7 + $0xac] ss:$16 sps:$4 sm:$0xff]  }
 0xa4a   :  { %v12334_v33 = vpack.c.bf16 %v5089_v59, %v5088_v55  ;;  %v13065_v59 = vld [vmem:[%s16259_s7 + $0xa4] ss:$16 sps:$4 sm:$0xff]   ;;  %v13490_v55 = vmov 1  }
 0xa4b   :  { %v5043_v17 = vpop.xlane.xlu1 %5042 }
 0xa4c   :  { %v5066_v52 = vpop.xlane.xlu0 %5065 }
 0xa4d   :  { %v5087_v53 = vsel %vm5085_vm10, %v5034_v42, %v5066_v52  ;;  %v13059_v42 = vld [vmem:[%s16259_s7 + $0x84] ss:$16 sps:$4 sm:$0xff]   ;;  %v13060_v52 = vld [vmem:[%s16259_s7 + $0xa8] ss:$16 sps:$4 sm:$0xff]  }
 0xa4e   :  { %v12330_v54 = vpack.c.bf16 %v5087_v53, %v5086_v2  ;;  %5558 = vmatprep.subr.bf16.mxu0 %v13059_v42  ;;  %v13063_v2 = vld [vmem:[%s16259_s7 + $0xa0] ss:$16 sps:$4 sm:$0xff]  }
 0xa4f   :  { %v5075_v47 = vpop.xlane.xlu1 %5074  ;;  %5559 = vmatpush1.bf16.msra.mxu0 %v13057_v45  ;;  %v13108_v45 = vld [vmem:[%s16259_s7 + $0x140] ss:$16 sps:$4 sm:$0xff]  }
 0xa50   :  { %12331 = vmatprep.subr.bf16.mxu1 %v12330_v54  ;;  %v5052_v56 = vpop.xlane.xlu0 %5051  ;;  %v5090_v60 = vsel %vm5085_vm10, %v5043_v17, %v5075_v47  ;;  %5560 = vmatprep.subr.bf16.mxu0 %v13065_v59  ;;  %v13069_v47 = vld [vmem:[%s16259_s7 + $0xc0] ss:$16 sps:$4 sm:$0xff]   ;;  %v13119_v59 = vld [vmem:[%s16259_s7 + $0x12c] ss:$16 sps:$4 sm:$0xff]  }
 0xa51   :  { %12333 = vmatpush3.bf16.msra.mxu1 %v12330_v54  ;;  %v13068_v54 = vld [vmem:[%s16259_s7 + $0xcc] ss:$16 sps:$4 sm:$0xff]  }
 0xa52   :  { %12335 = vmatprep.subr.bf16.mxu1 %v12334_v33 }
 0xa53   :  { %v5081_v51 = vpop.xlane.xlu1 %5080  ;;  %5561 = vmatpush1.bf16.msra.mxu0 %v13063_v2 }
 0xa54   :  { %v5046_v57 = vpop.xlane.xlu0 %5045  ;;  %v5092_v62 = vsel %vm5085_vm10, %v5049_v48, %v5081_v51  ;;  %v13077_v51 = vld [vmem:[%s16259_s7 + $0xe4] ss:$16 sps:$4 sm:$0xff]  }
 0xa55   :  { %12337 = vmatpush3.bf16.msra.mxu1 %v12334_v33  ;;  %v13066_v33 = vld [vmem:[%s16259_s7 + $0xc8] ss:$16 sps:$4 sm:$0xff]  }
 0xa58   :  { %v5078_v58 = vpop.xlane.xlu0 %5077 }
 0xa59   :  { %v5091_v22 = vsel %vm5085_vm10, %v5046_v57, %v5078_v58 }
 0xa5a   :  { %v12338_v61 = vpack.c.bf16 %v5091_v22, %v5090_v60  ;;  %v13074_v60 = vld [vmem:[%s16259_s7 + $0xec] ss:$16 sps:$4 sm:$0xff]   ;;  %v13072_v22 = vld [vmem:[%s16259_s7 + $0xe8] ss:$16 sps:$4 sm:$0xff]  }
 0xa5c   :  { %12339 = vmatprep.subr.bf16.mxu1 %v12338_v61  ;;  %v5084_v49 = vpop.xlane.xlu0 %5083 }
 0xa5d   :  { %v5093_v63 = vsel %vm5085_vm10, %v5052_v56, %v5084_v49  ;;  %12341 = vmatpush3.bf16.msra.mxu1 %v12338_v61  ;;  %v13071_v56 = vld [vmem:[%s16259_s7 + $0xc4] ss:$16 sps:$4 sm:$0xff]   ;;  %v13075_v61 = vld [vmem:[%s16259_s7 + $0xe0] ss:$16 sps:$4 sm:$0xff]  }
 0xa5e   :  { %v12342_v0 = vpack.c.bf16 %v5093_v63, %v5092_v62  ;;  %5562 = vmatprep.subr.bf16.mxu0 %v13071_v56  ;;  %v13080_v63 = vld [vmem:[%s16259_s7 + $0x4] ss:$16 sps:$4 sm:$0xff]  }
 0xa5f   :  { %5563 = vmatpush1.bf16.msra.mxu0 %v13069_v47  ;;  %v13128_v56 = vld [vmem:[%s16259_s7 + $0x184] ss:$16 sps:$4 sm:$0xff]   ;;  %v13126_v47 = vld [vmem:[%s16259_s7 + $0x180] ss:$16 sps:$4 sm:$0xff]  }
 0xa60   :  { %12343 = vmatprep.subr.bf16.mxu1 %v12342_v0  ;;  %5564 = vmatprep.subr.bf16.mxu0 %v13077_v51  ;;  %v13137_v51 = vld [vmem:[%s16259_s7 + $0x1e4] ss:$16 sps:$4 sm:$0xff]  }
 0xa61   :  { %12345 = vmatpush3.bf16.msra.mxu1 %v12342_v0 }
 0xa63   :  { %5565 = vmatpush1.bf16.msra.mxu0 %v13075_v61  ;;  %v13135_v61 = vld [vmem:[%s16259_s7 + $0x1e0] ss:$16 sps:$4 sm:$0xff]  }
 0xa64   :  { %12236 = vmatmul.mubr.msk.f32.vlgmr.msra.gmra.mrb[64].mxu1 %vm244_vm0, %v5020_v3 }
 0xa65   :  { %12242 = vmatprep.mubr.msk.f32.mxu1 %vm5197_vm11, %v5021_v19 }
 0xb37   :  { %v12237_v6 = vpop.f32.mrb[64].mxu1 }
 0xb38   :  { %v5176_v9 = vmul.f32 0.00390625, %v12237_v6  ;;  %v5166_v10 = vpop.f32.mrb[65].mxu1 }
 0xb39   :  { %v5175_v13 = vmul.f32 0.00390625, %v5166_v10 }
 0xb3a   :  { %v5178_v15 = vmul.f32 %v5176_v9, %v5176_v9 }
 0xb3b   :  { %v5177_v16 = vmul.f32 %v5175_v13, %v5175_v13 }
 0xb3c   :  { %5183 = vrot.lane.b32.xlu0 %v5178_v15, %s13489_s27 }
 0xb3d   :  { %5181 = vrot.lane.b32.xlu1 %v5177_v16, %s13489_s27  ;;  %v13078_v16 = vld [vmem:[%s16259_s7] ss:$16 sps:$4 sm:$0xff]  }
 0xbae   :  { %v5184_v24 = vpop.permute.xlu0 %5183 }
 0xbaf   :  { %v5188_v27 = vsub.f32 %v5176_v9, %v5184_v24  ;;  %v5182_v28 = vpop.permute.xlu1 %5181  ;;  %v13083_v24 = vld [vmem:[%s16259_s7 + $0x24] ss:$16 sps:$4 sm:$0xff]  }
 0xbb0   :  { %v5187_v30 = vsub.f32 %v5175_v13, %v5182_v28  ;;  %v13084_v28 = vld [vmem:[%s16259_s7 + $0x40] ss:$16 sps:$4 sm:$0xff]  }
 0xbb1   :  { %v5190_v4 = vmax.f32 %v5188_v27, 0.0  ;;  %v13086_v27 = vld [vmem:[%s16259_s7 + $0x44] ss:$16 sps:$4 sm:$0xff]  }
 0xbb2   :  { %v5189_v32 = vmax.f32 %v5187_v30, 0.0  ;;  %v13089_v30 = vld [vmem:[%s16259_s7 + $0x64] ss:$16 sps:$4 sm:$0xff]  }
 0xbb3   :  { %v5192_v12 = vadd.f32 1e-05, %v5190_v4  ;;  %v13087_v4 = vld [vmem:[%s16259_s7 + $0x60] ss:$16 sps:$4 sm:$0xff]  }
 0xbb4   :  { %v5191_v34 = vadd.f32 1e-05, %v5189_v32  ;;  %v13092_v32 = vld [vmem:[%s16259_s7 + $0xc] ss:$16 sps:$4 sm:$0xff]  }
 0xbb5   :  { %13478 = vrsqrt.f32 %v5192_v12  ;;  %v13090_v12 = vld [vmem:[%s16259_s7 + $0x8] ss:$16 sps:$4 sm:$0xff]  }
 0xbb6   :  { %13480 = vrsqrt.f32 %v5191_v34  ;;  %v13095_v34 = vld [vmem:[%s16259_s7 + $0x2c] ss:$16 sps:$4 sm:$0xff]  }
 0xbbf   :  { %v13479_v21 = vpop.eup %13478 }
 0xbc0   :  { %v13481_v36 = vpop.eup %13480  ;;  %v5196_v31 = vsel %vm5085_vm10, %v5176_v9, %v13479_v21  ;;  %v13093_v21 = vld [vmem:[%s16259_s7 + $0x28] ss:$16 sps:$4 sm:$0xff]  }
 0xbc1   :  { %v5195_v37 = vsel %vm5085_vm10, %v5175_v13, %v13481_v36  ;;  %v13098_v36 = vld [vmem:[%s16259_s7 + $0x4c] ss:$16 sps:$4 sm:$0xff]  }
 0xbc2   :  { %v12346_v38 = vpack.c.bf16 %v5196_v31, %v5195_v37  ;;  %v13096_v31 = vld [vmem:[%s16259_s7 + $0x48] ss:$16 sps:$4 sm:$0xff]   ;;  %v13101_v37 = vld [vmem:[%s16259_s7 + $0x6c] ss:$16 sps:$4 sm:$0xff]  }
 0xbc4   :  { %12347 = vmatprep.subr.bf16.mxu1 %v12346_v38 }
 0xbc5   :  { %12349 = vmatpush3.bf16.msra.mxu1 %v12346_v38  ;;  %v13099_v38 = vld [vmem:[%s16259_s7 + $0x68] ss:$16 sps:$4 sm:$0xff]  }
 0xbc6   :  { %5599 = vmatprep.subr.bf16.mxu1 %v13056_v35 }
 0xbc8   :  { %12243 = vmatmul.mubr.msk.f32.vlgmr.msra.gmra.mrb[66].mxu1 %vm5197_vm11, %v5022_v40  ;;  %v13104_v40 = vld [vmem:[%s16259_s7 + $0x104] ss:$16 sps:$4 sm:$0xff]  }
 0xbc9   :  { %12245 = vmatprep.mubr.msk.f32.mxu1 %vm5197_vm11, %v5023_v39  ;;  %5600 = vmatpush1.bf16.msra.mxu1 %v13054_v44  ;;  %v13102_v39 = vld [vmem:[%s16259_s7 + $0x100] ss:$16 sps:$4 sm:$0xff]   ;;  %v13110_v44 = vld [vmem:[%s16259_s7 + $0x144] ss:$16 sps:$4 sm:$0xff]  }
 0xbca   :  { %5601 = vmatprep.subr.bf16.mxu1 %v13062_v26 }
 0xbcc   :  { %12246 = vmatmul.mubr.msk.f32.gmra.mrb[68].mxu1 %vm5197_vm11, %v5024_v50 }
 0xbcd   :  { %12248 = vmatprep.mubr.msk.f32.mxu1 %vm5197_vm11, %v5025_v41  ;;  %5602 = vmatpush1.bf16.msra.mxu1 %v13060_v52  ;;  %v13107_v41 = vld [vmem:[%s16259_s7 + $0x124] ss:$16 sps:$4 sm:$0xff]   ;;  %v13114_v52 = vld [vmem:[%s16259_s7 + $0x108] ss:$16 sps:$4 sm:$0xff]  }
 0xbce   :  { %5603 = vmatprep.subr.bf16.mxu1 %v13068_v54  ;;  %v13120_v54 = vld [vmem:[%s16259_s7 + $0x148] ss:$16 sps:$4 sm:$0xff]  }
 0xbd0   :  { %12249 = vmatmul.mubr.msk.f32.gmra.mrb[70].mxu1 %vm5197_vm11, %v5026_v5 }
 0xbd1   :  { %12251 = vmatprep.mubr.msk.f32.mxu1 %vm5197_vm11, %v5027_v43  ;;  %5604 = vmatpush1.bf16.msra.mxu1 %v13066_v33  ;;  %v13123_v33 = vld [vmem:[%s16259_s7 + $0x168] ss:$16 sps:$4 sm:$0xff]  }
 0xbd2   :  { %5605 = vmatprep.subr.bf16.mxu1 %v13074_v60  ;;  %v13134_v60 = vld [vmem:[%s16259_s7 + $0x1c4] ss:$16 sps:$4 sm:$0xff]  }
 0xbd4   :  { %12252 = vmatmul.mubr.msk.f32.gmra.mrb[72].mxu1 %vm5197_vm11, %v5028_v18  ;;  %v13105_v18 = vld [vmem:[%s16259_s7 + $0x120] ss:$16 sps:$4 sm:$0xff]  }
 0xbd5   :  { %5631 = vmatprep.mubr.bf16.mxu1 %v13488_v1  ;;  %5606 = vmatpush1.bf16.msra.mxu1 %v13072_v22  ;;  %v13132_v22 = vld [vmem:[%s16259_s7 + $0x1c0] ss:$16 sps:$4 sm:$0xff]  }
 0xbd6   :  { %5723 = vmatprep.subr.bf16.mxu1 %v13080_v63 }
 0xc9b   :  { %v12244_v46 = vpop.f32.mrb[66].mxu1 }
 0xc9c   :  { %5334 = vperm.xlu0 %12688, %v12244_v46   ;;  %v5288_v48 = vpop.f32.mrb[67].mxu1 }
 0xc9d   :  { %5329 = vperm.xlu1 %12689, %v5288_v48  }
 0xc9f   :  { %v12247_v53 = vpop.f32.mrb[68].mxu1 }
 0xca0   :  { %v5298_v17 = vpop.f32.mrb[69].mxu1 }
 0xca1   :  { %12690 = vset.pattern.permute.xlu1 %v13490_v55  ;;  %5339 = vperm.xlu0 %12688, %v5298_v17  }
 0xca2   :  { %5376 = vperm.xlu1 %12690, %v5288_v48   ;;  %v13116_v48 = vld [vmem:[%s16259_s7 + $0x10c] ss:$16 sps:$4 sm:$0xff]  }
 0xca3   :  { %v12250_v57 = vpop.f32.mrb[70].mxu1 }
 0xca4   :  { %v5308_v58 = vpop.f32.mrb[71].mxu1 }
 0xca5   :  { %5344 = vperm.xlu0 %12688, %v12247_v53  }
 0xca6   :  { %5380 = vperm.xlu1 %12690, %v12244_v46   ;;  %v13111_v46 = vld [vmem:[%s16259_s7 + $0x160] ss:$16 sps:$4 sm:$0xff]  }
 0xca7   :  { %v12253_v49 = vpop.f32.mrb[72].mxu1 }
 0xca8   :  { %v5318_v62 = vpop.f32.mrb[73].mxu1 }
 0xca9   :  { %5349 = vperm.xlu0 %12688, %v5308_v58  }
 0xcaa   :  { %5384 = vperm.xlu1 %12690, %v5298_v17   ;;  %v13122_v17 = vld [vmem:[%s16259_s7 + $0x14c] ss:$16 sps:$4 sm:$0xff]  }
 0xcad   :  { %5354 = vperm.xlu0 %12688, %v12250_v57  }
 0xcae   :  { %5388 = vperm.xlu1 %12690, %v12247_v53   ;;  %v13117_v53 = vld [vmem:[%s16259_s7 + $0x128] ss:$16 sps:$4 sm:$0xff]  }
 0xcb1   :  { %5359 = vperm.xlu0 %12688, %v5318_v62  }
 0xcb2   :  { %5392 = vperm.xlu1 %12690, %v5308_v58   ;;  %v13129_v58 = vld [vmem:[%s16259_s7 + $0x1a0] ss:$16 sps:$4 sm:$0xff]  }
 0xcb5   :  { %5364 = vperm.xlu0 %12688, %v12253_v49  }
 0xcb6   :  { %5396 = vperm.xlu1 %12690, %v12250_v57   ;;  %v13131_v57 = vld [vmem:[%s16259_s7 + $0x1a4] ss:$16 sps:$4 sm:$0xff]  }
 0xcb9   :  { %12691 = vset.pattern.permute.xlu0 %v13490_v55  ;;  %v13125_v55 = vld [vmem:[%s16259_s7 + $0x16c] ss:$16 sps:$4 sm:$0xff]  }
 0xcba   :  { %5400 = vperm.xlu1 %12690, %v5318_v62   ;;  %v13138_v62 = vld [vmem:[%s16259_s7 + $0x188] ss:$16 sps:$4 sm:$0xff]  }
 0xcbe   :  { %5404 = vperm.xlu1 %12690, %v12253_v49   ;;  %v13140_v49 = vld [vmem:[%s16259_s7 + $0x18c] ss:$16 sps:$4 sm:$0xff]  }
 0xd1b   :  { %v5335_v50 = vpop.permute.xlu0 %5334 }
 0xd1c   :  { %v5330_v0 = vpop.permute.xlu1 %5329  ;;  %v5368_v43 = vsub.f32 %v14852_v14, %v5335_v50  ;;  %v13113_v14 = vld [vmem:[%s16259_s7 + $0x164] ss:$16 sps:$4 sm:$0xff]   ;;  %v13168_v50 = vld [vmem:[%s16259_s7 + $0x248] ss:$16 sps:$4 sm:$0xff]  }
 0xd1d   :  { %v5367_v3 = vsub.f32 %v14842_v8, %v5330_v0  ;;  %v13081_v8 = vld [vmem:[%s16259_s7 + $0x20] ss:$16 sps:$4 sm:$0xff]   ;;  %v13143_v0 = vld [vmem:[%s16259_s7 + $0x1ac] ss:$16 sps:$4 sm:$0xff]  }
 0xd21   :  { %v5377_v6 = vpop.permute.xlu1 %5376 }
 0xd22   :  { %v5407_v9 = vmul.f32 %v5377_v6, %v5367_v3  ;;  %v13141_v3 = vld [vmem:[%s16259_s7 + $0x1a8] ss:$16 sps:$4 sm:$0xff]   ;;  %v13146_v6 = vld [vmem:[%s16259_s7 + $0x1cc] ss:$16 sps:$4 sm:$0xff]  }
 0xd24   :  { %vm5415_vm12 = vcmp.ge.f32.partialorder %v5407_v9, 0.0  ;;  %v5423_v10 = vmul.f32 0.2, %v5407_v9 }
 0xd25   :  { %v5381_v5 = vpop.permute.xlu1 %5380 }
 0xd26   :  { %v5431_v13 = vsel %vm5415_vm12, %v5407_v9, %v5423_v10  ;;  %v5408_v35 = vmul.f32 %v5381_v5, %v5368_v43  ;;  %v13144_v9 = vld [vmem:[%s16259_s7 + $0x1c8] ss:$16 sps:$4 sm:$0xff]   ;;  %v13149_v10 = vld [vmem:[%s16259_s7 + $0x1ec] ss:$16 sps:$4 sm:$0xff]   ;;  %v13176_v43 = vld [vmem:[%s16259_s7 + $0x284] ss:$16 sps:$4 sm:$0xff]  }
 0xd27   :  { %v5439_v15 = vpack.c.bf16 %v5431_v13, %v5431_v13  ;;  %v13147_v13 = vld [vmem:[%s16259_s7 + $0x1e8] ss:$16 sps:$4 sm:$0xff]   ;;  %vm13493_vm12 = vmmov 0  }
 0xd28   :  { %v5424_v42 = vmul.f32 0.2, %v5408_v35  ;;  %vm5416_vm13 = vcmp.ge.f32.partialorder %v5408_v35, 0.0  ;;  %v13171_v5 = vld [vmem:[%s16259_s7 + $0x268] ss:$16 sps:$4 sm:$0xff]  }
 0xd29   :  { %v5474_v19 = vrot.slane %v5439_v15, 2 }
 0xd2a   :  { %v5432_v26 = vsel %vm5416_vm13, %v5408_v35, %v5424_v42  ;;  %v13177_v35 = vld [vmem:[%s16259_s7 + $0x2a0] ss:$16 sps:$4 sm:$0xff]   ;;  %v13185_v42 = vld [vmem:[%s16259_s7 + $0x2e4] ss:$16 sps:$4 sm:$0xff]  }
 0xd2b   :  { %10770 = vmatmul.mubr.msk.bf16.vlgmr.msra.gmra.mrb[80].mxu0 %vm244_vm0, %v5474_v19  ;;  %10771 = vmatmul.mubr.msk.bf16.vlgmr.msra.gmra.mrb[76].mxu1 %vm244_vm0, %v5474_v19  ;;  %v5805_v2 = vpack.c.bf16 %v5432_v26, %v5432_v26  ;;  %v5340_v19 = vpop.permute.xlu0 %5339  ;;  %v13186_v26 = vld [vmem:[%s16259_s7 + $0x288] ss:$16 sps:$4 sm:$0xff]  }
 0xd2c   :  { %5724 = vmatpush1.bf16.msra.mxu1 %v13078_v16  ;;  %5755 = vmatprep.mubr.bf16.mxu1 %v13488_v1  ;;  %v13150_v16 = vld [vmem:[%s16259_s7 + $0x200] ss:$16 sps:$4 sm:$0xff]  }
 0xd2d   :  { %5725 = vmatprep.subr.bf16.mxu1 %v13083_v24  ;;  %v6010_v63 = vrot.slane %v5805_v2, 2  ;;  %v13155_v24 = vld [vmem:[%s16259_s7 + $0x224] ss:$16 sps:$4 sm:$0xff]  }
 0xd30   :  { %5726 = vmatpush1.bf16.msra.mxu1 %v13081_v8  ;;  %v5385_v8 = vpop.permute.xlu1 %5384 }
 0xd31   :  { %5727 = vmatprep.subr.bf16.mxu1 %v13086_v27  ;;  %v5369_v27 = vsub.f32 %v14840_v7, %v5340_v19  ;;  %v13161_v7 = vld [vmem:[%s16259_s7 + $0x264] ss:$16 sps:$4 sm:$0xff]   ;;  %v13221_v19 = vld [vmem:[%s16259_s7 + $0x36c] ss:$16 sps:$4 sm:$0xff]  }
 0xd34   :  { %5728 = vmatpush1.bf16.msra.mxu1 %v13084_v28  ;;  %v13153_v28 = vld [vmem:[%s16259_s7 + $0x220] ss:$16 sps:$4 sm:$0xff]  }
 0xd35   :  { %5729 = vmatprep.subr.bf16.mxu1 %v13089_v30  ;;  %v13158_v30 = vld [vmem:[%s16259_s7 + $0x244] ss:$16 sps:$4 sm:$0xff]  }
 0xd38   :  { %5730 = vmatpush1.bf16.msra.mxu1 %v13087_v4  ;;  %v5409_v4 = vmul.f32 %v5385_v8, %v5369_v27  ;;  %v13224_v8 = vld [vmem:[%s16259_s7 + $0x384] ss:$16 sps:$4 sm:$0xff]   ;;  %v13222_v27 = vld [vmem:[%s16259_s7 + $0x380] ss:$16 sps:$4 sm:$0xff]  }
 0xd39   :  { %5764 = vmatprep.subr.bf16.mxu1 %v13092_v32  ;;  %v13156_v32 = vld [vmem:[%s16259_s7 + $0x240] ss:$16 sps:$4 sm:$0xff]  }
 0xd3a   :  { %vm5417_vm14 = vcmp.ge.f32.partialorder %v5409_v4, 0.0 }
 0xd3b   :  { %10788 = vmatmul.mubr.msk.bf16.vlgmr.msra.gmra.mrb[80].mxu1 %vm244_vm0, %v5439_v15 }
 0xd3c   :  { %5765 = vmatpush1.bf16.msra.mxu1 %v13090_v12  ;;  %5796 = vmatprep.mubr.bf16.mxu1 %v13488_v1  ;;  %v5425_v12 = vmul.f32 0.2, %v5409_v4 }
 0xd3d   :  { %5766 = vmatprep.subr.bf16.mxu1 %v13095_v34  ;;  %v13159_v34 = vld [vmem:[%s16259_s7 + $0x260] ss:$16 sps:$4 sm:$0xff]  }
 0xd40   :  { %5767 = vmatpush1.bf16.msra.mxu1 %v13093_v21  ;;  %v13164_v21 = vld [vmem:[%s16259_s7 + $0x20c] ss:$16 sps:$4 sm:$0xff]  }
 0xd41   :  { %5768 = vmatprep.subr.bf16.mxu1 %v13098_v36  ;;  %v5433_v36 = vsel %vm5417_vm14, %v5409_v4, %v5425_v12  ;;  %v13230_v4 = vld [vmem:[%s16259_s7 + $0x3c4] ss:$16 sps:$4 sm:$0xff]   ;;  %v13231_v12 = vld [vmem:[%s16259_s7 + $0x3e0] ss:$16 sps:$4 sm:$0xff]   ;;  %vm9450_vm14 = vcmask 1047556  }
 0xd44   :  { %5769 = vmatpush1.bf16.msra.mxu1 %v13096_v31  ;;  %v13162_v31 = vld [vmem:[%s16259_s7 + $0x208] ss:$16 sps:$4 sm:$0xff]  }
 0xd45   :  { %5770 = vmatprep.subr.bf16.mxu1 %v13101_v37  ;;  %v6180_v37 = vpack.c.bf16 %v5433_v36, %v5433_v36 }
 0xd48   :  { %5771 = vmatpush1.bf16.msra.mxu1 %v13099_v38  ;;  %v13167_v38 = vld [vmem:[%s16259_s7 + $0x22c] ss:$16 sps:$4 sm:$0xff]  }
 0xd49   :  { %5906 = vmatprep.subr.bf16.mxu1 %v13104_v40  ;;  %v13165_v40 = vld [vmem:[%s16259_s7 + $0x228] ss:$16 sps:$4 sm:$0xff]  }
 0xd4b   :  { %10789 = vmatmul.mubr.msk.bf16.vlgmr.msra.gmra.mrb[76].mxu1 %vm244_vm0, %v5439_v15  ;;  %v13152_v15 = vld [vmem:[%s16259_s7 + $0x204] ss:$16 sps:$4 sm:$0xff]  }
 0xd4c   :  { %5907 = vmatpush1.bf16.msra.mxu1 %v13102_v39  ;;  %5938 = vmatprep.mubr.bf16.mxu1 %v13488_v1  ;;  %v13170_v39 = vld [vmem:[%s16259_s7 + $0x24c] ss:$16 sps:$4 sm:$0xff]  }
 0xd4d   :  { %5908 = vmatprep.subr.bf16.mxu1 %v13107_v41  ;;  %v13173_v41 = vld [vmem:[%s16259_s7 + $0x26c] ss:$16 sps:$4 sm:$0xff]  }
 0xd50   :  { %5909 = vmatpush1.bf16.msra.mxu1 %v13105_v18  ;;  %v13174_v18 = vld [vmem:[%s16259_s7 + $0x280] ss:$16 sps:$4 sm:$0xff]  }
 0xd51   :  { %5910 = vmatprep.subr.bf16.mxu1 %v13110_v44  ;;  %v13179_v44 = vld [vmem:[%s16259_s7 + $0x2a4] ss:$16 sps:$4 sm:$0xff]  }
 0xd54   :  { %5911 = vmatpush1.bf16.msra.mxu1 %v13108_v45  ;;  %v13182_v45 = vld [vmem:[%s16259_s7 + $0x2c4] ss:$16 sps:$4 sm:$0xff]  }
 0xd55   :  { %5912 = vmatprep.subr.bf16.mxu1 %v13113_v14  ;;  %v13180_v14 = vld [vmem:[%s16259_s7 + $0x2c0] ss:$16 sps:$4 sm:$0xff]  }
 0xd58   :  { %5913 = vmatpush1.bf16.msra.mxu1 %v13111_v46  ;;  %v13183_v46 = vld [vmem:[%s16259_s7 + $0x2e0] ss:$16 sps:$4 sm:$0xff]  }
 0xd59   :  { %5947 = vmatprep.subr.bf16.mxu1 %v13116_v48  ;;  %v13188_v48 = vld [vmem:[%s16259_s7 + $0x28c] ss:$16 sps:$4 sm:$0xff]  }
 0xd5b   :  { %10822 = vmatmul.mubr.msk.bf16.vlgmr.msra.gmra.mrb[80].mxu1 %vm244_vm0, %v5805_v2 }
 0xd5c   :  { %5948 = vmatpush1.bf16.msra.mxu1 %v13114_v52  ;;  %5979 = vmatprep.mubr.bf16.mxu1 %v13488_v1  ;;  %v6385_v52 = vrot.slane %v6180_v37, 2 }
 0xd5d   :  { %5949 = vmatprep.subr.bf16.mxu1 %v13119_v59  ;;  %v13189_v59 = vld [vmem:[%s16259_s7 + $0x2a8] ss:$16 sps:$4 sm:$0xff]  }
 0xd60   :  { %5950 = vmatpush1.bf16.msra.mxu1 %v13117_v53  ;;  %v13194_v53 = vld [vmem:[%s16259_s7 + $0x2cc] ss:$16 sps:$4 sm:$0xff]  }
 0xd61   :  { %5951 = vmatprep.subr.bf16.mxu1 %v13122_v17  ;;  %v13192_v17 = vld [vmem:[%s16259_s7 + $0x2c8] ss:$16 sps:$4 sm:$0xff]  }
 0xd64   :  { %5952 = vmatpush1.bf16.msra.mxu1 %v13120_v54  ;;  %v13197_v54 = vld [vmem:[%s16259_s7 + $0x2ec] ss:$16 sps:$4 sm:$0xff]  }
 0xd65   :  { %5953 = vmatprep.subr.bf16.mxu1 %v13125_v55  ;;  %v13195_v55 = vld [vmem:[%s16259_s7 + $0x2e8] ss:$16 sps:$4 sm:$0xff]  }
 0xd68   :  { %5954 = vmatpush1.bf16.msra.mxu1 %v13123_v33  ;;  %v13200_v33 = vld [vmem:[%s16259_s7 + $0x304] ss:$16 sps:$4 sm:$0xff]  }
 0xd69   :  { %6094 = vmatprep.subr.bf16.mxu1 %v13128_v56  ;;  %v13198_v56 = vld [vmem:[%s16259_s7 + $0x300] ss:$16 sps:$4 sm:$0xff]  }
 0xd6b   :  { %10823 = vmatmul.mubr.msk.bf16.vlgmr.msra.gmra.mrb[76].mxu1 %vm244_vm0, %v5805_v2  ;;  %v13191_v2 = vld [vmem:[%s16259_s7 + $0x2ac] ss:$16 sps:$4 sm:$0xff]  }
 0xd6c   :  { %6095 = vmatpush1.bf16.msra.mxu1 %v13126_v47  ;;  %6126 = vmatprep.mubr.bf16.mxu1 %v13488_v1  ;;  %v5345_v47 = vpop.permute.xlu0 %5344 }
 0xd6d   :  { %6096 = vmatprep.subr.bf16.mxu1 %v13131_v57  ;;  %v13203_v57 = vld [vmem:[%s16259_s7 + $0x324] ss:$16 sps:$4 sm:$0xff]  }
 0xd70   :  { %6097 = vmatpush1.bf16.msra.mxu1 %v13129_v58  ;;  %v5389_v58 = vpop.permute.xlu1 %5388 }
 0xd71   :  { %6098 = vmatprep.subr.bf16.mxu1 %v13134_v60  ;;  %v5370_v60 = vsub.f32 %v14848_v11, %v5345_v47  ;;  %v13209_v11 = vld [vmem:[%s16259_s7 + $0x364] ss:$16 sps:$4 sm:$0xff]   ;;  %v13261_v47 = vld [vmem:[%s16259_s7 + $0x428] ss:$16 sps:$4 sm:$0xff]  }
 0xd74   :  { %6099 = vmatpush1.bf16.msra.mxu1 %v13132_v22  ;;  %v13201_v22 = vld [vmem:[%s16259_s7 + $0x320] ss:$16 sps:$4 sm:$0xff]  }
 0xd75   :  { %6100 = vmatprep.subr.bf16.mxu1 %v13137_v51  ;;  %v13206_v51 = vld [vmem:[%s16259_s7 + $0x344] ss:$16 sps:$4 sm:$0xff]  }
 0xd78   :  { %6101 = vmatpush1.bf16.msra.mxu1 %v13135_v61  ;;  %v5410_v61 = vmul.f32 %v5389_v58, %v5370_v60  ;;  %v13264_v58 = vld [vmem:[%s16259_s7 + $0x448] ss:$16 sps:$4 sm:$0xff]   ;;  %v13269_v60 = vld [vmem:[%s16259_s7 + $0x46c] ss:$16 sps:$4 sm:$0xff]  }
 0xd79   :  { %6135 = vmatprep.subr.bf16.mxu1 %v13140_v49  ;;  %v13204_v49 = vld [vmem:[%s16259_s7 + $0x340] ss:$16 sps:$4 sm:$0xff]  }
 0xd7a   :  { %vm5418_vm15 = vcmp.ge.f32.partialorder %v5410_v61, 0.0 }
 0xd7b   :  { %10856 = vmatmul.mubr.msk.bf16.vlgmr.msra.gmra.mrb[80].mxu1 %vm244_vm0, %v6010_v63 }
 0xd7c   :  { %6136 = vmatpush1.bf16.msra.mxu1 %v13138_v62  ;;  %6167 = vmatprep.mubr.bf16.mxu1 %v13488_v1  ;;  %v5426_v62 = vmul.f32 0.2, %v5410_v61 }
 0xd7d   :  { %6137 = vmatprep.subr.bf16.mxu1 %v13143_v0  ;;  %v13212_v0 = vld [vmem:[%s16259_s7 + $0x30c] ss:$16 sps:$4 sm:$0xff]  }
 0xd80   :  { %6138 = vmatpush1.bf16.msra.mxu1 %v13141_v3  ;;  %v5434_v3 = vsel %vm5418_vm15, %v5410_v61, %v5426_v62  ;;  %v13270_v61 = vld [vmem:[%s16259_s7 + $0x480] ss:$16 sps:$4 sm:$0xff]   ;;  %v13278_v62 = vld [vmem:[%s16259_s7 + $0x4c4] ss:$16 sps:$4 sm:$0xff]   ;;  %vm9699_vm15 = vcmask 519168  }
 0xd81   :  { %6139 = vmatprep.subr.bf16.mxu1 %v13146_v6  ;;  %v13210_v6 = vld [vmem:[%s16259_s7 + $0x308] ss:$16 sps:$4 sm:$0xff]  }
 0xd84   :  { %6140 = vmatpush1.bf16.msra.mxu1 %v13144_v9  ;;  %v15292_v9 = vpack.c.bf16 %v5434_v3, %v5434_v3  ;;  %v13279_v3 = vld [vmem:[%s16259_s7 + $0x4e0] ss:$16 sps:$4 sm:$0xff]  }
 0xd85   :  { %6141 = vmatprep.subr.bf16.mxu1 %v13149_v10  ;;  %v13215_v10 = vld [vmem:[%s16259_s7 + $0x32c] ss:$16 sps:$4 sm:$0xff]  }
 0xd86   :  { %v6760_v36 = vrot.slane %v15292_v9, 2 }
 0xd88   :  { %6142 = vmatpush1.bf16.msra.mxu1 %v13147_v13  ;;  %v13213_v13 = vld [vmem:[%s16259_s7 + $0x328] ss:$16 sps:$4 sm:$0xff]  }
 0xd89   :  { %6281 = vmatprep.subr.bf16.mxu1 %v13152_v15  ;;  %v13218_v15 = vld [vmem:[%s16259_s7 + $0x34c] ss:$16 sps:$4 sm:$0xff]  }
 0xd8b   :  { %10857 = vmatmul.mubr.msk.bf16.vlgmr.msra.gmra.mrb[76].mxu1 %vm244_vm0, %v6010_v63  ;;  %v13207_v63 = vld [vmem:[%s16259_s7 + $0x360] ss:$16 sps:$4 sm:$0xff]  }
 0xd8c   :  { %6282 = vmatpush1.bf16.msra.mxu1 %v13150_v16  ;;  %6313 = vmatprep.mubr.bf16.mxu1 %v13488_v1  ;;  %v13216_v16 = vld [vmem:[%s16259_s7 + $0x348] ss:$16 sps:$4 sm:$0xff]  }
 0xd8d   :  { %6283 = vmatprep.subr.bf16.mxu1 %v13155_v24  ;;  %v13219_v24 = vld [vmem:[%s16259_s7 + $0x368] ss:$16 sps:$4 sm:$0xff]  }
 0xd90   :  { %6284 = vmatpush1.bf16.msra.mxu1 %v13153_v28  ;;  %v13227_v28 = vld [vmem:[%s16259_s7 + $0x3a4] ss:$16 sps:$4 sm:$0xff]  }
 0xd91   :  { %6285 = vmatprep.subr.bf16.mxu1 %v13158_v30  ;;  %v13225_v30 = vld [vmem:[%s16259_s7 + $0x3a0] ss:$16 sps:$4 sm:$0xff]  }
 0xd94   :  { %6286 = vmatpush1.bf16.msra.mxu1 %v13156_v32  ;;  %v13228_v32 = vld [vmem:[%s16259_s7 + $0x3c0] ss:$16 sps:$4 sm:$0xff]  }
 0xd95   :  { %6287 = vmatprep.subr.bf16.mxu1 %v13161_v7  ;;  %v13233_v7 = vld [vmem:[%s16259_s7 + $0x3e4] ss:$16 sps:$4 sm:$0xff]  }
 0xd98   :  { %6288 = vmatpush1.bf16.msra.mxu1 %v13159_v34  ;;  %v13236_v34 = vld [vmem:[%s16259_s7 + $0x38c] ss:$16 sps:$4 sm:$0xff]  }
 0xd99   :  { %6322 = vmatprep.subr.bf16.mxu1 %v13164_v21  ;;  %v13234_v21 = vld [vmem:[%s16259_s7 + $0x388] ss:$16 sps:$4 sm:$0xff]  }
 0xd9b   :  { %10890 = vmatmul.mubr.msk.bf16.vlgmr.msra.gmra.mrb[80].mxu1 %vm244_vm0, %v6180_v37 }
 0xd9c   :  { %6323 = vmatpush1.bf16.msra.mxu1 %v13162_v31  ;;  %6354 = vmatprep.mubr.bf16.mxu1 %v13488_v1  ;;  %v13239_v31 = vld [vmem:[%s16259_s7 + $0x3ac] ss:$16 sps:$4 sm:$0xff]  }
 0xd9d   :  { %6324 = vmatprep.subr.bf16.mxu1 %v13167_v38  ;;  %v13242_v38 = vld [vmem:[%s16259_s7 + $0x3cc] ss:$16 sps:$4 sm:$0xff]  }
 0xda0   :  { %6325 = vmatpush1.bf16.msra.mxu1 %v13165_v40 }
 0xda1   :  { %6326 = vmatprep.subr.bf16.mxu1 %v13170_v39 }
 0xda4   :  { %6327 = vmatpush1.bf16.msra.mxu1 %v13168_v50 }
 0xda5   :  { %6328 = vmatprep.subr.bf16.mxu1 %v13173_v41  ;;  %v13240_v41 = vld [vmem:[%s16259_s7 + $0x3c8] ss:$16 sps:$4 sm:$0xff]  }
 0xda8   :  { %6329 = vmatpush1.bf16.msra.mxu1 %v13171_v5 }
 0xda9   :  { %6469 = vmatprep.subr.bf16.mxu1 %v13176_v43  ;;  %v13245_v43 = vld [vmem:[%s16259_s7 + $0x3ec] ss:$16 sps:$4 sm:$0xff]  }
 0xdab   :  { %10891 = vmatmul.mubr.msk.bf16.vlgmr.msra.gmra.mrb[76].mxu1 %vm244_vm0, %v6180_v37  ;;  %v13237_v37 = vld [vmem:[%s16259_s7 + $0x3a8] ss:$16 sps:$4 sm:$0xff]  }
 0xdac   :  { %6470 = vmatpush1.bf16.msra.mxu1 %v13174_v18  ;;  %6501 = vmatprep.mubr.bf16.mxu1 %v13488_v1  ;;  %v13243_v18 = vld [vmem:[%s16259_s7 + $0x3e8] ss:$16 sps:$4 sm:$0xff]  }
 0xdad   :  { %6471 = vmatprep.subr.bf16.mxu1 %v13179_v44  ;;  %v13248_v44 = vld [vmem:[%s16259_s7 + $0x404] ss:$16 sps:$4 sm:$0xff]  }
 0xdb0   :  { %6472 = vmatpush1.bf16.msra.mxu1 %v13177_v35  ;;  %v13246_v35 = vld [vmem:[%s16259_s7 + $0x400] ss:$16 sps:$4 sm:$0xff]  }
 0xdb1   :  { %6473 = vmatprep.subr.bf16.mxu1 %v13182_v45  ;;  %v5350_v45 = vpop.permute.xlu0 %5349 }
 0xdb4   :  { %6474 = vmatpush1.bf16.msra.mxu1 %v13180_v14  ;;  %v13251_v14 = vld [vmem:[%s16259_s7 + $0x424] ss:$16 sps:$4 sm:$0xff]  }
 0xdb5   :  { %6475 = vmatprep.subr.bf16.mxu1 %v13185_v42  ;;  %v5393_v42 = vpop.permute.xlu1 %5392 }
 0xdb8   :  { %6476 = vmatpush1.bf16.msra.mxu1 %v13183_v46  ;;  %v5371_v46 = vsub.f32 %v14861_v23, %v5350_v45  ;;  %v13257_v23 = vld [vmem:[%s16259_s7 + $0x464] ss:$16 sps:$4 sm:$0xff]   ;;  %v13317_v45 = vld [vmem:[%s16259_s7 + $0x56c] ss:$16 sps:$4 sm:$0xff]  }
 0xdb9   :  { %6510 = vmatprep.subr.bf16.mxu1 %v13188_v48  ;;  %v13249_v48 = vld [vmem:[%s16259_s7 + $0x420] ss:$16 sps:$4 sm:$0xff]  }
 0xdbb   :  { %10924 = vmatmul.mubr.msk.bf16.vlgmr.msra.gmra.mrb[80].mxu1 %vm244_vm0, %v6385_v52 }
 0xdbc   :  { %6511 = vmatpush1.bf16.msra.mxu1 %v13186_v26  ;;  %6542 = vmatprep.mubr.bf16.mxu1 %v13488_v1  ;;  %v13254_v26 = vld [vmem:[%s16259_s7 + $0x444] ss:$16 sps:$4 sm:$0xff]  }
 0xdbd   :  { %6512 = vmatprep.subr.bf16.mxu1 %v13191_v2  ;;  %v13252_v2 = vld [vmem:[%s16259_s7 + $0x440] ss:$16 sps:$4 sm:$0xff]  }
 0xdc0   :  { %6513 = vmatpush1.bf16.msra.mxu1 %v13189_v59 }
 0xdc1   :  { %6514 = vmatprep.subr.bf16.mxu1 %v13194_v53  ;;  %v13255_v53 = vld [vmem:[%s16259_s7 + $0x460] ss:$16 sps:$4 sm:$0xff]  }
 0xdc4   :  { %6515 = vmatpush1.bf16.msra.mxu1 %v13192_v17  ;;  %v13260_v17 = vld [vmem:[%s16259_s7 + $0x40c] ss:$16 sps:$4 sm:$0xff]  }
 0xdc5   :  { %6516 = vmatprep.subr.bf16.mxu1 %v13197_v54 }
 0xdc8   :  { %6517 = vmatpush1.bf16.msra.mxu1 %v13195_v55  ;;  %v13258_v55 = vld [vmem:[%s16259_s7 + $0x408] ss:$16 sps:$4 sm:$0xff]  }
 0xdc9   :  { %6656 = vmatprep.subr.bf16.mxu1 %v13200_v33 }
 0xdcb   :  { %10925 = vmatmul.mubr.msk.bf16.vlgmr.msra.gmra.mrb[76].mxu1 %vm244_vm0, %v6385_v52  ;;  %v5411_v52 = vmul.f32 %v5393_v42, %v5371_v46  ;;  %v13320_v42 = vld [vmem:[%s16259_s7 + $0x584] ss:$16 sps:$4 sm:$0xff]   ;;  %v13318_v46 = vld [vmem:[%s16259_s7 + $0x580] ss:$16 sps:$4 sm:$0xff]  }
 0xdcc   :  { %6657 = vmatpush1.bf16.msra.mxu1 %v13198_v56  ;;  %6688 = vmatprep.mubr.bf16.mxu1 %v13488_v1  ;;  %v13263_v56 = vld [vmem:[%s16259_s7 + $0x42c] ss:$16 sps:$4 sm:$0xff]  }
 0xdcd   :  { %6658 = vmatprep.subr.bf16.mxu1 %v13203_v57  ;;  %v5427_v59 = vmul.f32 0.2, %v5411_v52  ;;  %vm5419_vm1 = vcmp.ge.f32.partialorder %v5411_v52, 0.0  ;;  %v13266_v57 = vld [vmem:[%s16259_s7 + $0x44c] ss:$16 sps:$4 sm:$0xff]  }
 0xdcf   :  { %v5435_v54 = vsel %vm5419_vm1, %v5411_v52, %v5427_v59  ;;  %v13326_v52 = vld [vmem:[%s16259_s7 + $0x5c4] ss:$16 sps:$4 sm:$0xff]   ;;  %v13327_v59 = vld [vmem:[%s16259_s7 + $0x5e0] ss:$16 sps:$4 sm:$0xff]  }
 0xdd0   :  { %6659 = vmatpush1.bf16.msra.mxu1 %v13201_v22  ;;  %v6930_v33 = vpack.c.bf16 %v5435_v54, %v5435_v54  ;;  %v13267_v22 = vld [vmem:[%s16259_s7 + $0x468] ss:$16 sps:$4 sm:$0xff]  }
 0xdd1   :  { %6660 = vmatprep.subr.bf16.mxu1 %v13206_v51  ;;  %v13272_v51 = vld [vmem:[%s16259_s7 + $0x484] ss:$16 sps:$4 sm:$0xff]  }
 0xdd4   :  { %6661 = vmatpush1.bf16.msra.mxu1 %v13204_v49  ;;  %v13275_v49 = vld [vmem:[%s16259_s7 + $0x4a4] ss:$16 sps:$4 sm:$0xff]  }
 0xdd5   :  { %6662 = vmatprep.subr.bf16.mxu1 %v13209_v11  ;;  %v13273_v11 = vld [vmem:[%s16259_s7 + $0x4a0] ss:$16 sps:$4 sm:$0xff]  }
 0xdd8   :  { %6663 = vmatpush1.bf16.msra.mxu1 %v13207_v63  ;;  %v13276_v63 = vld [vmem:[%s16259_s7 + $0x4c0] ss:$16 sps:$4 sm:$0xff]  }
 0xdd9   :  { %6697 = vmatprep.subr.bf16.mxu1 %v13212_v0  ;;  %v13281_v0 = vld [vmem:[%s16259_s7 + $0x4e4] ss:$16 sps:$4 sm:$0xff]  }
 0xddb   :  { %10958 = vmatmul.mubr.msk.bf16.vlgmr.msra.gmra.mrb[80].mxu1 %vm244_vm0, %v15292_v9 }
 0xddc   :  { %6698 = vmatpush1.bf16.msra.mxu1 %v13210_v6  ;;  %6729 = vmatprep.mubr.bf16.mxu1 %v13488_v1  ;;  %v13284_v6 = vld [vmem:[%s16259_s7 + $0x48c] ss:$16 sps:$4 sm:$0xff]  }
 0xddd   :  { %6699 = vmatprep.subr.bf16.mxu1 %v13215_v10  ;;  %v7135_v10 = vrot.slane %v6930_v33, 2 }
 0xde0   :  { %6700 = vmatpush1.bf16.msra.mxu1 %v13213_v13  ;;  %v13287_v13 = vld [vmem:[%s16259_s7 + $0x4ac] ss:$16 sps:$4 sm:$0xff]  }
 0xde1   :  { %6701 = vmatprep.subr.bf16.mxu1 %v13218_v15  ;;  %v13285_v15 = vld [vmem:[%s16259_s7 + $0x4a8] ss:$16 sps:$4 sm:$0xff]  }
 0xde4   :  { %6702 = vmatpush1.bf16.msra.mxu1 %v13216_v16  ;;  %v13290_v16 = vld [vmem:[%s16259_s7 + $0x4cc] ss:$16 sps:$4 sm:$0xff]  }
 0xde5   :  { %6703 = vmatprep.subr.bf16.mxu1 %v13221_v19  ;;  %v13288_v19 = vld [vmem:[%s16259_s7 + $0x4c8] ss:$16 sps:$4 sm:$0xff]  }
 0xde8   :  { %6704 = vmatpush1.bf16.msra.mxu1 %v13219_v24  ;;  %v13293_v24 = vld [vmem:[%s16259_s7 + $0x4ec] ss:$16 sps:$4 sm:$0xff]  }
 0xde9   :  { %6844 = vmatprep.subr.bf16.mxu1 %v13224_v8  ;;  %v13291_v8 = vld [vmem:[%s16259_s7 + $0x4e8] ss:$16 sps:$4 sm:$0xff]  }
 0xdeb   :  { %10959 = vmatmul.mubr.msk.bf16.vlgmr.msra.gmra.mrb[76].mxu1 %vm244_vm0, %v15292_v9  ;;  %v13282_v9 = vld [vmem:[%s16259_s7 + $0x488] ss:$16 sps:$4 sm:$0xff]  }
 0xdec   :  { %6845 = vmatpush1.bf16.msra.mxu1 %v13222_v27  ;;  %6876 = vmatprep.mubr.bf16.mxu1 %v13488_v1  ;;  %v13296_v27 = vld [vmem:[%s16259_s7 + $0x504] ss:$16 sps:$4 sm:$0xff]  }
 0xded   :  { %6846 = vmatprep.subr.bf16.mxu1 %v13227_v28  ;;  %v13294_v28 = vld [vmem:[%s16259_s7 + $0x500] ss:$16 sps:$4 sm:$0xff]  }
 0xdf0   :  { %6847 = vmatpush1.bf16.msra.mxu1 %v13225_v30  ;;  %v5355_v30 = vpop.permute.xlu0 %5354 }
 0xdf1   :  { %6848 = vmatprep.subr.bf16.mxu1 %v13230_v4  ;;  %v13299_v4 = vld [vmem:[%s16259_s7 + $0x524] ss:$16 sps:$4 sm:$0xff]  }
 0xdf4   :  { %6849 = vmatpush1.bf16.msra.mxu1 %v13228_v32  ;;  %v5397_v32 = vpop.permute.xlu1 %5396 }
 0xdf5   :  { %6850 = vmatprep.subr.bf16.mxu1 %v13233_v7  ;;  %v5372_v7 = vsub.f32 %v14870_v29, %v5355_v30  ;;  %v13305_v29 = vld [vmem:[%s16259_s7 + $0x564] ss:$16 sps:$4 sm:$0xff]   ;;  %v13348_v30 = vld [vmem:[%s16259_s7 + $0x640] ss:$16 sps:$4 sm:$0xff]  }
 0xdf8   :  { %6851 = vmatpush1.bf16.msra.mxu1 %v13231_v12  ;;  %v13297_v12 = vld [vmem:[%s16259_s7 + $0x520] ss:$16 sps:$4 sm:$0xff]  }
 0xdf9   :  { %6885 = vmatprep.subr.bf16.mxu1 %v13236_v34  ;;  %v13302_v34 = vld [vmem:[%s16259_s7 + $0x544] ss:$16 sps:$4 sm:$0xff]  }
 0xdfb   :  { %10992 = vmatmul.mubr.msk.bf16.vlgmr.msra.gmra.mrb[80].mxu1 %vm244_vm0, %v6760_v36 }
 0xdfc   :  { %6886 = vmatpush1.bf16.msra.mxu1 %v13234_v21  ;;  %6917 = vmatprep.mubr.bf16.mxu1 %v13488_v1  ;;  %v5412_v21 = vmul.f32 %v5397_v32, %v5372_v7  ;;  %v13353_v32 = vld [vmem:[%s16259_s7 + $0x664] ss:$16 sps:$4 sm:$0xff]  }
 0xdfd   :  { %6887 = vmatprep.subr.bf16.mxu1 %v13239_v31 }
 0xdfe   :  { %v15360_v40 = vpop.f32.mrb[80].mxu0  ;;  %v5428_v31 = vmul.f32 0.2, %v5412_v21  ;;  %vm5420_vm2 = vcmp.ge.f32.partialorder %v5412_v21, 0.0 }
 0xdff   :  { %v15362_v39 = vpop.f32.mrb[81].mxu0 }
 0xe00   :  { %6888 = vmatpush1.bf16.msra.mxu1 %v13237_v37  ;;  %v5596_v50 = vpop.f32.mrb[82].mxu0  ;;  %v13303_v37 = vld [vmem:[%s16259_s7 + $0x560] ss:$16 sps:$4 sm:$0xff]  }
 0xe01   :  { %v5597_v5 = vpop.f32.mrb[83].mxu0  ;;  %6889 = vmatprep.subr.bf16.mxu1 %v13242_v38  ;;  %v13308_v38 = vld [vmem:[%s16259_s7 + $0x50c] ss:$16 sps:$4 sm:$0xff]   ;;  %v5436_v50 = vsel %vm5420_vm2, %v5412_v21, %v5428_v31  ;;  %v13351_v31 = vld [vmem:[%s16259_s7 + $0x660] ss:$16 sps:$4 sm:$0xff]  }
 0xe02   :  { %v7305_v5 = vpack.c.bf16 %v5436_v50, %v5436_v50 }
 0xe04   :  { %6890 = vmatpush1.bf16.msra.mxu1 %v13240_v41  ;;  %v13306_v41 = vld [vmem:[%s16259_s7 + $0x508] ss:$16 sps:$4 sm:$0xff]   ;;  %v7510_v54 = vrot.slane %v7305_v5, 2 }
 0xe05   :  { %6891 = vmatprep.subr.bf16.mxu1 %v13245_v43  ;;  %v13311_v43 = vld [vmem:[%s16259_s7 + $0x52c] ss:$16 sps:$4 sm:$0xff]  }
 0xe08   :  { %6892 = vmatpush1.bf16.msra.mxu1 %v13243_v18  ;;  %v13309_v18 = vld [vmem:[%s16259_s7 + $0x528] ss:$16 sps:$4 sm:$0xff]  }
 0xe09   :  { %7031 = vmatprep.subr.bf16.mxu1 %v13248_v44  ;;  %v13314_v44 = vld [vmem:[%s16259_s7 + $0x54c] ss:$16 sps:$4 sm:$0xff]  }
 0xe0b   :  { %10993 = vmatmul.mubr.msk.bf16.vlgmr.msra.gmra.mrb[76].mxu1 %vm244_vm0, %v6760_v36  ;;  %v13300_v36 = vld [vmem:[%s16259_s7 + $0x540] ss:$16 sps:$4 sm:$0xff]  }
 0xe0c   :  { %7032 = vmatpush1.bf16.msra.mxu1 %v13246_v35  ;;  %7063 = vmatprep.mubr.bf16.mxu1 %v13488_v1  ;;  %v13312_v35 = vld [vmem:[%s16259_s7 + $0x548] ss:$16 sps:$4 sm:$0xff]  }
 0xe0d   :  { %7033 = vmatprep.subr.bf16.mxu1 %v13251_v14  ;;  %v13315_v14 = vld [vmem:[%s16259_s7 + $0x568] ss:$16 sps:$4 sm:$0xff]  }
 0xe10   :  { %7034 = vmatpush1.bf16.msra.mxu1 %v13249_v48  ;;  %v13323_v48 = vld [vmem:[%s16259_s7 + $0x5a4] ss:$16 sps:$4 sm:$0xff]  }
 0xe11   :  { %7035 = vmatprep.subr.bf16.mxu1 %v13254_v26  ;;  %v13321_v26 = vld [vmem:[%s16259_s7 + $0x5a0] ss:$16 sps:$4 sm:$0xff]  }
 0xe14   :  { %7036 = vmatpush1.bf16.msra.mxu1 %v13252_v2  ;;  %v13324_v2 = vld [vmem:[%s16259_s7 + $0x5c0] ss:$16 sps:$4 sm:$0xff]  }
 0xe15   :  { %7037 = vmatprep.subr.bf16.mxu1 %v13257_v23  ;;  %v13329_v23 = vld [vmem:[%s16259_s7 + $0x5e4] ss:$16 sps:$4 sm:$0xff]  }
 0xe18   :  { %7038 = vmatpush1.bf16.msra.mxu1 %v13255_v53  ;;  %v13332_v53 = vld [vmem:[%s16259_s7 + $0x58c] ss:$16 sps:$4 sm:$0xff]  }
 0xe19   :  { %7072 = vmatprep.subr.bf16.mxu1 %v13260_v17  ;;  %v13330_v17 = vld [vmem:[%s16259_s7 + $0x588] ss:$16 sps:$4 sm:$0xff]  }
 0xe1b   :  { %11026 = vmatmul.mubr.msk.bf16.vlgmr.msra.gmra.mrb[80].mxu1 %vm244_vm0, %v6930_v33 }
 0xe1c   :  { %7073 = vmatpush1.bf16.msra.mxu1 %v13258_v55  ;;  %7104 = vmatprep.mubr.bf16.mxu1 %v13488_v1  ;;  %v13335_v55 = vld [vmem:[%s16259_s7 + $0x5ac] ss:$16 sps:$4 sm:$0xff]  }
 0xe1d   :  { %7074 = vmatprep.subr.bf16.mxu1 %v13263_v56  ;;  %v13338_v56 = vld [vmem:[%s16259_s7 + $0x5cc] ss:$16 sps:$4 sm:$0xff]  }
 0xe20   :  { %7075 = vmatpush1.bf16.msra.mxu1 %v13261_v47  ;;  %v13336_v47 = vld [vmem:[%s16259_s7 + $0x5c8] ss:$16 sps:$4 sm:$0xff]  }
 0xe21   :  { %7076 = vmatprep.subr.bf16.mxu1 %v13266_v57  ;;  %v13341_v57 = vld [vmem:[%s16259_s7 + $0x5ec] ss:$16 sps:$4 sm:$0xff]  }
 0xe24   :  { %7077 = vmatpush1.bf16.msra.mxu1 %v13264_v58  ;;  %v13339_v58 = vld [vmem:[%s16259_s7 + $0x5e8] ss:$16 sps:$4 sm:$0xff]  }
 0xe25   :  { %7078 = vmatprep.subr.bf16.mxu1 %v13269_v60  ;;  %v13344_v60 = vld [vmem:[%s16259_s7 + $0x604] ss:$16 sps:$4 sm:$0xff]  }
 0xe28   :  { %7079 = vmatpush1.bf16.msra.mxu1 %v13267_v22  ;;  %v13342_v22 = vld [vmem:[%s16259_s7 + $0x600] ss:$16 sps:$4 sm:$0xff]  }
 0xe29   :  { %7219 = vmatprep.subr.bf16.mxu1 %v13272_v51  ;;  %v5360_v51 = vpop.permute.xlu0 %5359 }
 0xe2b   :  { %11027 = vmatmul.mubr.msk.bf16.vlgmr.msra.gmra.mrb[76].mxu1 %vm244_vm0, %v6930_v33  ;;  %v13333_v33 = vld [vmem:[%s16259_s7 + $0x5a8] ss:$16 sps:$4 sm:$0xff]  }
 0xe2c   :  { %7220 = vmatpush1.bf16.msra.mxu1 %v13270_v61  ;;  %7251 = vmatprep.mubr.bf16.mxu1 %v13488_v1  ;;  %v13347_v61 = vld [vmem:[%s16259_s7 + $0x624] ss:$16 sps:$4 sm:$0xff]  }
 0xe2d   :  { %7221 = vmatprep.subr.bf16.mxu1 %v13275_v49  ;;  %v5401_v49 = vpop.permute.xlu1 %5400 }
 0xe30   :  { %7222 = vmatpush1.bf16.msra.mxu1 %v13273_v11  ;;  %v13345_v11 = vld [vmem:[%s16259_s7 + $0x620] ss:$16 sps:$4 sm:$0xff]  }
 0xe31   :  { %7223 = vmatprep.subr.bf16.mxu1 %v13278_v62  ;;  %v13350_v62 = vld [vmem:[%s16259_s7 + $0x644] ss:$16 sps:$4 sm:$0xff]  }
 0xe34   :  { %7224 = vmatpush1.bf16.msra.mxu1 %v13276_v63  ;;  %v5373_v63 = vsub.f32 %v14859_v20, %v5360_v51  ;;  %v8431_v20 = vld [vmem:[%s16260_s8 + $0x8] sm:$0xff]  ;;  %v13369_v51 = vld [vmem:[%s16259_s7 + $0x6a0] ss:$16 sps:$4 sm:$0xff]  }
 0xe35   :  { %7225 = vmatprep.subr.bf16.mxu1 %v13281_v0  ;;  %v8446_v0 = vld [vmem:[%s16260_s8 + $0x80] sm:$0xff] }
 0xe38   :  { %7226 = vmatpush1.bf16.msra.mxu1 %v13279_v3  ;;  %v8447_v3 = vld [vmem:[%s16260_s8 + $0x88] sm:$0xff] }
 0xe39   :  { %7260 = vmatprep.subr.bf16.mxu1 %v13284_v6  ;;  %v8430_v6 = vld [vmem:[%s16260_s8] sm:$0xff] }
 0xe3b   :  { %11060 = vmatmul.mubr.msk.bf16.vlgmr.msra.gmra.mrb[80].mxu1 %vm244_vm0, %v7135_v10 }
 0xe3c   :  { %7261 = vmatpush1.bf16.msra.mxu1 %v13282_v9  ;;  %7292 = vmatprep.mubr.bf16.mxu1 %v13488_v1  ;;  %v12350_v9 = vpack.c.bf16 %v8447_v3, %v8446_v0  ;;  %v13378_v0 = vld [vmem:[%s16259_s7 + $0x688] ss:$16 sps:$4 sm:$0xff]  }
 0xe3d   :  { %7262 = vmatprep.subr.bf16.mxu1 %v13287_v13  ;;  %v8449_v13 = vld [vmem:[%s16260_s8 + $0x98] sm:$0xff] }
 0xe3e   :  { %12351 = vmatprep.subr.bf16.mxu0 %v12350_v9  ;;  %v13381_v9 = vld [vmem:[%s16259_s7 + $0x6a8] ss:$16 sps:$4 sm:$0xff]  }
 0xe40   :  { %7263 = vmatpush1.bf16.msra.mxu1 %v13285_v15  ;;  %v5413_v15 = vmul.f32 %v5401_v49, %v5373_v63  ;;  %v13372_v49 = vld [vmem:[%s16259_s7 + $0x6c0] ss:$16 sps:$4 sm:$0xff]   ;;  %v13380_v63 = vld [vmem:[%s16259_s7 + $0x68c] ss:$16 sps:$4 sm:$0xff]  }
 0xe41   :  { %7264 = vmatprep.subr.bf16.mxu1 %v13290_v16  ;;  %v12352_v16 = vpack.c.bf16 %v8431_v20, %v8430_v6  ;;  %v13383_v6 = vld [vmem:[%s16259_s7 + $0x6ac] ss:$16 sps:$4 sm:$0xff]  }
 0xe42   :  { %v5429_v21 = vmul.f32 0.2, %v5413_v15  ;;  %vm5421_vm3 = vcmp.ge.f32.partialorder %v5413_v15, 0.0  ;;  %v13386_v20 = vld [vmem:[%s16259_s7 + $0x6cc] ss:$16 sps:$4 sm:$0xff]  }
 0xe43   :  { %12353 = vmatpush3.bf16.msra.mxu0 %v12352_v16  ;;  %v13392_v16 = vld [vmem:[%s16259_s7 + $0x704] ss:$16 sps:$4 sm:$0xff]  }
 0xe44   :  { %7265 = vmatpush1.bf16.msra.mxu1 %v13288_v19 }
 0xe45   :  { %7266 = vmatprep.subr.bf16.mxu1 %v13293_v24  ;;  %v8432_v24 = vld [vmem:[%s16260_s8 + $0x10] sm:$0xff] }
 0xe48   :  { %7267 = vmatpush1.bf16.msra.mxu1 %v13291_v8  ;;  %v8433_v8 = vld [vmem:[%s16260_s8 + $0x18] sm:$0xff] }
 0xe49   :  { %7406 = vmatprep.subr.bf16.mxu1 %v13296_v27  ;;  %v8450_v27 = vld [vmem:[%s16260_s8 + $0xa0] sm:$0xff] }
 0xe4b   :  { %11061 = vmatmul.mubr.msk.bf16.vlgmr.msra.gmra.mrb[76].mxu1 %vm244_vm0, %v7135_v10  ;;  %v8448_v10 = vld [vmem:[%s16260_s8 + $0x90] sm:$0xff] }
 0xe4c   :  { %7407 = vmatpush1.bf16.msra.mxu1 %v13294_v28  ;;  %7438 = vmatprep.mubr.bf16.mxu1 %v13488_v1  ;;  %v12354_v19 = vpack.c.bf16 %v8449_v13, %v8448_v10  ;;  %v8451_v28 = vld [vmem:[%s16260_s8 + $0xa8] sm:$0xff] }
 0xe4d   :  { %7408 = vmatprep.subr.bf16.mxu1 %v13299_v4  ;;  %v12356_v4 = vpack.c.bf16 %v8433_v8, %v8432_v24  ;;  %v12358_v7 = vpack.c.bf16 %v8451_v28, %v8450_v27  ;;  %v13384_v10 = vld [vmem:[%s16259_s7 + $0x6c8] ss:$16 sps:$4 sm:$0xff]   ;;  %v13389_v13 = vld [vmem:[%s16259_s7 + $0x6ec] ss:$16 sps:$4 sm:$0xff]   ;;  %v5365_v24 = vpop.permute.xlu0 %5364  ;;  %v13395_v8 = vld [vmem:[%s16259_s7 + $0x724] ss:$16 sps:$4 sm:$0xff]   ;;  %v5405_v27 = vpop.permute.xlu1 %5404 }
 0xe4e   :  { %12355 = vmatprep.subr.bf16.mxu0 %v12354_v19  ;;  %v13390_v19 = vld [vmem:[%s16259_s7 + $0x700] ss:$16 sps:$4 sm:$0xff]   ;;  %v5374_v28 = vsub.f32 %v14865_v25, %v5365_v24  ;;  %v13401_v25 = vld [vmem:[%s16259_s7 + $0x764] ss:$16 sps:$4 sm:$0xff]  }
 0xe4f   :  { %12357 = vmatpush3.bf16.msra.mxu0 %v12356_v4  ;;  %v13398_v4 = vld [vmem:[%s16259_s7 + $0x744] ss:$16 sps:$4 sm:$0xff]  }
 0xe50   :  { %7409 = vmatpush1.bf16.msra.mxu1 %v13297_v12  ;;  %v8434_v12 = vld [vmem:[%s16260_s8 + $0x20] sm:$0xff]  ;;  %12359 = vmatprep.subr.bf16.mxu0 %v12358_v7 }
 0xe51   :  { %7410 = vmatprep.subr.bf16.mxu1 %v13302_v34  ;;  %v8435_v34 = vld [vmem:[%s16260_s8 + $0x28] sm:$0xff]  ;;  %v13396_v7 = vld [vmem:[%s16259_s7 + $0x740] ss:$16 sps:$4 sm:$0xff]  }
 0xe54   :  { %7411 = vmatpush1.bf16.msra.mxu1 %v13300_v36  ;;  %v8452_v36 = vld [vmem:[%s16260_s8 + $0xb0] sm:$0xff] }
 0xe55   :  { %7412 = vmatprep.subr.bf16.mxu1 %v13305_v29  ;;  %v8453_v29 = vld [vmem:[%s16260_s8 + $0xb8] sm:$0xff] }
 0xe56   :  { %v12362_v50 = vpack.c.bf16 %v8453_v29, %v8452_v36  ;;  %v13402_v29 = vld [vmem:[%s16259_s7 + $0x708] ss:$16 sps:$4 sm:$0xff]  }
 0xe58   :  { %7413 = vmatpush1.bf16.msra.mxu1 %v13303_v37  ;;  %v12360_v37 = vpack.c.bf16 %v8435_v34, %v8434_v12  ;;  %v13399_v34 = vld [vmem:[%s16259_s7 + $0x760] ss:$16 sps:$4 sm:$0xff]  }
 0xe59   :  { %7447 = vmatprep.subr.bf16.mxu1 %v13308_v38  ;;  %v13356_v38 = vld [vmem:[%s16259_s7 + $0x60c] ss:$16 sps:$4 sm:$0xff]  }
 0xe5a   :  { %12361 = vmatpush3.bf16.msra.mxu0 %v12360_v37  ;;  %v13407_v37 = vld [vmem:[%s16259_s7 + $0x72c] ss:$16 sps:$4 sm:$0xff]  }
 0xe5b   :  { %11094 = vmatmul.mubr.msk.bf16.vlgmr.msra.gmra.mrb[80].mxu1 %vm244_vm0, %v7305_v5  ;;  %12363 = vmatprep.subr.bf16.mxu0 %v12362_v50  ;;  %v13410_v50 = vld [vmem:[%s16259_s7 + $0x74c] ss:$16 sps:$4 sm:$0xff]  }
 0xe5c   :  { %7448 = vmatpush1.bf16.msra.mxu1 %v13306_v41  ;;  %7479 = vmatprep.mubr.bf16.mxu1 %v13488_v1  ;;  %v5437_v41 = vsel %vm5421_vm3, %v5413_v15, %v5429_v21  ;;  %v13387_v15 = vld [vmem:[%s16259_s7 + $0x6e8] ss:$16 sps:$4 sm:$0xff]   ;;  %v13404_v21 = vld [vmem:[%s16259_s7 + $0x70c] ss:$16 sps:$4 sm:$0xff]  }
 0xe5d   :  { %7449 = vmatprep.subr.bf16.mxu1 %v13311_v43  ;;  %v8437_v43 = vld [vmem:[%s16260_s8 + $0x38] sm:$0xff] }
 0xe60   :  { %7450 = vmatpush1.bf16.msra.mxu1 %v13309_v18  ;;  %v8454_v18 = vld [vmem:[%s16260_s8 + $0xc0] sm:$0xff] }
 0xe61   :  { %7451 = vmatprep.subr.bf16.mxu1 %v13314_v44  ;;  %v8455_v44 = vld [vmem:[%s16260_s8 + $0xc8] sm:$0xff] }
 0xe64   :  { %7452 = vmatpush1.bf16.msra.mxu1 %v13312_v35  ;;  %v13354_v35 = vld [vmem:[%s16259_s7 + $0x608] ss:$16 sps:$4 sm:$0xff]  }
 0xe65   :  { %7453 = vmatprep.subr.bf16.mxu1 %v13317_v45  ;;  %v15670_v45 = vpack.c.bf16 %v5437_v41, %v5437_v41  ;;  %v13408_v41 = vld [vmem:[%s16259_s7 + $0x748] ss:$16 sps:$4 sm:$0xff]  }
 0xe67   :  { %v7885_v3 = vrot.slane %v15670_v45, 2 }
 0xe68   :  { %7454 = vmatpush1.bf16.msra.mxu1 %v13315_v14  ;;  %v13359_v14 = vld [vmem:[%s16259_s7 + $0x62c] ss:$16 sps:$4 sm:$0xff]  }
 0xe69   :  { %7594 = vmatprep.subr.bf16.mxu1 %v13320_v42 }
 0xe6b   :  { %11095 = vmatmul.mubr.msk.bf16.vlgmr.msra.gmra.mrb[76].mxu1 %vm244_vm0, %v7305_v5  ;;  %v8436_v5 = vld [vmem:[%s16260_s8 + $0x30] sm:$0xff] }
 0xe6c   :  { %7595 = vmatpush1.bf16.msra.mxu1 %v13318_v46  ;;  %7626 = vmatprep.mubr.bf16.mxu1 %v13488_v1  ;;  %v12364_v42 = vpack.c.bf16 %v8437_v43, %v8436_v5  ;;  %v12366_v46 = vpack.c.bf16 %v8455_v44, %v8454_v18  ;;  %v13413_v5 = vld [vmem:[%s16259_s7 + $0x76c] ss:$16 sps:$4 sm:$0xff]   ;;  %v13411_v43 = vld [vmem:[%s16259_s7 + $0x768] ss:$16 sps:$4 sm:$0xff]   ;;  %v13416_v18 = vld [vmem:[%s16259_s7 + $0x784] ss:$16 sps:$4 sm:$0xff]  }
 0xe6d   :  { %7596 = vmatprep.subr.bf16.mxu1 %v13323_v48  ;;  %v8438_v48 = vld [vmem:[%s16260_s8 + $0x40] sm:$0xff] }
 0xe6e   :  { %12365 = vmatpush3.bf16.msra.mxu0 %v12364_v42  ;;  %v13414_v44 = vld [vmem:[%s16259_s7 + $0x780] ss:$16 sps:$4 sm:$0xff]  }
 0xe6f   :  { %12367 = vmatprep.subr.bf16.mxu0 %v12366_v46  ;;  %v13420_v42 = vld [vmem:[%s16259_s7 + $0x7c0] ss:$16 sps:$4 sm:$0xff]   ;;  %v13425_v46 = vld [vmem:[%s16259_s7 + $0x7e4] ss:$16 sps:$4 sm:$0xff]  }
 0xe70   :  { %7597 = vmatpush1.bf16.msra.mxu1 %v13321_v26  ;;  %v8439_v26 = vld [vmem:[%s16260_s8 + $0x48] sm:$0xff] }
 0xe71   :  { %7598 = vmatprep.subr.bf16.mxu1 %v13326_v52  ;;  %v8456_v52 = vld [vmem:[%s16260_s8 + $0xd0] sm:$0xff] }
 0xe74   :  { %7599 = vmatpush1.bf16.msra.mxu1 %v13324_v2  ;;  %v8457_v2 = vld [vmem:[%s16260_s8 + $0xd8] sm:$0xff] }
 0xe75   :  { %7600 = vmatprep.subr.bf16.mxu1 %v13329_v23  ;;  %v13357_v23 = vld [vmem:[%s16259_s7 + $0x628] ss:$16 sps:$4 sm:$0xff]  }
 0xe78   :  { %7601 = vmatpush1.bf16.msra.mxu1 %v13327_v59  ;;  %v13362_v59 = vld [vmem:[%s16259_s7 + $0x64c] ss:$16 sps:$4 sm:$0xff]  }
 0xe79   :  { %7635 = vmatprep.subr.bf16.mxu1 %v13332_v53  ;;  %v12368_v53 = vpack.c.bf16 %v8439_v26, %v8438_v48  ;;  %v13423_v48 = vld [vmem:[%s16259_s7 + $0x7e0] ss:$16 sps:$4 sm:$0xff]   ;;  %v13428_v26 = vld [vmem:[%s16259_s7 + $0x78c] ss:$16 sps:$4 sm:$0xff]  }
 0xe7b   :  { %11128 = vmatmul.mubr.msk.bf16.vlgmr.msra.gmra.mrb[80].mxu1 %vm244_vm0, %v7510_v54  ;;  %12369 = vmatpush3.bf16.msra.mxu0 %v12368_v53  ;;  %v13434_v53 = vld [vmem:[%s16259_s7 + $0x7cc] ss:$16 sps:$4 sm:$0xff]  }
 0xe7c   :  { %7636 = vmatpush1.bf16.msra.mxu1 %v13330_v17  ;;  %7667 = vmatprep.mubr.bf16.mxu1 %v13488_v1  ;;  %v12370_v17 = vpack.c.bf16 %v8457_v2, %v8456_v52  ;;  %v13426_v52 = vld [vmem:[%s16259_s7 + $0x788] ss:$16 sps:$4 sm:$0xff]  }
 0xe7d   :  { %7637 = vmatprep.subr.bf16.mxu1 %v13335_v55  ;;  %v8441_v55 = vld [vmem:[%s16260_s8 + $0x58] sm:$0xff] }
 0xe7e   :  { %12371 = vmatprep.subr.bf16.mxu0 %v12370_v17  ;;  %v13432_v17 = vld [vmem:[%s16259_s7 + $0x7c8] ss:$16 sps:$4 sm:$0xff]  }
 0xe80   :  { %7638 = vmatpush1.bf16.msra.mxu1 %v13333_v33  ;;  %v13360_v33 = vld [vmem:[%s16259_s7 + $0x648] ss:$16 sps:$4 sm:$0xff]  }
 0xe81   :  { %7639 = vmatprep.subr.bf16.mxu1 %v13338_v56  ;;  %v13365_v56 = vld [vmem:[%s16259_s7 + $0x66c] ss:$16 sps:$4 sm:$0xff]  }
 0xe84   :  { %7640 = vmatpush1.bf16.msra.mxu1 %v13336_v47 }
 0xe85   :  { %7641 = vmatprep.subr.bf16.mxu1 %v13341_v57  ;;  %v13363_v57 = vld [vmem:[%s16259_s7 + $0x668] ss:$16 sps:$4 sm:$0xff]  }
 0xe88   :  { %7642 = vmatpush1.bf16.msra.mxu1 %v13339_v58  ;;  %v13368_v58 = vld [vmem:[%s16259_s7 + $0x684] ss:$16 sps:$4 sm:$0xff]  }
 0xe89   :  { %7781 = vmatprep.subr.bf16.mxu1 %v13344_v60  ;;  %v13366_v60 = vld [vmem:[%s16259_s7 + $0x680] ss:$16 sps:$4 sm:$0xff]  }
 0xe8b   :  { %11129 = vmatmul.mubr.msk.bf16.vlgmr.msra.gmra.mrb[76].mxu1 %vm244_vm0, %v7510_v54  ;;  %v8440_v54 = vld [vmem:[%s16260_s8 + $0x50] sm:$0xff] }
 0xe8c   :  { %7782 = vmatpush1.bf16.msra.mxu1 %v13342_v22  ;;  %7813 = vmatprep.mubr.bf16.mxu1 %v13488_v1  ;;  %v12372_v47 = vpack.c.bf16 %v8441_v55, %v8440_v54  ;;  %v13371_v22 = vld [vmem:[%s16259_s7 + $0x6a4] ss:$16 sps:$4 sm:$0xff]   ;;  %v13437_v54 = vld [vmem:[%s16259_s7 + $0x7ec] ss:$16 sps:$4 sm:$0xff]  }
 0xe8d   :  { %7783 = vmatprep.subr.bf16.mxu1 %v13347_v61  ;;  %v13374_v61 = vld [vmem:[%s16259_s7 + $0x6c4] ss:$16 sps:$4 sm:$0xff]  }
 0xe8e   :  { %12373 = vmatpush3.bf16.msra.mxu0 %v12372_v47  ;;  %v8458_v55 = vld [vmem:[%s16260_s8 + $0xe0] sm:$0xff] }
 0xe8f   :  { %v8442_v47 = vld [vmem:[%s16260_s8 + $0x60] sm:$0xff] }
 0xe90   :  { %7784 = vmatpush1.bf16.msra.mxu1 %v13345_v11  ;;  %v13377_v11 = vld [vmem:[%s16259_s7 + $0x6e4] ss:$16 sps:$4 sm:$0xff]  }
 0xe91   :  { %7785 = vmatprep.subr.bf16.mxu1 %v13350_v62  ;;  %v13375_v62 = vld [vmem:[%s16259_s7 + $0x6e0] ss:$16 sps:$4 sm:$0xff]  }
 0xe94   :  { %7786 = vmatpush1.bf16.msra.mxu1 %v13348_v30  ;;  %v13393_v30 = vld [vmem:[%s16259_s7 + $0x720] ss:$16 sps:$4 sm:$0xff]  }
 0xe95   :  { %7787 = vmatprep.subr.bf16.mxu1 %v13353_v32  ;;  %v5414_v32 = vmul.f32 %v5405_v27, %v5374_v28 }
 0xe97   :  { %v5430_v12 = vmul.f32 0.2, %v5414_v32  ;;  %vm5422_vm4 = vcmp.ge.f32.partialorder %v5414_v32, 0.0 }
 0xe98   :  { %7788 = vmatpush1.bf16.msra.mxu1 %v13351_v31 }
 0xe99   :  { %7822 = vmatprep.subr.bf16.mxu1 %v13356_v38  ;;  %v5438_v36 = vsel %vm5422_vm4, %v5414_v32, %v5430_v12  ;;  %v13405_v38 = vld [vmem:[%s16259_s7 + $0x728] ss:$16 sps:$4 sm:$0xff]   ;;  %v8464_v32 = vld [vmem:[%s16260_s8 + $0x110] sm:$0xff]  ;;  %v8482_v12 = vld [vmem:[%s16260_s8 + $0x1a0] sm:$0xff] }
 0xe9a   :  { %v8055_v31 = vpack.c.bf16 %v5438_v36, %v5438_v36 }
 0xe9b   :  { %11162 = vmatmul.mubr.msk.bf16.vlgmr.msra.gmra.mrb[80].mxu1 %vm244_vm0, %v15670_v45 }
 0xe9c   :  { %7823 = vmatpush1.bf16.msra.mxu1 %v13354_v35  ;;  %7854 = vmatprep.mubr.bf16.mxu1 %v13488_v1  ;;  %v13419_v35 = vld [vmem:[%s16259_s7 + $0x7a4] ss:$16 sps:$4 sm:$0xff]   ;;  %v8260_v2 = vrot.slane %v8055_v31, 2 }
 0xe9d   :  { %7824 = vmatprep.subr.bf16.mxu1 %v13359_v14  ;;  %v13422_v14 = vld [vmem:[%s16259_s7 + $0x7c4] ss:$16 sps:$4 sm:$0xff]  }
 0xea0   :  { %7825 = vmatpush1.bf16.msra.mxu1 %v13357_v23  ;;  %v13431_v23 = vld [vmem:[%s16259_s7 + $0x7ac] ss:$16 sps:$4 sm:$0xff]  }
 0xea1   :  { %7826 = vmatprep.subr.bf16.mxu1 %v13362_v59  ;;  %v13429_v59 = vld [vmem:[%s16259_s7 + $0x7a8] ss:$16 sps:$4 sm:$0xff]  }
 0xea4   :  { %7827 = vmatpush1.bf16.msra.mxu1 %v13360_v33  ;;  %v8459_v33 = vld [vmem:[%s16260_s8 + $0xe8] sm:$0xff] }
 0xea5   :  { %7828 = vmatprep.subr.bf16.mxu1 %v13365_v56  ;;  %v12374_v56 = vpack.c.bf16 %v8459_v33, %v8458_v55  ;;  %v8472_v55 = vld [vmem:[%s16260_s8 + $0x150] sm:$0xff]  ;;  %v8473_v33 = vld [vmem:[%s16260_s8 + $0x158] sm:$0xff] }
 0xea7   :  { %12375 = vmatprep.subr.bf16.mxu0 %v12374_v56  ;;  %v8490_v56 = vld [vmem:[%s16260_s8 + $0x1e0] sm:$0xff] }
 0xea8   :  { %7829 = vmatpush1.bf16.msra.mxu1 %v13363_v57  ;;  %v8443_v57 = vld [vmem:[%s16260_s8 + $0x68] sm:$0xff] }
 0xea9   :  { %7969 = vmatprep.subr.bf16.mxu1 %v13368_v58  ;;  %v12376_v58 = vpack.c.bf16 %v8443_v57, %v8442_v47  ;;  %v8491_v47 = vld [vmem:[%s16260_s8 + $0x1e8] sm:$0xff]  ;;  %v12404_v57 = vpack.c.bf16 %v8473_v33, %v8472_v55 }
 0xeab   :  { %11163 = vmatmul.mubr.msk.bf16.vlgmr.msra.gmra.mrb[76].mxu1 %vm244_vm0, %v15670_v45  ;;  %v13417_v45 = vld [vmem:[%s16259_s7 + $0x7a0] ss:$16 sps:$4 sm:$0xff]   ;;  %12377 = vmatpush3.bf16.msra.mxu0 %v12376_v58  ;;  %v12406_v58 = vpack.c.bf16 %v8491_v47, %v8490_v56 }
 0xeac   :  { %7970 = vmatpush1.bf16.msra.mxu1 %v13366_v60  ;;  %8001 = vmatprep.mubr.bf16.mxu1 %v13488_v1  ;;  %v8460_v60 = vld [vmem:[%s16260_s8 + $0xf0] sm:$0xff] }
 0xead   :  { %7971 = vmatprep.subr.bf16.mxu1 %v13371_v22  ;;  %v8461_v22 = vld [vmem:[%s16260_s8 + $0xf8] sm:$0xff] }
 0xeb0   :  { %7972 = vmatpush1.bf16.msra.mxu1 %v13369_v51  ;;  %v12378_v51 = vpack.c.bf16 %v8461_v22, %v8460_v60  ;;  %v8474_v60 = vld [vmem:[%s16260_s8 + $0x160] sm:$0xff]  ;;  %v8475_v22 = vld [vmem:[%s16260_s8 + $0x168] sm:$0xff] }
 0xeb1   :  { %7973 = vmatprep.subr.bf16.mxu1 %v13374_v61  ;;  %v8444_v61 = vld [vmem:[%s16260_s8 + $0x70] sm:$0xff] }
 0xeb2   :  { %12379 = vmatprep.subr.bf16.mxu0 %v12378_v51  ;;  %v8492_v51 = vld [vmem:[%s16260_s8 + $0x1f0] sm:$0xff] }
 0xeb4   :  { %7974 = vmatpush1.bf16.msra.mxu1 %v13372_v49  ;;  %v8445_v49 = vld [vmem:[%s16260_s8 + $0x78] sm:$0xff] }
 0xeb5   :  { %7975 = vmatprep.subr.bf16.mxu1 %v13377_v11  ;;  %v12380_v11 = vpack.c.bf16 %v8445_v49, %v8444_v61  ;;  %v8493_v61 = vld [vmem:[%s16260_s8 + $0x1f8] sm:$0xff]  ;;  %v12408_v49 = vpack.c.bf16 %v8475_v22, %v8474_v60 }
 0xeb7   :  { %12381 = vmatpush3.bf16.msra.mxu0 %v12380_v11  ;;  %v12410_v11 = vpack.c.bf16 %v8493_v61, %v8492_v51 }
 0xeb8   :  { %7976 = vmatpush1.bf16.msra.mxu1 %v13375_v62  ;;  %v8478_v62 = vld [vmem:[%s16260_s8 + $0x180] sm:$0xff] }
 0xeb9   :  { %8010 = vmatprep.subr.bf16.mxu1 %v13380_v63  ;;  %v8479_v63 = vld [vmem:[%s16260_s8 + $0x188] sm:$0xff] }
 0xebb   :  { %11196 = vmatmul.mubr.msk.bf16.vlgmr.msra.gmra.mrb[80].mxu1 %vm244_vm0, %v7885_v3 }
 0xebc   :  { %8011 = vmatpush1.bf16.msra.mxu1 %v13378_v0  ;;  %8042 = vmatprep.mubr.bf16.mxu1 %v13488_v1  ;;  %v12382_v0 = vpack.c.bf16 %v8479_v63, %v8478_v62  ;;  %v8476_v62 = vld [vmem:[%s16260_s8 + $0x170] sm:$0xff]  ;;  %v8477_v63 = vld [vmem:[%s16260_s8 + $0x178] sm:$0xff] }
 0xebd   :  { %8012 = vmatprep.subr.bf16.mxu1 %v13383_v6 }
 0xebe   :  { %12383 = vmatprep.subr.bf16.mxu0 %v12382_v0 }
 0xec0   :  { %8013 = vmatpush1.bf16.msra.mxu1 %v13381_v9 }
 0xec1   :  { %8014 = vmatprep.subr.bf16.mxu1 %v13386_v20 }
 0xec4   :  { %8015 = vmatpush1.bf16.msra.mxu1 %v13384_v10 }
 0xec5   :  { %8016 = vmatprep.subr.bf16.mxu1 %v13389_v13 }
 0xec8   :  { %8017 = vmatpush1.bf16.msra.mxu1 %v13387_v15 }
 0xec9   :  { %8156 = vmatprep.subr.bf16.mxu1 %v13392_v16 }
 0xecb   :  { %11197 = vmatmul.mubr.msk.bf16.vlgmr.msra.gmra.mrb[76].mxu1 %vm244_vm0, %v7885_v3 }
 0xecc   :  { %8157 = vmatpush1.bf16.msra.mxu1 %v13390_v19  ;;  %8188 = vmatprep.mubr.bf16.mxu1 %v13488_v1  ;;  %v8462_v19 = vld [vmem:[%s16260_s8 + $0x100] sm:$0xff] }
 0xecd   :  { %8158 = vmatprep.subr.bf16.mxu1 %v13395_v8  ;;  %v8481_v8 = vld [vmem:[%s16260_s8 + $0x198] sm:$0xff] }
 0xed0   :  { %8159 = vmatpush1.bf16.msra.mxu1 %v13393_v30 }
 0xed1   :  { %8160 = vmatprep.subr.bf16.mxu1 %v13398_v4 }
 0xed4   :  { %8161 = vmatpush1.bf16.msra.mxu1 %v13396_v7  ;;  %v8465_v7 = vld [vmem:[%s16260_s8 + $0x118] sm:$0xff] }
 0xed5   :  { %8162 = vmatprep.subr.bf16.mxu1 %v13401_v25 }
 0xed8   :  { %8163 = vmatpush1.bf16.msra.mxu1 %v13399_v34  ;;  %v8483_v34 = vld [vmem:[%s16260_s8 + $0x1a8] sm:$0xff] }
 0xed9   :  { %8197 = vmatprep.subr.bf16.mxu1 %v13404_v21  ;;  %v12388_v21 = vpack.c.bf16 %v8465_v7, %v8464_v32  ;;  %v12390_v36 = vpack.c.bf16 %v8483_v34, %v8482_v12 }
 0xedb   :  { %11230 = vmatmul.mubr.msk.bf16.vlgmr.msra.gmra.mrb[80].mxu1 %vm244_vm0, %v8055_v31 }
 0xedc   :  { %8198 = vmatpush1.bf16.msra.mxu1 %v13402_v29  ;;  %8229 = vmatprep.mubr.bf16.mxu1 %v13488_v1  ;;  %v8466_v29 = vld [vmem:[%s16260_s8 + $0x120] sm:$0xff] }
 0xedd   :  { %8199 = vmatprep.subr.bf16.mxu1 %v13407_v37  ;;  %v8484_v37 = vld [vmem:[%s16260_s8 + $0x1b0] sm:$0xff] }
 0xee0   :  { %8200 = vmatpush1.bf16.msra.mxu1 %v13405_v38  ;;  %v8485_v38 = vld [vmem:[%s16260_s8 + $0x1b8] sm:$0xff] }
 0xee1   :  { %8201 = vmatprep.subr.bf16.mxu1 %v13410_v50 }
 0xee4   :  { %8202 = vmatpush1.bf16.msra.mxu1 %v13408_v41 }
 0xee5   :  { %8203 = vmatprep.subr.bf16.mxu1 %v13413_v5  ;;  %v12394_v5 = vpack.c.bf16 %v8485_v38, %v8484_v37  ;;  %v13440_v37 = vld [vmem:[%s16262_s10 + $0x48] sm:$0xff]  }
 0xee8   :  { %8204 = vmatpush1.bf16.msra.mxu1 %v13411_v43  ;;  %v8468_v43 = vld [vmem:[%s16260_s8 + $0x130] sm:$0xff] }
 0xee9   :  { %8344 = vmatprep.subr.bf16.mxu1 %v13416_v18  ;;  %v8469_v18 = vld [vmem:[%s16260_s8 + $0x138] sm:$0xff] }
 0xeeb   :  { %11231 = vmatmul.mubr.msk.bf16.vlgmr.msra.gmra.mrb[76].mxu1 %vm244_vm0, %v8055_v31  ;;  %v8467_v31 = vld [vmem:[%s16260_s8 + $0x128] sm:$0xff] }
 0xeec   :  { %8345 = vmatpush1.bf16.msra.mxu1 %v13414_v44  ;;  %8376 = vmatprep.mubr.bf16.mxu1 %v13488_v1  ;;  %v12392_v50 = vpack.c.bf16 %v8467_v31, %v8466_v29  ;;  %v13439_v29 = vld [vmem:[%s16262_s10] sm:$0xff]  }
 0xeed   :  { %8346 = vmatprep.subr.bf16.mxu1 %v13419_v35  ;;  %v8486_v35 = vld [vmem:[%s16260_s8 + $0x1c0] sm:$0xff] }
 0xef0   :  { %8347 = vmatpush1.bf16.msra.mxu1 %v13417_v45  ;;  %v8487_v45 = vld [vmem:[%s16260_s8 + $0x1c8] sm:$0xff] }
 0xef1   :  { %8348 = vmatprep.subr.bf16.mxu1 %v13422_v14 }
 0xef4   :  { %8349 = vmatpush1.bf16.msra.mxu1 %v13420_v42 }
 0xef5   :  { %8350 = vmatprep.subr.bf16.mxu1 %v13425_v46 }
 0xef8   :  { %8351 = vmatpush1.bf16.msra.mxu1 %v13423_v48  ;;  %v12396_v48 = vpack.c.bf16 %v8469_v18, %v8468_v43  ;;  %v13443_v43 = vld [vmem:[%s16262_s10 + $0x10] sm:$0xff]   ;;  %v13444_v18 = vld [vmem:[%s16262_s10 + $0x58] sm:$0xff]  }
 0xef9   :  { %8385 = vmatprep.subr.bf16.mxu1 %v13428_v26 }
 0xefb   :  { %11264 = vmatmul.mubr.msk.bf16.vlgmr.msra.gmra.mrb[80].mxu1 %vm244_vm0, %v8260_v2 }
 0xefc   :  { %8386 = vmatpush1.bf16.msra.mxu1 %v13426_v52  ;;  %8417 = vmatprep.mubr.bf16.mxu1 %v13488_v1  ;;  %v13435_v1 = vld [vmem:[%s16259_s7 + $0x7e8] ss:$16 sps:$4 sm:$0xff]   ;;  %v12398_v52 = vpack.c.bf16 %v8487_v45, %v8486_v35  ;;  %v13446_v45 = vld [vmem:[%s16262_s10 + $0x60] sm:$0xff]  }
 0xefd   :  { %8387 = vmatprep.subr.bf16.mxu1 %v13431_v23  ;;  %v8471_v23 = vld [vmem:[%s16260_s8 + $0x148] sm:$0xff]  ;;  %v13445_v35 = vld [vmem:[%s16262_s10 + $0x18] sm:$0xff]  }
 0xf00   :  { %8388 = vmatpush1.bf16.msra.mxu1 %v13429_v59  ;;  %v8488_v59 = vld [vmem:[%s16260_s8 + $0x1d0] sm:$0xff] }
 0xf01   :  { %8389 = vmatprep.subr.bf16.mxu1 %v13434_v53  ;;  %v8489_v53 = vld [vmem:[%s16260_s8 + $0x1d8] sm:$0xff] }
 0xf04   :  { %8390 = vmatpush1.bf16.msra.mxu1 %v13432_v17 }
 0xf05   :  { %8391 = vmatprep.subr.bf16.mxu1 %v13437_v54 }
 0xf08   :  { %8392 = vmatpush1.bf16.msra.mxu1 %v13435_v1  ;;  %v12402_v1 = vpack.c.bf16 %v8489_v53, %v8488_v59 }
 0xf0b   :  { %11265 = vmatmul.mubr.msk.bf16.vlgmr.msra.gmra.mrb[76].mxu1 %vm244_vm0, %v8260_v2  ;;  %v8470_v2 = vld [vmem:[%s16260_s8 + $0x140] sm:$0xff] }
 0xf0c   :  { %v12400_v54 = vpack.c.bf16 %v8471_v23, %v8470_v2  ;;  %v13453_v2 = vld [vmem:[%s16262_s10 + $0x38] sm:$0xff]   ;;  %v13454_v23 = vld [vmem:[%s16262_s10 + $0xc0] sm:$0xff]  }
 0xfce   :  { %v8378_v3 = vpop.f32.mrb[80].mxu1 }
 0xfcf   :  { %v15902_v6 = vadd.f32 %v8378_v3, %v15360_v40  ;;  %v8380_v9 = vpop.f32.mrb[81].mxu1  ;;  %v8463_v40 = vld [vmem:[%s16260_s8 + $0x108] sm:$0xff]  ;;  %v12412_v3 = vpack.c.bf16 %v8477_v63, %v8476_v62 }
 0xfd0   :  { %v15905_v20 = vadd.f32 %v8380_v9, %v15362_v39  ;;  %v8382_v10 = vpop.f32.mrb[82].mxu1  ;;  %v8480_v39 = vld [vmem:[%s16260_s8 + $0x190] sm:$0xff]  ;;  %v12384_v28 = vpack.c.bf16 %v8463_v40, %v8462_v19  ;;  %v13491_v19 = vmov 0.0  }
 0xfd1   :  { %v8498_v13 = vmul.f32 %v15902_v6, %v15902_v6  ;;  %v8383_v15 = vpop.f32.mrb[83].mxu1  ;;  %v12386_v4 = vpack.c.bf16 %v8481_v8, %v8480_v39  ;;  %8737 = vmatprep.mubr.f32.mxu1 %v13491_v19  ;;  %v8496_v40 = vld [vmem:[%s16261_s9 + $0x10] sm:$0xff] }
 0xfd2   :  { %v8499_v16 = vmul.f32 %v15905_v20, %v15905_v20  ;;  %v8494_v15 = vld [vmem:[%s16261_s9] sm:$0xff] }
 0xfd3   :  { %v8506_v24 = vrot.slane %v8498_v13, 4  ;;  %v8495_v13 = vld [vmem:[%s16261_s9 + $0x8] sm:$0xff] }
 0xfd4   :  { %v8507_v27 = vrot.slane %v8499_v16, 4  ;;  %v8497_v16 = vld [vmem:[%s16261_s9 + $0x18] sm:$0xff]  ;;  %8673 = vmatprep.subr.mxu1 %v8495_v13  ;;  %v13457_v13 = vld [vmem:[%s16262_s10 + $0x88] sm:$0xff]  }
 0xfd5   :  { %v8515_v25 = vsel %vm8514_vm5, %v15902_v6, %v8506_v24  ;;  %8674 = vmatpush1.msra.mxu1 %v8494_v15  ;;  %v13438_v24 = vld [vmem:[%s16262_s10 + $0x40] sm:$0xff]   ;;  %v13458_v15 = vld [vmem:[%s16262_s10 + $0xd0] sm:$0xff]  }
 0xfd6   :  { %v8516_v30 = vsel %vm8514_vm5, %v15905_v20, %v8507_v27 }
 0xfd7   :  { %8583 = vmatprep.mubr.f32.mxu0 %v8516_v30 }
 0xfd8   :  { %8584 = vmatmul.mubr.f32.vlgmr.msra.gmra.mrb[84].mxu0 %v8515_v25 }
 0xfd9   :  { %12385 = vmatpush3.bf16.msra.mxu0 %v12384_v28 }
 0xfda   :  { %12387 = vmatprep.subr.bf16.mxu0 %v12386_v4 }
 0xfdd   :  { %12389 = vmatpush3.bf16.msra.mxu0 %v12388_v21 }
 0xfde   :  { %v15951_v41 = vpop.f32.mrb[76].mxu1  ;;  %12391 = vmatprep.subr.bf16.mxu0 %v12390_v36 }
 0xfdf   :  { %v15959_v44 = vpop.f32.mrb[77].mxu1  ;;  %v8500_v0 = vmul.f32 %v15951_v41, %v15951_v41 }
 0xfe0   :  { %v8501_v14 = vmul.f32 %v15959_v44, %v15959_v44  ;;  %v8423_v42 = vpop.f32.mrb[78].mxu1 }
 0xfe1   :  { %12393 = vmatpush3.bf16.msra.mxu0 %v12392_v50  ;;  %v8424_v46 = vpop.f32.mrb[79].mxu1  ;;  %v8508_v9 = vrot.slane %v8500_v0, 4  ;;  %v13441_v50 = vld [vmem:[%s16262_s10 + $0x8] sm:$0xff]  }
 0xfe2   :  { %v8509_v26 = vrot.slane %v8501_v14, 4  ;;  %12395 = vmatprep.subr.bf16.mxu0 %v12394_v5  ;;  %v13442_v5 = vld [vmem:[%s16262_s10 + $0x50] sm:$0xff]   ;;  %v13447_v14 = vld [vmem:[%s16262_s10 + $0x20] sm:$0xff]   ;;  %v13448_v42 = vld [vmem:[%s16262_s10 + $0x68] sm:$0xff]  }
 0xfe3   :  { %v8517_v10 = vsel %vm8514_vm5, %v15951_v41, %v8508_v9  ;;  %v13449_v46 = vld [vmem:[%s16262_s10 + $0x28] sm:$0xff]  }
 0xfe4   :  { %v8518_v17 = vsel %vm8514_vm5, %v15959_v44, %v8509_v26  ;;  %v13451_v26 = vld [vmem:[%s16262_s10 + $0x30] sm:$0xff]   ;;  %v13456_v9 = vld [vmem:[%s16262_s10 + $0xc8] sm:$0xff]  }
 0xfe5   :  { %12397 = vmatpush3.bf16.msra.mxu0 %v12396_v48  ;;  %8653 = vmatprep.mubr.f32.mxu0 %v8518_v17  ;;  %v13450_v48 = vld [vmem:[%s16262_s10 + $0x70] sm:$0xff]  }
 0xfe6   :  { %12399 = vmatprep.subr.bf16.mxu0 %v12398_v52  ;;  %v13452_v52 = vld [vmem:[%s16262_s10 + $0x78] sm:$0xff]  }
 0xfe9   :  { %12401 = vmatpush3.bf16.msra.mxu0 %v12400_v54 }
 0xfea   :  { %12403 = vmatprep.subr.bf16.mxu0 %v12402_v1 }
 0xfed   :  { %12405 = vmatpush3.bf16.msra.mxu0 %v12404_v57 }
 0xfee   :  { %12407 = vmatprep.subr.bf16.mxu0 %v12406_v58 }
 0xff1   :  { %12409 = vmatpush3.bf16.msra.mxu0 %v12408_v49 }
 0xff2   :  { %12411 = vmatprep.subr.bf16.mxu0 %v12410_v11 }
 0xff5   :  { %12413 = vmatpush3.bf16.msra.mxu0 %v12412_v3 }
 0xff6   :  { %8744 = vmatprep.subr.mxu0 %v8497_v16  ;;  %v13459_v16 = vld [vmem:[%s16262_s10 + $0x90] sm:$0xff]  }
 0xff8   :  { %8654 = vmatmul.mubr.f32.vlgmr.msra.gmra.mrb[86].mxu0 %v8517_v10 }
 0xff9   :  { %8808 = vmatprep.mubr.f32.mxu0 %v13491_v19  ;;  %8745 = vmatpush1.msra.mxu0 %v8496_v40  ;;  %v13460_v40 = vld [vmem:[%s16262_s10 + $0xd8] sm:$0xff]  }
 0xffa   :  { %11949 = vmatprep.subr.bf16.mxu0 %v13438_v24  ;;  %v13461_v24 = vld [vmem:[%s16262_s10 + $0x98] sm:$0xff]  }
0x10ab   :  { %v11911_v39 = vpop.f32.mrb[84].mxu0 }
0x10ac   :  { %v11912_v8 = vpop.f32.mrb[85].mxu0 }
0x10ad   :  { %v11913_v27 = vadd.f32 %v11912_v8, %v11911_v39  ;;  %v13462_v39 = vld [vmem:[%s16262_s10 + $0xe0] sm:$0xff]  }
0x10ae   :  { %v13463_v8 = vld [vmem:[%s16262_s10 + $0xa0] sm:$0xff]  }
0x10cb   :  { %v11946_v28 = vpop.f32.mrb[86].mxu0 }
0x10cc   :  { %v11947_v30 = vpop.f32.mrb[87].mxu0 }
0x10cd   :  { %v11948_v4 = vadd.f32 %v11947_v30, %v11946_v28  ;;  %v13465_v28 = vld [vmem:[%s16262_s10 + $0xa8] sm:$0xff]   ;;  %v13466_v30 = vld [vmem:[%s16262_s10 + $0xf0] sm:$0xff]  }
0x10cf   :  { %v8656_v32 = vadd.f32 %v11948_v4, %v11913_v27  ;;  %v13464_v27 = vld [vmem:[%s16262_s10 + $0xe8] sm:$0xff]   ;;  %v13467_v4 = vld [vmem:[%s16262_s10 + $0xb0] sm:$0xff]  }
0x10d1   :  { %v8659_v7 = vmul.f32 0.015625, %v8656_v32  ;;  %v13468_v32 = vld [vmem:[%s16262_s10 + $0xf8] sm:$0xff]  }
0x10d3   :  { %v8660_v25 = vmul.f32 %v8659_v7, %v8659_v7 }
0x10d5   :  { %v8662_v12 = vrot.slane %v8660_v25, 4  ;;  %v13469_v25 = vld [vmem:[%s16262_s10 + $0xb8] sm:$0xff]  }
0x10d7   :  { %v8664_v34 = vsub.f32 %v8659_v7, %v8662_v12 }
0x10d9   :  { %v8665_v21 = vmax.f32 %v8664_v34, 0.0 }
0x10db   :  { %v8666_v36 = vadd.f32 1e-05, %v8665_v21  ;;  %v13492_v21 = vmov 0.0|0.0  }
0x10dd   :  { %13482 = vrsqrt.f32 %v8666_v36  ;;  %v9187_v36 = vld [vmem:[%s16263_s11] sm:$0xff] }
0x10e7   :  { %v13483_v31 = vpop.eup %13482 }
0x10e8   :  { %v8668_v38 = vsel %vm8514_vm5, %v8659_v7, %v13483_v31 }
0x10e9   :  { %11266 = vmatmul.mubr.msk.f32.vlgmr.msra.gmra.mrb[74].mxu1 %vm8669_vm6, %v8668_v38  ;;  %11267 = vmatmul.mubr.msk.f32.vlgmr.msra.gmra.mrb[88].mxu0 %vm8669_vm6, %v8668_v38  ;;  %v9190_v38 = vld [vmem:[%s16263_s11 + $0x18] sm:$0xff] }
0x10ea   :  { %11950 = vmatpush3.bf16.msra.mxu0 %v13439_v29  ;;  %v9188_v29 = vld [vmem:[%s16263_s11 + $0x8] sm:$0xff] }
0x10eb   :  { %11951 = vmatprep.subr.bf16.mxu0 %v13440_v37  ;;  %v16139_v31 = vpack.c.bf16 %v9188_v29, %v9187_v36  ;;  %v9189_v37 = vld [vmem:[%s16263_s11 + $0x10] sm:$0xff] }
0x10ee   :  { %11952 = vmatpush3.bf16.msra.mxu0 %v13441_v50  ;;  %v16149_v50 = vpack.c.bf16 %v9190_v38, %v9189_v37 }
0x10ef   :  { %11953 = vmatprep.subr.bf16.mxu0 %v13442_v5  ;;  %v9191_v5 = vld [vmem:[%s16263_s11 + $0x20] sm:$0xff] }
0x10f2   :  { %11954 = vmatpush3.bf16.msra.mxu0 %v13443_v43  ;;  %v9192_v43 = vld [vmem:[%s16263_s11 + $0x28] sm:$0xff] }
0x10f3   :  { %11955 = vmatprep.subr.bf16.mxu0 %v13444_v18  ;;  %v16159_v18 = vpack.c.bf16 %v9192_v43, %v9191_v5 }
0x10f6   :  { %11956 = vmatpush3.bf16.msra.mxu0 %v13445_v35  ;;  %v9193_v35 = vld [vmem:[%s16263_s11 + $0x30] sm:$0xff] }
0x10f7   :  { %11957 = vmatprep.subr.bf16.mxu0 %v13446_v45  ;;  %v9194_v45 = vld [vmem:[%s16263_s11 + $0x38] sm:$0xff] }
0x10fa   :  { %11958 = vmatpush3.bf16.msra.mxu0 %v13447_v14  ;;  %v16169_v14 = vpack.c.bf16 %v9194_v45, %v9193_v35 }
0x10fb   :  { %11959 = vmatprep.subr.bf16.mxu0 %v13448_v42 }
0x10fe   :  { %11960 = vmatpush3.bf16.msra.mxu0 %v13449_v46 }
0x10ff   :  { %11961 = vmatprep.subr.bf16.mxu0 %v13450_v48 }
0x1102   :  { %11962 = vmatpush3.bf16.msra.mxu0 %v13451_v26 }
0x1103   :  { %11963 = vmatprep.subr.bf16.mxu0 %v13452_v52 }
0x1106   :  { %11964 = vmatpush3.bf16.msra.mxu0 %v13453_v2 }
0x1107   :  { %11971 = vmatprep.subr.bf16.mxu0 %v13454_v23 }
0x11bc   :  { %v8739_v59 = vpop.f32.mrb[74].mxu1  ;;  %v8810_v53 = vpop.f32.mrb[88].mxu0 }
0x11bd   :  { %v8815_v17 = vsub.f32 %v15902_v6, %v8739_v59  ;;  %v8823_v54 = vrot.slane %v8739_v59, 4  ;;  %v8817_v1 = vsub.f32 %v15951_v41, %v8810_v53  ;;  %v8825_v55 = vrot.slane %v8810_v53, 4  ;;  %v8741_v33 = vpop.f32.mrb[75].mxu1  ;;  %v8812_v56 = vpop.f32.mrb[89].mxu0 }
0x11be   :  { %v8816_v47 = vsub.f32 %v15905_v20, %v8741_v33  ;;  %v8824_v57 = vrot.slane %v8741_v33, 4  ;;  %v8818_v58 = vsub.f32 %v15959_v44, %v8812_v56  ;;  %v8826_v60 = vrot.slane %v8812_v56, 4  ;;  %v13455_v20 = vld [vmem:[%s16262_s10 + $0x80] sm:$0xff]  }
0x11bf   :  { %v8831_v22 = vmul.f32 %v8823_v54, %v8815_v17  ;;  %v8833_v51 = vmul.f32 %v8825_v55, %v8817_v1  ;;  %v9195_v56 = vld [vmem:[%s16264_s12] sm:$0xff] }
0x11c0   :  { %v8832_v61 = vmul.f32 %v8824_v57, %v8816_v47  ;;  %v8834_v49 = vmul.f32 %v8826_v60, %v8818_v58  ;;  %v9196_v47 = vld [vmem:[%s16264_s12 + $0x8] sm:$0xff] }
0x11c1   :  { %vm8835_vm7 = vcmp.ge.f32.partialorder %v8831_v22, 0.0  ;;  %v8839_v11 = vmul.f32 0.2, %v8831_v22  ;;  %v8841_v7 = vmul.f32 0.2, %v8833_v51  ;;  %vm8837_vm10 = vcmp.ge.f32.partialorder %v8833_v51, 0.0 }
0x11c2   :  { %v8840_v62 = vmul.f32 0.2, %v8832_v61  ;;  %v8842_v6 = vmul.f32 0.2, %v8834_v49  ;;  %vm8836_vm8 = vcmp.ge.f32.partialorder %v8832_v61, 0.0  ;;  %vm8838_vm9 = vcmp.ge.f32.partialorder %v8834_v49, 0.0 }
0x11c3   :  { %v8843_v41 = vsel %vm8835_vm7, %v8831_v22, %v8839_v11  ;;  %v8845_v12 = vsel %vm8837_vm10, %v8833_v51, %v8841_v7  ;;  %v16185_v57 = vpack.c.bf16 %v9196_v47, %v9195_v56 }
0x11c4   :  { %v8844_v63 = vsel %vm8836_vm8, %v8832_v61, %v8840_v62  ;;  %v8846_v0 = vsel %vm8838_vm9, %v8834_v49, %v8842_v6  ;;  %v8847_v44 = vpack.c.bf16 %v8843_v41, %v8843_v41  ;;  %v8849_v34 = vpack.c.bf16 %v8845_v12, %v8845_v12  ;;  %v13470_v6 = vld [vmem:[%s16265_s14] sm:$0xff]  }
0x11c5   :  { %v8848_v3 = vpack.c.bf16 %v8844_v63, %v8844_v63  ;;  %v8850_v10 = vpack.c.bf16 %v8846_v0, %v8846_v0  ;;  %v13471_v0 = vld [vmem:[%s16265_s14 + $0x8] sm:$0xff]  }
0x11c7   :  { %9139 = vmatprep.mubr.bf16.mxu0 %v8848_v3  ;;  %v13472_v3 = vld [vmem:[%s16265_s14 + $0x10] sm:$0xff]  }
0x11c8   :  { %9140 = vmatmul.mubr.bf16.vlgmr.msra.gmra.mrb[92].mxu0 %v8847_v44 }
0x11c9   :  { %11972 = vmatpush3.bf16.msra.mxu0 %v13455_v20  ;;  %9179 = vmatprep.mubr.bf16.mxu0 %v8850_v10  ;;  %v13473_v20 = vld [vmem:[%s16265_s14 + $0x18] sm:$0xff]  }
0x11ca   :  { %11973 = vmatprep.subr.bf16.mxu0 %v13456_v9 }
0x11cd   :  { %11974 = vmatpush3.bf16.msra.mxu0 %v13457_v13 }
0x11ce   :  { %11975 = vmatprep.subr.bf16.mxu0 %v13458_v15 }
0x11d1   :  { %11976 = vmatpush3.bf16.msra.mxu0 %v13459_v16 }
0x11d2   :  { %11977 = vmatprep.subr.bf16.mxu0 %v13460_v40 }
0x11d5   :  { %11978 = vmatpush3.bf16.msra.mxu0 %v13461_v24  ;;  %v13474_v24 = vld [vmem:[%s16266_s13] sm:$0xff]  }
0x11d6   :  { %11979 = vmatprep.subr.bf16.mxu0 %v13462_v39 }
0x11d9   :  { %11980 = vmatpush3.bf16.msra.mxu0 %v13463_v8  ;;  %v13475_v8 = vld [vmem:[%s16266_s13 + $0x8] sm:$0xff]  }
0x11da   :  { %11981 = vmatprep.subr.bf16.mxu0 %v13464_v27  ;;  %v13476_v27 = vld [vmem:[%s16266_s13 + $0x10] sm:$0xff]  }
0x11dd   :  { %11982 = vmatpush3.bf16.msra.mxu0 %v13465_v28  ;;  %v13477_v28 = vld [vmem:[%s16266_s13 + $0x18] sm:$0xff]  }
0x11de   :  { %11983 = vmatprep.subr.bf16.mxu0 %v13466_v30 }
0x11e1   :  { %11984 = vmatpush3.bf16.msra.mxu0 %v13467_v4 }
0x11e2   :  { %11985 = vmatprep.subr.bf16.mxu0 %v13468_v32 }
0x11e5   :  { %11986 = vmatpush3.bf16.msra.mxu0 %v13469_v25 }
0x11e6   :  { %12414 = vmatprep.subr.bf16.mxu0 %v13492_v21 }
0x11e8   :  { %9180 = vmatmul.mubr.bf16.vlgmr.msra.gmra.mrb[96].mxu0 %v8849_v34 }
0x11e9   :  { %12416 = vmatpush3.bf16.msra.mxu0 %v16139_v31  ;;  %12270 = vmatprep.mubr.msk.f32.mxu0 %vm13493_vm12, %v13491_v19 }
0x11ea   :  { %12417 = vmatprep.subr.bf16.mxu0 %v13492_v21 }
0x11ed   :  { %12419 = vmatpush3.bf16.msra.mxu0 %v16149_v50 }
0x11ee   :  { %12420 = vmatprep.subr.bf16.mxu0 %v13492_v21 }
0x11f1   :  { %12422 = vmatpush3.bf16.msra.mxu0 %v16159_v18 }
0x11f2   :  { %12423 = vmatprep.subr.bf16.mxu0 %v13492_v21 }
0x11f5   :  { %12425 = vmatpush3.bf16.msra.mxu0 %v16169_v14 }
0x11f6   :  { %12426 = vmatprep.subr.bf16.mxu0 %v13492_v21 }
0x129b   :  { %v11965_v42 = vpop.f32.mrb[92].mxu0 }
0x129c   :  { %v11966_v46 = vpop.f32.mrb[93].mxu0 }
0x129d   :  { %v11967_v48 = vadd.f32 %v11966_v46, %v11965_v42  ;;  %v11968_v26 = vpop.f32.mrb[94].mxu0 }
0x129e   :  { %v11969_v52 = vpop.f32.mrb[95].mxu0 }
0x12bb   :  { %v11987_v2 = vpop.f32.mrb[96].mxu0 }
0x12bc   :  { %v11988_v23 = vpop.f32.mrb[97].mxu0 }
0x12bd   :  { %v11989_v59 = vadd.f32 %v11988_v23, %v11987_v2  ;;  %v11990_v53 = vpop.f32.mrb[98].mxu0 }
0x12be   :  { %v11991_v17 = vpop.f32.mrb[99].mxu0 }
0x12bf   :  { %v9182_v54 = vadd.f32 %v11989_v59, %v11967_v48 }
0x12c1   :  { %v9197_v1 = vmul.f32 %v9182_v54, %v9182_v54 }
0x12c3   :  { %v9199_v55 = vrot.slane %v9197_v1, 4 }
0x12c5   :  { %v9201_v33 = vsel %vm8514_vm5, %v9182_v54, %v9199_v55  ;;  %v11314_v55 = vld [vmem:[%s16267_s15] ss:$0 sm:$0xff] }
0x12c6   :  { %12271 = vmatmul.mubr.msk.f32.vlgmr.msra.gmra.mrb[90].mxu0 %vm244_vm0, %v9201_v33 }
0x12c7   :  { %12277 = vmatprep.mubr.msk.f32.mxu0 %vm13493_vm12, %v13491_v19  ;;  %12428 = vmatpush3.bf16.msra.mxu0 %v16185_v57 }
0x12c8   :  { %12280 = vmatprep.subr.bf16.mxu0 %v13491_v19 }
0x1399   :  { %v9271_v58 = vpop.f32.mrb[90].mxu0 }
0x139a   :  { %v9275_v60 = vmul.f32 0.25, %v9271_v58  ;;  %v12272_v22 = vpop.f32.mrb[91].mxu0 }
0x139c   :  { %v9276_v51 = vmul.f32 %v9275_v60, %v9275_v60 }
0x139e   :  { %v9278_v61 = vrot.slane %v9276_v51, 4 }
0x13a0   :  { %v9280_v49 = vsub.f32 %v9275_v60, %v9278_v61 }
0x13a2   :  { %v9281_v11 = vmax.f32 %v9280_v49, 0.0 }
0x13a4   :  { %v9282_v62 = vadd.f32 1e-05, %v9281_v11 }
0x13a6   :  { %13484 = vrsqrt.f32 %v9282_v62 }
0x13b0   :  { %v13485_v41 = vpop.eup %13484 }
0x13b1   :  { %v9284_v63 = vsel %vm8514_vm5, %v9275_v60, %v13485_v41 }
0x13b2   :  { %12278 = vmatmul.mubr.msk.f32.vlgmr.msra.gmra.mrb[100].mxu0 %vm5197_vm11, %v9284_v63 }
0x13b3   :  { %12281 = vmatpush3.bf16.msra.mxu0 %v13470_v6  ;;  %12288 = vmatprep.mubr.msk.bf16.mxu0 %vm13493_vm12, %v13491_v19 }
0x13b4   :  { %12282 = vmatprep.subr.bf16.mxu0 %v13491_v19 }
0x13b7   :  { %12283 = vmatpush3.bf16.msra.mxu0 %v13471_v0 }
0x13b8   :  { %12284 = vmatprep.subr.bf16.mxu0 %v13491_v19 }
0x13bb   :  { %12285 = vmatpush3.bf16.msra.mxu0 %v13472_v3 }
0x13bc   :  { %12286 = vmatprep.subr.bf16.mxu0 %v13491_v19 }
0x13bf   :  { %12287 = vmatpush3.bf16.msra.mxu0 %v13473_v20 }
0x13c0   :  { %12292 = vmatprep.subr.bf16.mxu0 %v13491_v19 }
0x1485   :  { %v9354_v44 = vpop.f32.mrb[100].mxu0 }
0x1486   :  { %v9358_v9 = vsub.f32 %v9182_v54, %v9354_v44  ;;  %v9360_v10 = vrot.slane %v9354_v44, 4  ;;  %v12279_v13 = vpop.f32.mrb[101].mxu0 }
0x1488   :  { %v9362_v15 = vmul.f32 %v9360_v10, %v9358_v9 }
0x148a   :  { %vm9363_vm13 = vcmp.ge.f32.partialorder %v9362_v15, 0.0  ;;  %v9364_v16 = vmul.f32 0.2, %v9362_v15 }
0x148c   :  { %v9365_v40 = vsel %vm9363_vm13, %v9362_v15, %v9364_v16 }
0x148d   :  { %v9366_v39 = vpack.c.bf16 %v9365_v40, %v9365_v40 }
0x148f   :  { %12289 = vmatmul.mubr.msk.bf16.vlgmr.msra.gmra.mrb[104].mxu0 %vm244_vm0, %v9366_v39 }
0x1490   :  { %12293 = vmatpush3.bf16.msra.mxu0 %v13474_v24  ;;  %12300 = vmatprep.mubr.msk.bf16.mxu0 %vm13493_vm12, %v13491_v19 }
0x1491   :  { %12294 = vmatprep.subr.bf16.mxu0 %v13491_v19 }
0x1494   :  { %12295 = vmatpush3.bf16.msra.mxu0 %v13475_v8 }
0x1495   :  { %12296 = vmatprep.subr.bf16.mxu0 %v13491_v19 }
0x1498   :  { %12297 = vmatpush3.bf16.msra.mxu0 %v13476_v27 }
0x1499   :  { %12298 = vmatprep.subr.bf16.mxu0 %v13491_v19 }
0x149c   :  { %12299 = vmatpush3.bf16.msra.mxu0 %v13477_v28 }
0x149d   :  { %12429 = vmatprep.subr.bf16.mxu0 %v13492_v21 }
0x149f   :  { %12301 = vmatmul.mubr.msk.bf16.vlgmr.msra.gmra.mrb[108].mxu0 %vm244_vm0, %v9366_v39 }
0x14a0   :  { %12431 = vmatpush3.bf16.msra.mxu0 %v16139_v31  ;;  %12320 = vmatprep.mubr.msk.f32.mxu0 %vm13493_vm12, %v13491_v19 }
0x14a1   :  { %12432 = vmatprep.subr.bf16.mxu0 %v13492_v21 }
0x14a4   :  { %12434 = vmatpush3.bf16.msra.mxu0 %v16149_v50 }
0x14a5   :  { %12435 = vmatprep.subr.bf16.mxu0 %v13492_v21 }
0x14a8   :  { %12437 = vmatpush3.bf16.msra.mxu0 %v16159_v18 }
0x14a9   :  { %12438 = vmatprep.subr.bf16.mxu0 %v13492_v21 }
0x14ac   :  { %12440 = vmatpush3.bf16.msra.mxu0 %v16169_v14 }
0x14ad   :  { %12441 = vmatprep.subr.bf16.mxu0 %v13492_v21 }
0x1562   :  { %v9444_v30 = vpop.f32.mrb[104].mxu0 }
0x1563   :  { %v9451_v4 = vrot.slane %v9444_v30, 4  ;;  %v12290_v32 = vpop.f32.mrb[105].mxu0 }
0x1564   :  { %v9447_v7 = vpop.f32.mrb[106].mxu0 }
0x1565   :  { %v12291_v25 = vpop.f32.mrb[107].mxu0  ;;  %v9452_v12 = vsel %vm9450_vm14, %v9451_v4, %v9444_v30 }
0x1566   :  { %v9453_v34 = vrot.slane %v9452_v12, 4 }
0x1568   :  { %v9454_v36 = vsel %vm9450_vm14, %v9453_v34, %v9444_v30 }
0x1569   :  { %v9480_v29 = vrot.slane %v9454_v36, 2 }
0x1572   :  { %v9516_v31 = vpop.f32.mrb[108].mxu0 }
0x1573   :  { %v9517_v37 = vadd.f32 %v9516_v31, %v9480_v29  ;;  %v12302_v38 = vpop.f32.mrb[109].mxu0 }
0x1574   :  { %v9519_v50 = vpop.f32.mrb[110].mxu0 }
0x1575   :  { %v9522_v5 = vmul.f32 %v9517_v37, %v9517_v37  ;;  %v12303_v43 = vpop.f32.mrb[111].mxu0 }
0x1577   :  { %v9524_v18 = vrot.slane %v9522_v5, 4 }
0x1579   :  { %v9526_v35 = vsel %vm8514_vm5, %v9517_v37, %v9524_v18 }
0x157a   :  { %12321 = vmatmul.mubr.msk.f32.vlgmr.msra.gmra.mrb[102].mxu0 %vm244_vm0, %v9526_v35 }
0x157b   :  { %12443 = vmatpush3.bf16.msra.mxu0 %v16185_v57  ;;  %12327 = vmatprep.mubr.msk.f32.mxu0 %vm13493_vm12, %v13491_v19 }
0x164d   :  { %v9596_v21 = vpop.f32.mrb[102].mxu0 }
0x164e   :  { %v9600_v45 = vmul.f32 0.25, %v9596_v21  ;;  %v12322_v14 = vpop.f32.mrb[103].mxu0 }
0x1650   :  { %v9601_v42 = vmul.f32 %v9600_v45, %v9600_v45 }
0x1652   :  { %v9603_v46 = vrot.slane %v9601_v42, 4 }
0x1654   :  { %v9605_v48 = vsub.f32 %v9600_v45, %v9603_v46 }
0x1656   :  { %v9606_v26 = vmax.f32 %v9605_v48, 0.0 }
0x1658   :  { %v9607_v52 = vadd.f32 1e-05, %v9606_v26 }
0x165a   :  { %13486 = vrsqrt.f32 %v9607_v52 }
0x1664   :  { %v13487_v2 = vpop.eup %13486 }
0x1665   :  { %v9609_v23 = vsel %vm8514_vm5, %v9600_v45, %v13487_v2 }
0x1666   :  { %12328 = vmatmul.mubr.msk.f32.vlgmr.msra.gmra.mrb[112].mxu0 %vm5197_vm11, %v9609_v23  ;;  %vm9708_vm11 = vcmask 1024  }
0x1739   :  { %v9679_v59 = vpop.f32.mrb[112].mxu0 }
0x173a   :  { %v9683_v53 = vsub.f32 %v9517_v37, %v9679_v59  ;;  %v9685_v17 = vrot.slane %v9679_v59, 4  ;;  %v12329_v54 = vpop.f32.mrb[113].mxu0 }
0x173c   :  { %v9687_v1 = vmul.f32 %v9685_v17, %v9683_v53 }
0x173e   :  { %vm9688_vm0 = vcmp.ge.f32.partialorder %v9687_v1, 0.0  ;;  %v9689_v19 = vmul.f32 0.2, %v9687_v1 }
0x1740   :  { %v9690_v33 = vsel %vm9688_vm0, %v9687_v1, %v9689_v19 }
0x1741   :  { %v9698_v56 = vmul.f32 %v11314_v55, %v9690_v33 }
0x1743   :  { %v9700_v47 = vsel %vm9699_vm15, %v9698_v56, 0.0 }
0x1744   :  { %9701 = vadd.xlane.f32.xlu0 %v9700_v47 }
0x17d1   :  { %v9702_v57 = vpop.xlane.xlu0 %9701 }
0x17d2   :  { %v9704_v58 = vrot.slane %v9702_v57, 2 }
0x17d4   :  { %v9706_v60 = vsub.f32 %v9702_v57, %v9704_v58 }
0x17d6   :  { %v9707_v22 = vmul.f32 0.5, %v9706_v60 }
0x17d8   :  { %9709 = vst.msk [vmem:[%s16268_s16] sm:$0x3] %vm9708_vm11, %v9707_v22 }

</bundles_post_ra>
